<compile_context>
chip_gen: v5e
topology: v5e:2x2
jax: 0.10.0
libtpu: 0.0.40
codegen_flags: <defaults>
</compile_context>

<pallas_src>
import numpy as np
import jax
import jax.numpy as jnp
from jax import lax
from jax.experimental import pallas as pl
from jax.experimental.pallas import tpu as pltpu

LANE = 128


def _round_up(x, m):
    return (x + m - 1) // m * m


# ----------------------------------------------------------------------------
# Fused kernel: one-hot embedding (feature row included) -> stacked LSTM ->
# vocab projection.  Everything stays in vregs; single lane-dense output store.
# ----------------------------------------------------------------------------
def make_decoder_kernel(num_layers, L, H_pad):
    def kernel(caps_ref, table_ref, *rest):
        lstm_refs = rest[:3 * num_layers]            # (wih, whh, b) per layer
        w_lin_ref = rest[3 * num_layers]             # (H_pad, Vout_pad) bf16
        b_lin_ref = rest[3 * num_layers + 1]         # (1, Vout_pad)     f32
        out_ref = rest[3 * num_layers + 2]           # (L, Vout_pad)     f32

        # --- LSTM input: one aligned one-hot MXU matmul.  Row 0 of the token-id
        # vector points at the image-feature row appended to the table, so the
        # "concat" is free.  Out-of-range ids give an all-zero row (nn.Embedding
        # would raise; intentional deviation).
        v_rows = table_ref.shape[0]
        iota = lax.broadcasted_iota(jnp.int32, (L, v_rows), 1)
        one_hot = (caps_ref[...] == iota).astype(jnp.bfloat16)          # (L, Vrows)
        x = jnp.dot(one_hot, table_ref[...],
                    preferred_element_type=jnp.float32)                 # (L, E_pad) f32
        # TODO(synk): nn.Dropout(0.5) is eval-mode identity here; training mode
        # would need pltpu.prng_seed / prng_random_bits masking.

        # --- Stacked LSTM; recurrence fully unrolled (L is tiny), h/c stay f32.
        for layer in range(num_layers):
            wih = lstm_refs[3 * layer][...]          # (in_pad, 4*H_pad) bf16 (i/f/o *0.5)
            whh = lstm_refs[3 * layer + 1][...]      # (H_pad, 4*H_pad)  bf16 (i/f/o *0.5)
            b = lstm_refs[3 * layer + 2][...]        # (1, 4*H_pad)      f32  (i/f/o *0.5)

            # Input projection for all timesteps in one bf16 MXU matmul, f32 acc.
            xg = jnp.dot(x.astype(jnp.bfloat16), wih,
                         preferred_element_type=jnp.float32) + b        # (L, 4*H_pad)

            h = jnp.zeros((1, H_pad), jnp.float32)
            c = jnp.zeros((1, H_pad), jnp.float32)
            rows = []
            for t in range(L):                       # static unroll, static slices
                g = xg[t:t + 1, :] + jnp.dot(h.astype(jnp.bfloat16), whh,
                                             preferred_element_type=jnp.float32)
                # One EUP tanh for all four gate blocks (i/f/o pre-scaled by 0.5
                # in the wrapper, so sigmoid(z) == 0.5*(tanh(z/2)+1) pops out).
                a = jnp.tanh(g)                                           # (1, 4*H_pad)
                i_g = 0.5 * (a[:, 0 * H_pad:1 * H_pad] + 1.0)
                f_g = 0.5 * (a[:, 1 * H_pad:2 * H_pad] + 1.0)
                g_g = a[:, 2 * H_pad:3 * H_pad]
                o_g = 0.5 * (a[:, 3 * H_pad:4 * H_pad] + 1.0)
                c = f_g * c + i_g * g_g
                h = o_g * jnp.tanh(c)
                rows.append(h)                       # stays in vregs (no VMEM bounce)
            x = jnp.concatenate(rows, axis=0)        # (L, H_pad) hidden sequence

        # --- Vocab projection: one bulk lane-dense store of the (padded) logits.
        out_ref[...] = (
            jnp.dot(x.astype(jnp.bfloat16), w_lin_ref[...],
                    preferred_element_type=jnp.float32) + b_lin_ref[...]
        ).astype(out_ref.dtype)

    return kernel


# ----------------------------------------------------------------------------
# Wrapper: padding / gate re-layout / bf16 cast + single pallas_call dispatch.
# ----------------------------------------------------------------------------
def decoder_rnn_forward(params, feature, captions):
    embed = params["embed"]                          # (V, E) f32
    V, E = embed.shape
    T = int(captions.shape[0])
    L = T + 1
    lstm = params["lstm"]
    num_layers = len(lstm)
    H = lstm[0][1].shape[0]
    w_lin_t, b_lin = params["linear"]
    Vout = w_lin_t.shape[1]

    E_pad = _round_up(E, LANE)
    H_pad = _round_up(H, LANE)
    Vout_pad = _round_up(Vout, LANE)
    Vrows_pad = _round_up(V + 1, LANE)               # +1 row for the image feature

    f32, bf16 = jnp.float32, jnp.bfloat16

    # Augmented, padded embedding table: rows [0,V) = table, row V = image feature.
    feat_row = feature.reshape(1, E).astype(f32)     # feature.squeeze(1) -> (1, E)
    table_aug = jnp.zeros((Vrows_pad, E_pad), f32)
    table_aug = table_aug.at[:V, :E].set(embed)
    table_aug = table_aug.at[V, :E].set(feat_row[0])
    table_aug = table_aug.astype(bf16)

    # Token ids: row 0 selects the feature row, rows 1..T the caption tokens.
    caps_aug = jnp.concatenate(
        [jnp.full((1,), V, jnp.int32), captions.astype(jnp.int32)]).reshape(L, 1)

    # Gate blocks -> lane-aligned H_pad slots; i/f/o columns pre-scaled by 0.5 so a
    # single in-kernel tanh yields all four gates.  Zero padding keeps padded lanes
    # of h/c exactly zero through the recurrence.
    def pad_gates(w, rows, rows_pad, dtype):
        out = jnp.zeros((rows_pad, 4 * H_pad), f32)
        for k in range(4):
            blk = w[:, k * H:(k + 1) * H]
            if k != 2:                               # i, f, o gates (PyTorch order i,f,g,o)
                blk = blk * 0.5
            out = out.at[:rows, k * H_pad:k * H_pad + H].set(blk)
        return out.astype(dtype)

    flat_lstm = []
    in_size, in_pad = E, E_pad
    for (wih_t, whh_t, b) in lstm:
        flat_lstm.append(pad_gates(wih_t, in_size, in_pad, bf16))     # (in_pad, 4H_pad)
        flat_lstm.append(pad_gates(whh_t, H, H_pad, bf16))            # (H_pad, 4H_pad)
        flat_lstm.append(pad_gates(b, 1, 1, f32))                     # (1, 4H_pad)
        in_size, in_pad = H, H_pad

    w_lin_p = jnp.zeros((H_pad, Vout_pad), f32).at[:H, :Vout].set(w_lin_t).astype(bf16)
    b_lin_p = jnp.zeros((1, Vout_pad), f32).at[:, :Vout].set(b_lin)

    inputs = [caps_aug, table_aug, *flat_lstm, w_lin_p, b_lin_p]

    # Per-generation VMEM budget (v5e/v6e: 128 MiB physical, v7x: 64 MiB per TC);
    # leave headroom for pipeline buffers / internal scratch.
    footprint = (sum(int(a.size) * a.dtype.itemsize for a in inputs)
                 + L * Vout_pad * 4)
    try:
        phys_vmem = int(pltpu.get_tpu_info().vmem_capacity_bytes)
    except Exception:
        phys_vmem = 64 << 20                         # conservative fallback (v7x per-TC)
    vmem_limit = int(min(max(4 * footprint, 4 << 20), (phys_vmem * 3) // 4))

    kernel = make_decoder_kernel(num_layers, L, H_pad)
    vmem_spec = pl.BlockSpec(memory_space=pltpu.MemorySpace.VMEM)

    logits_padded = pl.pallas_call(
        kernel,
        out_shape=jax.ShapeDtypeStruct((L, Vout_pad), jnp.float32),
        in_specs=[vmem_spec] * len(inputs),
        out_specs=vmem_spec,
        compiler_params=pltpu.CompilerParams(vmem_limit_bytes=vmem_limit),
    )(*inputs)

    return logits_padded[:, :Vout]                   # drop padded vocab columns


# ----------------------------------------------------------------------------
# Pure-JAX f32 reference (mirrors the PyTorch module) for correctness check.
# ----------------------------------------------------------------------------
def reference_forward(params, feature, captions):
    emb = params["embed"][captions]                  # (T, E)
    x = jnp.concatenate([feature.reshape(1, -1), emb], axis=0)
    h_seq = x
    for wih_t, whh_t, b in params["lstm"]:
        H = whh_t.shape[0]
        xg = h_seq @ wih_t + b                       # (L, 4H)

        def step(carry, g_x):
            h, c = carry
            g = g_x + h @ whh_t
            i = jax.nn.sigmoid(g[:, :H])
            f = jax.nn.sigmoid(g[:, H:2 * H])
            gg = jnp.tanh(g[:, 2 * H:3 * H])
            o = jax.nn.sigmoid(g[:, 3 * H:])
            c = f * c + i * gg
            h = o * jnp.tanh(c)
            return (h, c), h

        (_, _), hs = lax.scan(
            step,
            (jnp.zeros((1, H), jnp.float32), jnp.zeros((1, H), jnp.float32)),
            xg[:, None, :],
        )
        h_seq = hs[:, 0, :]
    w_lin_t, b_lin = params["linear"]
    return h_seq @ w_lin_t + b_lin


# ----------------------------------------------------------------------------
# Deterministic parameter init (shapes follow the nn.Module __init__).
# ----------------------------------------------------------------------------
def init_params(key, embed_size, hidden_size, vocab_size, num_layers):
    scale = 0.1
    keys = jax.random.split(key, 2 + num_layers)
    embed = jax.random.uniform(
        keys[0], (vocab_size, embed_size), jnp.float32, -scale, scale)
    lstm = []
    in_size = embed_size
    for l in range(num_layers):
        k1, k2, k3 = jax.random.split(keys[1 + l], 3)
        wih_t = jax.random.uniform(
            k1, (in_size, 4 * hidden_size), jnp.float32, -scale, scale)
        whh_t = jax.random.uniform(
            k2, (hidden_size, 4 * hidden_size), jnp.float32, -scale, scale)
        b = jax.random.uniform(
            k3, (1, 4 * hidden_size), jnp.float32, -scale, scale)  # b_ih + b_hh combined
        lstm.append((wih_t, whh_t, b))
        in_size = hidden_size
    kl1, kl2 = jax.random.split(keys[1 + num_layers], 2)
    w_lin_t = jax.random.uniform(
        kl1, (hidden_size, vocab_size), jnp.float32, -scale, scale)
    b_lin = jax.random.uniform(kl2, (1, vocab_size), jnp.float32, -scale, scale)
    return {"embed": embed, "lstm": lstm, "linear": (w_lin_t, b_lin)}


if __name__ == "__main__":
    embed_size, hidden_size, vocab_size, num_layers = 32, 32, 64, 2
    T = 8  # caption length; LSTM sequence length is T + 1 (prepended image feature)

    key = jax.random.PRNGKey(0)
    kp, kf, kc = jax.random.split(key, 3)
    params = init_params(kp, embed_size, hidden_size, vocab_size, num_layers)
    feature = jax.random.normal(kf, (1, 1, embed_size), jnp.float32)
    captions = jax.random.randint(kc, (T,), 0, vocab_size, dtype=jnp.int32)

    logits = decoder_rnn_forward(params, feature, captions)
    logits = jax.block_until_ready(logits)

    ref = reference_forward(params, feature, captions)
    assert logits.shape == (T + 1, vocab_size)
    # Kernel feeds bf16 operands to the MXU (f32 accumulation / f32 state), so
    # compare against the pure-f32 reference with a bf16-appropriate tolerance.
    np.testing.assert_allclose(np.asarray(logits), np.asarray(ref),
                               rtol=1e-2, atol=1e-2)
    print("KERNEL_OK")
</pallas_src>

<mosaic_0001>
module attributes {stable_mosaic.version = 11 : i64} {
  func.func @kernel(%arg0: memref<9x1xi32, #tpu.memory_space<vmem>>, %arg1: memref<128x128xbf16, #tpu.memory_space<vmem>>, %arg2: memref<128x512xbf16, #tpu.memory_space<vmem>>, %arg3: memref<128x512xbf16, #tpu.memory_space<vmem>>, %arg4: memref<1x512xf32, #tpu.memory_space<vmem>>, %arg5: memref<128x512xbf16, #tpu.memory_space<vmem>>, %arg6: memref<128x512xbf16, #tpu.memory_space<vmem>>, %arg7: memref<1x512xf32, #tpu.memory_space<vmem>>, %arg8: memref<128x128xbf16, #tpu.memory_space<vmem>>, %arg9: memref<1x128xf32, #tpu.memory_space<vmem>>, %arg10: memref<9x128xf32, #tpu.memory_space<vmem>>) attributes {dimension_semantics = [], scalar_prefetch = 0 : i64, scratch_operands = 0 : i64, tpu.core_type = #tpu.core_type<tc>} {
    %0 = tpu.iota {dimensions = array<i32: 1>} : vector<9x128xi32>
    %c0 = arith.constant 0 : index
    %c0_0 = arith.constant 0 : index
    %1 = vector.load %arg0[%c0, %c0_0] : memref<9x1xi32, #tpu.memory_space<vmem>>, vector<9x1xi32>
    %2 = vector.broadcast %1 : vector<9x1xi32> to vector<9x128xi32>
    %3 = arith.cmpi eq, %2, %0 : vector<9x128xi32>
    %4 = arith.extui %3 : vector<9x128xi1> to vector<9x128xi32>
    %5 = arith.sitofp %4 : vector<9x128xi32> to vector<9x128xf32>
    %6 = arith.truncf %5 : vector<9x128xf32> to vector<9x128xbf16>
    %c0_1 = arith.constant 0 : index
    %c0_2 = arith.constant 0 : index
    %7 = vector.load %arg1[%c0_1, %c0_2] : memref<128x128xbf16, #tpu.memory_space<vmem>>, vector<128x128xbf16>
    %cst = arith.constant dense<0.000000e+00> : vector<9x128xf32>
    %8 = tpu.matmul %6, %7, %cst {dimension_numbers = #tpu.dot_dimension_numbers<[1], [0], [0], [1], [0, 0, 1, 1], [], []>} : vector<9x128xbf16>, vector<128x128xbf16>, vector<9x128xf32> -> vector<9x128xf32>
    %c0_3 = arith.constant 0 : index
    %c0_4 = arith.constant 0 : index
    %9 = vector.load %arg2[%c0_3, %c0_4] : memref<128x512xbf16, #tpu.memory_space<vmem>>, vector<128x512xbf16>
    %c0_5 = arith.constant 0 : index
    %c0_6 = arith.constant 0 : index
    %10 = vector.load %arg3[%c0_5, %c0_6] : memref<128x512xbf16, #tpu.memory_space<vmem>>, vector<128x512xbf16>
    %c0_7 = arith.constant 0 : index
    %c0_8 = arith.constant 0 : index
    %11 = vector.load %arg4[%c0_7, %c0_8] : memref<1x512xf32, #tpu.memory_space<vmem>>, vector<1x512xf32>
    %12 = arith.truncf %8 : vector<9x128xf32> to vector<9x128xbf16>
    %cst_9 = arith.constant dense<0.000000e+00> : vector<9x512xf32>
    %13 = tpu.matmul %12, %9, %cst_9 {dimension_numbers = #tpu.dot_dimension_numbers<[1], [0], [0], [1], [0, 0, 1, 1], [], []>} : vector<9x128xbf16>, vector<128x512xbf16>, vector<9x512xf32> -> vector<9x512xf32>
    %14 = vector.broadcast %11 : vector<1x512xf32> to vector<9x512xf32>
    %15 = arith.addf %13, %14 : vector<9x512xf32>
    %cst_10 = arith.constant 0.000000e+00 : f32
    %16 = vector.broadcast %cst_10 : f32 to vector<1x128xf32>
    %cst_11 = arith.constant 0.000000e+00 : f32
    %17 = vector.broadcast %cst_11 : f32 to vector<1x128xf32>
    %18 = vector.extract_strided_slice %15 {offsets = [0, 0], sizes = [1, 512], strides = [1, 1]} : vector<9x512xf32> to vector<1x512xf32>
    %19 = arith.truncf %16 : vector<1x128xf32> to vector<1x128xbf16>
    %cst_12 = arith.constant dense<0.000000e+00> : vector<1x512xf32>
    %20 = tpu.matmul %19, %10, %cst_12 {dimension_numbers = #tpu.dot_dimension_numbers<[1], [0], [0], [1], [0, 0, 1, 1], [], []>} : vector<1x128xbf16>, vector<128x512xbf16>, vector<1x512xf32> -> vector<1x512xf32>
    %21 = arith.addf %18, %20 : vector<1x512xf32>
    %22 = math.tanh %21 : vector<1x512xf32>
    %23 = vector.extract_strided_slice %22 {offsets = [0, 0], sizes = [1, 128], strides = [1, 1]} : vector<1x512xf32> to vector<1x128xf32>
    %cst_13 = arith.constant 1.000000e+00 : f32
    %24 = vector.broadcast %cst_13 : f32 to vector<1x128xf32>
    %25 = arith.addf %23, %24 : vector<1x128xf32>
    %cst_14 = arith.constant 5.000000e-01 : f32
    %26 = vector.broadcast %cst_14 : f32 to vector<1x128xf32>
    %27 = arith.mulf %26, %25 : vector<1x128xf32>
    %28 = vector.extract_strided_slice %22 {offsets = [0, 128], sizes = [1, 128], strides = [1, 1]} : vector<1x512xf32> to vector<1x128xf32>
    %cst_15 = arith.constant 1.000000e+00 : f32
    %29 = vector.broadcast %cst_15 : f32 to vector<1x128xf32>
    %30 = arith.addf %28, %29 : vector<1x128xf32>
    %cst_16 = arith.constant 5.000000e-01 : f32
    %31 = vector.broadcast %cst_16 : f32 to vector<1x128xf32>
    %32 = arith.mulf %31, %30 : vector<1x128xf32>
    %33 = vector.extract_strided_slice %22 {offsets = [0, 256], sizes = [1, 128], strides = [1, 1]} : vector<1x512xf32> to vector<1x128xf32>
    %34 = vector.extract_strided_slice %22 {offsets = [0, 384], sizes = [1, 128], strides = [1, 1]} : vector<1x512xf32> to vector<1x128xf32>
    %cst_17 = arith.constant 1.000000e+00 : f32
    %35 = vector.broadcast %cst_17 : f32 to vector<1x128xf32>
    %36 = arith.addf %34, %35 : vector<1x128xf32>
    %cst_18 = arith.constant 5.000000e-01 : f32
    %37 = vector.broadcast %cst_18 : f32 to vector<1x128xf32>
    %38 = arith.mulf %37, %36 : vector<1x128xf32>
    %39 = arith.mulf %32, %17 : vector<1x128xf32>
    %40 = arith.mulf %27, %33 : vector<1x128xf32>
    %41 = arith.addf %39, %40 : vector<1x128xf32>
    %42 = math.tanh %41 : vector<1x128xf32>
    %43 = arith.mulf %38, %42 : vector<1x128xf32>
    %44 = vector.extract_strided_slice %15 {offsets = [1, 0], sizes = [1, 512], strides = [1, 1]} : vector<9x512xf32> to vector<1x512xf32>
    %45 = arith.truncf %43 : vector<1x128xf32> to vector<1x128xbf16>
    %cst_19 = arith.constant dense<0.000000e+00> : vector<1x512xf32>
    %46 = tpu.matmul %45, %10, %cst_19 {dimension_numbers = #tpu.dot_dimension_numbers<[1], [0], [0], [1], [0, 0, 1, 1], [], []>} : vector<1x128xbf16>, vector<128x512xbf16>, vector<1x512xf32> -> vector<1x512xf32>
    %47 = arith.addf %44, %46 : vector<1x512xf32>
    %48 = math.tanh %47 : vector<1x512xf32>
    %49 = vector.extract_strided_slice %48 {offsets = [0, 0], sizes = [1, 128], strides = [1, 1]} : vector<1x512xf32> to vector<1x128xf32>
    %cst_20 = arith.constant 1.000000e+00 : f32
    %50 = vector.broadcast %cst_20 : f32 to vector<1x128xf32>
    %51 = arith.addf %49, %50 : vector<1x128xf32>
    %cst_21 = arith.constant 5.000000e-01 : f32
    %52 = vector.broadcast %cst_21 : f32 to vector<1x128xf32>
    %53 = arith.mulf %52, %51 : vector<1x128xf32>
    %54 = vector.extract_strided_slice %48 {offsets = [0, 128], sizes = [1, 128], strides = [1, 1]} : vector<1x512xf32> to vector<1x128xf32>
    %cst_22 = arith.constant 1.000000e+00 : f32
    %55 = vector.broadcast %cst_22 : f32 to vector<1x128xf32>
    %56 = arith.addf %54, %55 : vector<1x128xf32>
    %cst_23 = arith.constant 5.000000e-01 : f32
    %57 = vector.broadcast %cst_23 : f32 to vector<1x128xf32>
    %58 = arith.mulf %57, %56 : vector<1x128xf32>
    %59 = vector.extract_strided_slice %48 {offsets = [0, 256], sizes = [1, 128], strides = [1, 1]} : vector<1x512xf32> to vector<1x128xf32>
    %60 = vector.extract_strided_slice %48 {offsets = [0, 384], sizes = [1, 128], strides = [1, 1]} : vector<1x512xf32> to vector<1x128xf32>
    %cst_24 = arith.constant 1.000000e+00 : f32
    %61 = vector.broadcast %cst_24 : f32 to vector<1x128xf32>
    %62 = arith.addf %60, %61 : vector<1x128xf32>
    %cst_25 = arith.constant 5.000000e-01 : f32
    %63 = vector.broadcast %cst_25 : f32 to vector<1x128xf32>
    %64 = arith.mulf %63, %62 : vector<1x128xf32>
    %65 = arith.mulf %58, %41 : vector<1x128xf32>
    %66 = arith.mulf %53, %59 : vector<1x128xf32>
    %67 = arith.addf %65, %66 : vector<1x128xf32>
    %68 = math.tanh %67 : vector<1x128xf32>
    %69 = arith.mulf %64, %68 : vector<1x128xf32>
    %70 = vector.extract_strided_slice %15 {offsets = [2, 0], sizes = [1, 512], strides = [1, 1]} : vector<9x512xf32> to vector<1x512xf32>
    %71 = arith.truncf %69 : vector<1x128xf32> to vector<1x128xbf16>
    %cst_26 = arith.constant dense<0.000000e+00> : vector<1x512xf32>
    %72 = tpu.matmul %71, %10, %cst_26 {dimension_numbers = #tpu.dot_dimension_numbers<[1], [0], [0], [1], [0, 0, 1, 1], [], []>} : vector<1x128xbf16>, vector<128x512xbf16>, vector<1x512xf32> -> vector<1x512xf32>
    %73 = arith.addf %70, %72 : vector<1x512xf32>
    %74 = math.tanh %73 : vector<1x512xf32>
    %75 = vector.extract_strided_slice %74 {offsets = [0, 0], sizes = [1, 128], strides = [1, 1]} : vector<1x512xf32> to vector<1x128xf32>
    %cst_27 = arith.constant 1.000000e+00 : f32
    %76 = vector.broadcast %cst_27 : f32 to vector<1x128xf32>
    %77 = arith.addf %75, %76 : vector<1x128xf32>
    %cst_28 = arith.constant 5.000000e-01 : f32
    %78 = vector.broadcast %cst_28 : f32 to vector<1x128xf32>
    %79 = arith.mulf %78, %77 : vector<1x128xf32>
    %80 = vector.extract_strided_slice %74 {offsets = [0, 128], sizes = [1, 128], strides = [1, 1]} : vector<1x512xf32> to vector<1x128xf32>
    %cst_29 = arith.constant 1.000000e+00 : f32
    %81 = vector.broadcast %cst_29 : f32 to vector<1x128xf32>
    %82 = arith.addf %80, %81 : vector<1x128xf32>
    %cst_30 = arith.constant 5.000000e-01 : f32
    %83 = vector.broadcast %cst_30 : f32 to vector<1x128xf32>
    %84 = arith.mulf %83, %82 : vector<1x128xf32>
    %85 = vector.extract_strided_slice %74 {offsets = [0, 256], sizes = [1, 128], strides = [1, 1]} : vector<1x512xf32> to vector<1x128xf32>
    %86 = vector.extract_strided_slice %74 {offsets = [0, 384], sizes = [1, 128], strides = [1, 1]} : vector<1x512xf32> to vector<1x128xf32>
    %cst_31 = arith.constant 1.000000e+00 : f32
    %87 = vector.broadcast %cst_31 : f32 to vector<1x128xf32>
    %88 = arith.addf %86, %87 : vector<1x128xf32>
    %cst_32 = arith.constant 5.000000e-01 : f32
    %89 = vector.broadcast %cst_32 : f32 to vector<1x128xf32>
    %90 = arith.mulf %89, %88 : vector<1x128xf32>
    %91 = arith.mulf %84, %67 : vector<1x128xf32>
    %92 = arith.mulf %79, %85 : vector<1x128xf32>
    %93 = arith.addf %91, %92 : vector<1x128xf32>
    %94 = math.tanh %93 : vector<1x128xf32>
    %95 = arith.mulf %90, %94 : vector<1x128xf32>
    %96 = vector.extract_strided_slice %15 {offsets = [3, 0], sizes = [1, 512], strides = [1, 1]} : vector<9x512xf32> to vector<1x512xf32>
    %97 = arith.truncf %95 : vector<1x128xf32> to vector<1x128xbf16>
    %cst_33 = arith.constant dense<0.000000e+00> : vector<1x512xf32>
    %98 = tpu.matmul %97, %10, %cst_33 {dimension_numbers = #tpu.dot_dimension_numbers<[1], [0], [0], [1], [0, 0, 1, 1], [], []>} : vector<1x128xbf16>, vector<128x512xbf16>, vector<1x512xf32> -> vector<1x512xf32>
    %99 = arith.addf %96, %98 : vector<1x512xf32>
    %100 = math.tanh %99 : vector<1x512xf32>
    %101 = vector.extract_strided_slice %100 {offsets = [0, 0], sizes = [1, 128], strides = [1, 1]} : vector<1x512xf32> to vector<1x128xf32>
    %cst_34 = arith.constant 1.000000e+00 : f32
    %102 = vector.broadcast %cst_34 : f32 to vector<1x128xf32>
    %103 = arith.addf %101, %102 : vector<1x128xf32>
    %cst_35 = arith.constant 5.000000e-01 : f32
    %104 = vector.broadcast %cst_35 : f32 to vector<1x128xf32>
    %105 = arith.mulf %104, %103 : vector<1x128xf32>
    %106 = vector.extract_strided_slice %100 {offsets = [0, 128], sizes = [1, 128], strides = [1, 1]} : vector<1x512xf32> to vector<1x128xf32>
    %cst_36 = arith.constant 1.000000e+00 : f32
    %107 = vector.broadcast %cst_36 : f32 to vector<1x128xf32>
    %108 = arith.addf %106, %107 : vector<1x128xf32>
    %cst_37 = arith.constant 5.000000e-01 : f32
    %109 = vector.broadcast %cst_37 : f32 to vector<1x128xf32>
    %110 = arith.mulf %109, %108 : vector<1x128xf32>
    %111 = vector.extract_strided_slice %100 {offsets = [0, 256], sizes = [1, 128], strides = [1, 1]} : vector<1x512xf32> to vector<1x128xf32>
    %112 = vector.extract_strided_slice %100 {offsets = [0, 384], sizes = [1, 128], strides = [1, 1]} : vector<1x512xf32> to vector<1x128xf32>
    %cst_38 = arith.constant 1.000000e+00 : f32
    %113 = vector.broadcast %cst_38 : f32 to vector<1x128xf32>
    %114 = arith.addf %112, %113 : vector<1x128xf32>
    %cst_39 = arith.constant 5.000000e-01 : f32
    %115 = vector.broadcast %cst_39 : f32 to vector<1x128xf32>
    %116 = arith.mulf %115, %114 : vector<1x128xf32>
    %117 = arith.mulf %110, %93 : vector<1x128xf32>
    %118 = arith.mulf %105, %111 : vector<1x128xf32>
    %119 = arith.addf %117, %118 : vector<1x128xf32>
    %120 = math.tanh %119 : vector<1x128xf32>
    %121 = arith.mulf %116, %120 : vector<1x128xf32>
    %122 = vector.extract_strided_slice %15 {offsets = [4, 0], sizes = [1, 512], strides = [1, 1]} : vector<9x512xf32> to vector<1x512xf32>
    %123 = arith.truncf %121 : vector<1x128xf32> to vector<1x128xbf16>
    %cst_40 = arith.constant dense<0.000000e+00> : vector<1x512xf32>
    %124 = tpu.matmul %123, %10, %cst_40 {dimension_numbers = #tpu.dot_dimension_numbers<[1], [0], [0], [1], [0, 0, 1, 1], [], []>} : vector<1x128xbf16>, vector<128x512xbf16>, vector<1x512xf32> -> vector<1x512xf32>
    %125 = arith.addf %122, %124 : vector<1x512xf32>
    %126 = math.tanh %125 : vector<1x512xf32>
    %127 = vector.extract_strided_slice %126 {offsets = [0, 0], sizes = [1, 128], strides = [1, 1]} : vector<1x512xf32> to vector<1x128xf32>
    %cst_41 = arith.constant 1.000000e+00 : f32
    %128 = vector.broadcast %cst_41 : f32 to vector<1x128xf32>
    %129 = arith.addf %127, %128 : vector<1x128xf32>
    %cst_42 = arith.constant 5.000000e-01 : f32
    %130 = vector.broadcast %cst_42 : f32 to vector<1x128xf32>
    %131 = arith.mulf %130, %129 : vector<1x128xf32>
    %132 = vector.extract_strided_slice %126 {offsets = [0, 128], sizes = [1, 128], strides = [1, 1]} : vector<1x512xf32> to vector<1x128xf32>
    %cst_43 = arith.constant 1.000000e+00 : f32
    %133 = vector.broadcast %cst_43 : f32 to vector<1x128xf32>
    %134 = arith.addf %132, %133 : vector<1x128xf32>
    %cst_44 = arith.constant 5.000000e-01 : f32
    %135 = vector.broadcast %cst_44 : f32 to vector<1x128xf32>
    %136 = arith.mulf %135, %134 : vector<1x128xf32>
    %137 = vector.extract_strided_slice %126 {offsets = [0, 256], sizes = [1, 128], strides = [1, 1]} : vector<1x512xf32> to vector<1x128xf32>
    %138 = vector.extract_strided_slice %126 {offsets = [0, 384], sizes = [1, 128], strides = [1, 1]} : vector<1x512xf32> to vector<1x128xf32>
    %cst_45 = arith.constant 1.000000e+00 : f32
    %139 = vector.broadcast %cst_45 : f32 to vector<1x128xf32>
    %140 = arith.addf %138, %139 : vector<1x128xf32>
    %cst_46 = arith.constant 5.000000e-01 : f32
    %141 = vector.broadcast %cst_46 : f32 to vector<1x128xf32>
    %142 = arith.mulf %141, %140 : vector<1x128xf32>
    %143 = arith.mulf %136, %119 : vector<1x128xf32>
    %144 = arith.mulf %131, %137 : vector<1x128xf32>
    %145 = arith.addf %143, %144 : vector<1x128xf32>
    %146 = math.tanh %145 : vector<1x128xf32>
    %147 = arith.mulf %142, %146 : vector<1x128xf32>
    %148 = vector.extract_strided_slice %15 {offsets = [5, 0], sizes = [1, 512], strides = [1, 1]} : vector<9x512xf32> to vector<1x512xf32>
    %149 = arith.truncf %147 : vector<1x128xf32> to vector<1x128xbf16>
    %cst_47 = arith.constant dense<0.000000e+00> : vector<1x512xf32>
    %150 = tpu.matmul %149, %10, %cst_47 {dimension_numbers = #tpu.dot_dimension_numbers<[1], [0], [0], [1], [0, 0, 1, 1], [], []>} : vector<1x128xbf16>, vector<128x512xbf16>, vector<1x512xf32> -> vector<1x512xf32>
    %151 = arith.addf %148, %150 : vector<1x512xf32>
    %152 = math.tanh %151 : vector<1x512xf32>
    %153 = vector.extract_strided_slice %152 {offsets = [0, 0], sizes = [1, 128], strides = [1, 1]} : vector<1x512xf32> to vector<1x128xf32>
    %cst_48 = arith.constant 1.000000e+00 : f32
    %154 = vector.broadcast %cst_48 : f32 to vector<1x128xf32>
    %155 = arith.addf %153, %154 : vector<1x128xf32>
    %cst_49 = arith.constant 5.000000e-01 : f32
    %156 = vector.broadcast %cst_49 : f32 to vector<1x128xf32>
    %157 = arith.mulf %156, %155 : vector<1x128xf32>
    %158 = vector.extract_strided_slice %152 {offsets = [0, 128], sizes = [1, 128], strides = [1, 1]} : vector<1x512xf32> to vector<1x128xf32>
    %cst_50 = arith.constant 1.000000e+00 : f32
    %159 = vector.broadcast %cst_50 : f32 to vector<1x128xf32>
    %160 = arith.addf %158, %159 : vector<1x128xf32>
    %cst_51 = arith.constant 5.000000e-01 : f32
    %161 = vector.broadcast %cst_51 : f32 to vector<1x128xf32>
    %162 = arith.mulf %161, %160 : vector<1x128xf32>
    %163 = vector.extract_strided_slice %152 {offsets = [0, 256], sizes = [1, 128], strides = [1, 1]} : vector<1x512xf32> to vector<1x128xf32>
    %164 = vector.extract_strided_slice %152 {offsets = [0, 384], sizes = [1, 128], strides = [1, 1]} : vector<1x512xf32> to vector<1x128xf32>
    %cst_52 = arith.constant 1.000000e+00 : f32
    %165 = vector.broadcast %cst_52 : f32 to vector<1x128xf32>
    %166 = arith.addf %164, %165 : vector<1x128xf32>
    %cst_53 = arith.constant 5.000000e-01 : f32
    %167 = vector.broadcast %cst_53 : f32 to vector<1x128xf32>
    %168 = arith.mulf %167, %166 : vector<1x128xf32>
    %169 = arith.mulf %162, %145 : vector<1x128xf32>
    %170 = arith.mulf %157, %163 : vector<1x128xf32>
    %171 = arith.addf %169, %170 : vector<1x128xf32>
    %172 = math.tanh %171 : vector<1x128xf32>
    %173 = arith.mulf %168, %172 : vector<1x128xf32>
    %174 = vector.extract_strided_slice %15 {offsets = [6, 0], sizes = [1, 512], strides = [1, 1]} : vector<9x512xf32> to vector<1x512xf32>
    %175 = arith.truncf %173 : vector<1x128xf32> to vector<1x128xbf16>
    %cst_54 = arith.constant dense<0.000000e+00> : vector<1x512xf32>
    %176 = tpu.matmul %175, %10, %cst_54 {dimension_numbers = #tpu.dot_dimension_numbers<[1], [0], [0], [1], [0, 0, 1, 1], [], []>} : vector<1x128xbf16>, vector<128x512xbf16>, vector<1x512xf32> -> vector<1x512xf32>
    %177 = arith.addf %174, %176 : vector<1x512xf32>
    %178 = math.tanh %177 : vector<1x512xf32>
    %179 = vector.extract_strided_slice %178 {offsets = [0, 0], sizes = [1, 128], strides = [1, 1]} : vector<1x512xf32> to vector<1x128xf32>
    %cst_55 = arith.constant 1.000000e+00 : f32
    %180 = vector.broadcast %cst_55 : f32 to vector<1x128xf32>
    %181 = arith.addf %179, %180 : vector<1x128xf32>
    %cst_56 = arith.constant 5.000000e-01 : f32
    %182 = vector.broadcast %cst_56 : f32 to vector<1x128xf32>
    %183 = arith.mulf %182, %181 : vector<1x128xf32>
    %184 = vector.extract_strided_slice %178 {offsets = [0, 128], sizes = [1, 128], strides = [1, 1]} : vector<1x512xf32> to vector<1x128xf32>
    %cst_57 = arith.constant 1.000000e+00 : f32
    %185 = vector.broadcast %cst_57 : f32 to vector<1x128xf32>
    %186 = arith.addf %184, %185 : vector<1x128xf32>
    %cst_58 = arith.constant 5.000000e-01 : f32
    %187 = vector.broadcast %cst_58 : f32 to vector<1x128xf32>
    %188 = arith.mulf %187, %186 : vector<1x128xf32>
    %189 = vector.extract_strided_slice %178 {offsets = [0, 256], sizes = [1, 128], strides = [1, 1]} : vector<1x512xf32> to vector<1x128xf32>
    %190 = vector.extract_strided_slice %178 {offsets = [0, 384], sizes = [1, 128], strides = [1, 1]} : vector<1x512xf32> to vector<1x128xf32>
    %cst_59 = arith.constant 1.000000e+00 : f32
    %191 = vector.broadcast %cst_59 : f32 to vector<1x128xf32>
    %192 = arith.addf %190, %191 : vector<1x128xf32>
    %cst_60 = arith.constant 5.000000e-01 : f32
    %193 = vector.broadcast %cst_60 : f32 to vector<1x128xf32>
    %194 = arith.mulf %193, %192 : vector<1x128xf32>
    %195 = arith.mulf %188, %171 : vector<1x128xf32>
    %196 = arith.mulf %183, %189 : vector<1x128xf32>
    %197 = arith.addf %195, %196 : vector<1x128xf32>
    %198 = math.tanh %197 : vector<1x128xf32>
    %199 = arith.mulf %194, %198 : vector<1x128xf32>
    %200 = vector.extract_strided_slice %15 {offsets = [7, 0], sizes = [1, 512], strides = [1, 1]} : vector<9x512xf32> to vector<1x512xf32>
    %201 = arith.truncf %199 : vector<1x128xf32> to vector<1x128xbf16>
    %cst_61 = arith.constant dense<0.000000e+00> : vector<1x512xf32>
    %202 = tpu.matmul %201, %10, %cst_61 {dimension_numbers = #tpu.dot_dimension_numbers<[1], [0], [0], [1], [0, 0, 1, 1], [], []>} : vector<1x128xbf16>, vector<128x512xbf16>, vector<1x512xf32> -> vector<1x512xf32>
    %203 = arith.addf %200, %202 : vector<1x512xf32>
    %204 = math.tanh %203 : vector<1x512xf32>
    %205 = vector.extract_strided_slice %204 {offsets = [0, 0], sizes = [1, 128], strides = [1, 1]} : vector<1x512xf32> to vector<1x128xf32>
    %cst_62 = arith.constant 1.000000e+00 : f32
    %206 = vector.broadcast %cst_62 : f32 to vector<1x128xf32>
    %207 = arith.addf %205, %206 : vector<1x128xf32>
    %cst_63 = arith.constant 5.000000e-01 : f32
    %208 = vector.broadcast %cst_63 : f32 to vector<1x128xf32>
    %209 = arith.mulf %208, %207 : vector<1x128xf32>
    %210 = vector.extract_strided_slice %204 {offsets = [0, 128], sizes = [1, 128], strides = [1, 1]} : vector<1x512xf32> to vector<1x128xf32>
    %cst_64 = arith.constant 1.000000e+00 : f32
    %211 = vector.broadcast %cst_64 : f32 to vector<1x128xf32>
    %212 = arith.addf %210, %211 : vector<1x128xf32>
    %cst_65 = arith.constant 5.000000e-01 : f32
    %213 = vector.broadcast %cst_65 : f32 to vector<1x128xf32>
    %214 = arith.mulf %213, %212 : vector<1x128xf32>
    %215 = vector.extract_strided_slice %204 {offsets = [0, 256], sizes = [1, 128], strides = [1, 1]} : vector<1x512xf32> to vector<1x128xf32>
    %216 = vector.extract_strided_slice %204 {offsets = [0, 384], sizes = [1, 128], strides = [1, 1]} : vector<1x512xf32> to vector<1x128xf32>
    %cst_66 = arith.constant 1.000000e+00 : f32
    %217 = vector.broadcast %cst_66 : f32 to vector<1x128xf32>
    %218 = arith.addf %216, %217 : vector<1x128xf32>
    %cst_67 = arith.constant 5.000000e-01 : f32
    %219 = vector.broadcast %cst_67 : f32 to vector<1x128xf32>
    %220 = arith.mulf %219, %218 : vector<1x128xf32>
    %221 = arith.mulf %214, %197 : vector<1x128xf32>
    %222 = arith.mulf %209, %215 : vector<1x128xf32>
    %223 = arith.addf %221, %222 : vector<1x128xf32>
    %224 = math.tanh %223 : vector<1x128xf32>
    %225 = arith.mulf %220, %224 : vector<1x128xf32>
    %226 = vector.extract_strided_slice %15 {offsets = [8, 0], sizes = [1, 512], strides = [1, 1]} : vector<9x512xf32> to vector<1x512xf32>
    %227 = arith.truncf %225 : vector<1x128xf32> to vector<1x128xbf16>
    %cst_68 = arith.constant dense<0.000000e+00> : vector<1x512xf32>
    %228 = tpu.matmul %227, %10, %cst_68 {dimension_numbers = #tpu.dot_dimension_numbers<[1], [0], [0], [1], [0, 0, 1, 1], [], []>} : vector<1x128xbf16>, vector<128x512xbf16>, vector<1x512xf32> -> vector<1x512xf32>
    %229 = arith.addf %226, %228 : vector<1x512xf32>
    %230 = math.tanh %229 : vector<1x512xf32>
    %231 = vector.extract_strided_slice %230 {offsets = [0, 0], sizes = [1, 128], strides = [1, 1]} : vector<1x512xf32> to vector<1x128xf32>
    %cst_69 = arith.constant 1.000000e+00 : f32
    %232 = vector.broadcast %cst_69 : f32 to vector<1x128xf32>
    %233 = arith.addf %231, %232 : vector<1x128xf32>
    %cst_70 = arith.constant 5.000000e-01 : f32
    %234 = vector.broadcast %cst_70 : f32 to vector<1x128xf32>
    %235 = arith.mulf %234, %233 : vector<1x128xf32>
    %236 = vector.extract_strided_slice %230 {offsets = [0, 128], sizes = [1, 128], strides = [1, 1]} : vector<1x512xf32> to vector<1x128xf32>
    %cst_71 = arith.constant 1.000000e+00 : f32
    %237 = vector.broadcast %cst_71 : f32 to vector<1x128xf32>
    %238 = arith.addf %236, %237 : vector<1x128xf32>
    %cst_72 = arith.constant 5.000000e-01 : f32
    %239 = vector.broadcast %cst_72 : f32 to vector<1x128xf32>
    %240 = arith.mulf %239, %238 : vector<1x128xf32>
    %241 = vector.extract_strided_slice %230 {offsets = [0, 256], sizes = [1, 128], strides = [1, 1]} : vector<1x512xf32> to vector<1x128xf32>
    %242 = vector.extract_strided_slice %230 {offsets = [0, 384], sizes = [1, 128], strides = [1, 1]} : vector<1x512xf32> to vector<1x128xf32>
    %cst_73 = arith.constant 1.000000e+00 : f32
    %243 = vector.broadcast %cst_73 : f32 to vector<1x128xf32>
    %244 = arith.addf %242, %243 : vector<1x128xf32>
    %cst_74 = arith.constant 5.000000e-01 : f32
    %245 = vector.broadcast %cst_74 : f32 to vector<1x128xf32>
    %246 = arith.mulf %245, %244 : vector<1x128xf32>
    %247 = arith.mulf %240, %223 : vector<1x128xf32>
    %248 = arith.mulf %235, %241 : vector<1x128xf32>
    %249 = arith.addf %247, %248 : vector<1x128xf32>
    %250 = math.tanh %249 : vector<1x128xf32>
    %251 = arith.mulf %246, %250 : vector<1x128xf32>
    %252 = tpu.concatenate %43, %69, %95, %121, %147, %173, %199, %225, %251 in 0 : vector<1x128xf32>, vector<1x128xf32>, vector<1x128xf32>, vector<1x128xf32>, vector<1x128xf32>, vector<1x128xf32>, vector<1x128xf32>, vector<1x128xf32>, vector<1x128xf32> -> vector<9x128xf32>
    %c0_75 = arith.constant 0 : index
    %c0_76 = arith.constant 0 : index
    %253 = vector.load %arg5[%c0_75, %c0_76] : memref<128x512xbf16, #tpu.memory_space<vmem>>, vector<128x512xbf16>
    %c0_77 = arith.constant 0 : index
    %c0_78 = arith.constant 0 : index
    %254 = vector.load %arg6[%c0_77, %c0_78] : memref<128x512xbf16, #tpu.memory_space<vmem>>, vector<128x512xbf16>
    %c0_79 = arith.constant 0 : index
    %c0_80 = arith.constant 0 : index
    %255 = vector.load %arg7[%c0_79, %c0_80] : memref<1x512xf32, #tpu.memory_space<vmem>>, vector<1x512xf32>
    %256 = arith.truncf %252 : vector<9x128xf32> to vector<9x128xbf16>
    %cst_81 = arith.constant dense<0.000000e+00> : vector<9x512xf32>
    %257 = tpu.matmul %256, %253, %cst_81 {dimension_numbers = #tpu.dot_dimension_numbers<[1], [0], [0], [1], [0, 0, 1, 1], [], []>} : vector<9x128xbf16>, vector<128x512xbf16>, vector<9x512xf32> -> vector<9x512xf32>
    %258 = vector.broadcast %255 : vector<1x512xf32> to vector<9x512xf32>
    %259 = arith.addf %257, %258 : vector<9x512xf32>
    %cst_82 = arith.constant 0.000000e+00 : f32
    %260 = vector.broadcast %cst_82 : f32 to vector<1x128xf32>
    %cst_83 = arith.constant 0.000000e+00 : f32
    %261 = vector.broadcast %cst_83 : f32 to vector<1x128xf32>
    %262 = vector.extract_strided_slice %259 {offsets = [0, 0], sizes = [1, 512], strides = [1, 1]} : vector<9x512xf32> to vector<1x512xf32>
    %263 = arith.truncf %260 : vector<1x128xf32> to vector<1x128xbf16>
    %cst_84 = arith.constant dense<0.000000e+00> : vector<1x512xf32>
    %264 = tpu.matmul %263, %254, %cst_84 {dimension_numbers = #tpu.dot_dimension_numbers<[1], [0], [0], [1], [0, 0, 1, 1], [], []>} : vector<1x128xbf16>, vector<128x512xbf16>, vector<1x512xf32> -> vector<1x512xf32>
    %265 = arith.addf %262, %264 : vector<1x512xf32>
    %266 = math.tanh %265 : vector<1x512xf32>
    %267 = vector.extract_strided_slice %266 {offsets = [0, 0], sizes = [1, 128], strides = [1, 1]} : vector<1x512xf32> to vector<1x128xf32>
    %cst_85 = arith.constant 1.000000e+00 : f32
    %268 = vector.broadcast %cst_85 : f32 to vector<1x128xf32>
    %269 = arith.addf %267, %268 : vector<1x128xf32>
    %cst_86 = arith.constant 5.000000e-01 : f32
    %270 = vector.broadcast %cst_86 : f32 to vector<1x128xf32>
    %271 = arith.mulf %270, %269 : vector<1x128xf32>
    %272 = vector.extract_strided_slice %266 {offsets = [0, 128], sizes = [1, 128], strides = [1, 1]} : vector<1x512xf32> to vector<1x128xf32>
    %cst_87 = arith.constant 1.000000e+00 : f32
    %273 = vector.broadcast %cst_87 : f32 to vector<1x128xf32>
    %274 = arith.addf %272, %273 : vector<1x128xf32>
    %cst_88 = arith.constant 5.000000e-01 : f32
    %275 = vector.broadcast %cst_88 : f32 to vector<1x128xf32>
    %276 = arith.mulf %275, %274 : vector<1x128xf32>
    %277 = vector.extract_strided_slice %266 {offsets = [0, 256], sizes = [1, 128], strides = [1, 1]} : vector<1x512xf32> to vector<1x128xf32>
    %278 = vector.extract_strided_slice %266 {offsets = [0, 384], sizes = [1, 128], strides = [1, 1]} : vector<1x512xf32> to vector<1x128xf32>
    %cst_89 = arith.constant 1.000000e+00 : f32
    %279 = vector.broadcast %cst_89 : f32 to vector<1x128xf32>
    %280 = arith.addf %278, %279 : vector<1x128xf32>
    %cst_90 = arith.constant 5.000000e-01 : f32
    %281 = vector.broadcast %cst_90 : f32 to vector<1x128xf32>
    %282 = arith.mulf %281, %280 : vector<1x128xf32>
    %283 = arith.mulf %276, %261 : vector<1x128xf32>
    %284 = arith.mulf %271, %277 : vector<1x128xf32>
    %285 = arith.addf %283, %284 : vector<1x128xf32>
    %286 = math.tanh %285 : vector<1x128xf32>
    %287 = arith.mulf %282, %286 : vector<1x128xf32>
    %288 = vector.extract_strided_slice %259 {offsets = [1, 0], sizes = [1, 512], strides = [1, 1]} : vector<9x512xf32> to vector<1x512xf32>
    %289 = arith.truncf %287 : vector<1x128xf32> to vector<1x128xbf16>
    %cst_91 = arith.constant dense<0.000000e+00> : vector<1x512xf32>
    %290 = tpu.matmul %289, %254, %cst_91 {dimension_numbers = #tpu.dot_dimension_numbers<[1], [0], [0], [1], [0, 0, 1, 1], [], []>} : vector<1x128xbf16>, vector<128x512xbf16>, vector<1x512xf32> -> vector<1x512xf32>
    %291 = arith.addf %288, %290 : vector<1x512xf32>
    %292 = math.tanh %291 : vector<1x512xf32>
    %293 = vector.extract_strided_slice %292 {offsets = [0, 0], sizes = [1, 128], strides = [1, 1]} : vector<1x512xf32> to vector<1x128xf32>
    %cst_92 = arith.constant 1.000000e+00 : f32
    %294 = vector.broadcast %cst_92 : f32 to vector<1x128xf32>
    %295 = arith.addf %293, %294 : vector<1x128xf32>
    %cst_93 = arith.constant 5.000000e-01 : f32
    %296 = vector.broadcast %cst_93 : f32 to vector<1x128xf32>
    %297 = arith.mulf %296, %295 : vector<1x128xf32>
    %298 = vector.extract_strided_slice %292 {offsets = [0, 128], sizes = [1, 128], strides = [1, 1]} : vector<1x512xf32> to vector<1x128xf32>
    %cst_94 = arith.constant 1.000000e+00 : f32
    %299 = vector.broadcast %cst_94 : f32 to vector<1x128xf32>
    %300 = arith.addf %298, %299 : vector<1x128xf32>
    %cst_95 = arith.constant 5.000000e-01 : f32
    %301 = vector.broadcast %cst_95 : f32 to vector<1x128xf32>
    %302 = arith.mulf %301, %300 : vector<1x128xf32>
    %303 = vector.extract_strided_slice %292 {offsets = [0, 256], sizes = [1, 128], strides = [1, 1]} : vector<1x512xf32> to vector<1x128xf32>
    %304 = vector.extract_strided_slice %292 {offsets = [0, 384], sizes = [1, 128], strides = [1, 1]} : vector<1x512xf32> to vector<1x128xf32>
    %cst_96 = arith.constant 1.000000e+00 : f32
    %305 = vector.broadcast %cst_96 : f32 to vector<1x128xf32>
    %306 = arith.addf %304, %305 : vector<1x128xf32>
    %cst_97 = arith.constant 5.000000e-01 : f32
    %307 = vector.broadcast %cst_97 : f32 to vector<1x128xf32>
    %308 = arith.mulf %307, %306 : vector<1x128xf32>
    %309 = arith.mulf %302, %285 : vector<1x128xf32>
    %310 = arith.mulf %297, %303 : vector<1x128xf32>
    %311 = arith.addf %309, %310 : vector<1x128xf32>
    %312 = math.tanh %311 : vector<1x128xf32>
    %313 = arith.mulf %308, %312 : vector<1x128xf32>
    %314 = vector.extract_strided_slice %259 {offsets = [2, 0], sizes = [1, 512], strides = [1, 1]} : vector<9x512xf32> to vector<1x512xf32>
    %315 = arith.truncf %313 : vector<1x128xf32> to vector<1x128xbf16>
    %cst_98 = arith.constant dense<0.000000e+00> : vector<1x512xf32>
    %316 = tpu.matmul %315, %254, %cst_98 {dimension_numbers = #tpu.dot_dimension_numbers<[1], [0], [0], [1], [0, 0, 1, 1], [], []>} : vector<1x128xbf16>, vector<128x512xbf16>, vector<1x512xf32> -> vector<1x512xf32>
    %317 = arith.addf %314, %316 : vector<1x512xf32>
    %318 = math.tanh %317 : vector<1x512xf32>
    %319 = vector.extract_strided_slice %318 {offsets = [0, 0], sizes = [1, 128], strides = [1, 1]} : vector<1x512xf32> to vector<1x128xf32>
    %cst_99 = arith.constant 1.000000e+00 : f32
    %320 = vector.broadcast %cst_99 : f32 to vector<1x128xf32>
    %321 = arith.addf %319, %320 : vector<1x128xf32>
    %cst_100 = arith.constant 5.000000e-01 : f32
    %322 = vector.broadcast %cst_100 : f32 to vector<1x128xf32>
    %323 = arith.mulf %322, %321 : vector<1x128xf32>
    %324 = vector.extract_strided_slice %318 {offsets = [0, 128], sizes = [1, 128], strides = [1, 1]} : vector<1x512xf32> to vector<1x128xf32>
    %cst_101 = arith.constant 1.000000e+00 : f32
    %325 = vector.broadcast %cst_101 : f32 to vector<1x128xf32>
    %326 = arith.addf %324, %325 : vector<1x128xf32>
    %cst_102 = arith.constant 5.000000e-01 : f32
    %327 = vector.broadcast %cst_102 : f32 to vector<1x128xf32>
    %328 = arith.mulf %327, %326 : vector<1x128xf32>
    %329 = vector.extract_strided_slice %318 {offsets = [0, 256], sizes = [1, 128], strides = [1, 1]} : vector<1x512xf32> to vector<1x128xf32>
    %330 = vector.extract_strided_slice %318 {offsets = [0, 384], sizes = [1, 128], strides = [1, 1]} : vector<1x512xf32> to vector<1x128xf32>
    %cst_103 = arith.constant 1.000000e+00 : f32
    %331 = vector.broadcast %cst_103 : f32 to vector<1x128xf32>
    %332 = arith.addf %330, %331 : vector<1x128xf32>
    %cst_104 = arith.constant 5.000000e-01 : f32
    %333 = vector.broadcast %cst_104 : f32 to vector<1x128xf32>
    %334 = arith.mulf %333, %332 : vector<1x128xf32>
    %335 = arith.mulf %328, %311 : vector<1x128xf32>
    %336 = arith.mulf %323, %329 : vector<1x128xf32>
    %337 = arith.addf %335, %336 : vector<1x128xf32>
    %338 = math.tanh %337 : vector<1x128xf32>
    %339 = arith.mulf %334, %338 : vector<1x128xf32>
    %340 = vector.extract_strided_slice %259 {offsets = [3, 0], sizes = [1, 512], strides = [1, 1]} : vector<9x512xf32> to vector<1x512xf32>
    %341 = arith.truncf %339 : vector<1x128xf32> to vector<1x128xbf16>
    %cst_105 = arith.constant dense<0.000000e+00> : vector<1x512xf32>
    %342 = tpu.matmul %341, %254, %cst_105 {dimension_numbers = #tpu.dot_dimension_numbers<[1], [0], [0], [1], [0, 0, 1, 1], [], []>} : vector<1x128xbf16>, vector<128x512xbf16>, vector<1x512xf32> -> vector<1x512xf32>
    %343 = arith.addf %340, %342 : vector<1x512xf32>
    %344 = math.tanh %343 : vector<1x512xf32>
    %345 = vector.extract_strided_slice %344 {offsets = [0, 0], sizes = [1, 128], strides = [1, 1]} : vector<1x512xf32> to vector<1x128xf32>
    %cst_106 = arith.constant 1.000000e+00 : f32
    %346 = vector.broadcast %cst_106 : f32 to vector<1x128xf32>
    %347 = arith.addf %345, %346 : vector<1x128xf32>
    %cst_107 = arith.constant 5.000000e-01 : f32
    %348 = vector.broadcast %cst_107 : f32 to vector<1x128xf32>
    %349 = arith.mulf %348, %347 : vector<1x128xf32>
    %350 = vector.extract_strided_slice %344 {offsets = [0, 128], sizes = [1, 128], strides = [1, 1]} : vector<1x512xf32> to vector<1x128xf32>
    %cst_108 = arith.constant 1.000000e+00 : f32
    %351 = vector.broadcast %cst_108 : f32 to vector<1x128xf32>
    %352 = arith.addf %350, %351 : vector<1x128xf32>
    %cst_109 = arith.constant 5.000000e-01 : f32
    %353 = vector.broadcast %cst_109 : f32 to vector<1x128xf32>
    %354 = arith.mulf %353, %352 : vector<1x128xf32>
    %355 = vector.extract_strided_slice %344 {offsets = [0, 256], sizes = [1, 128], strides = [1, 1]} : vector<1x512xf32> to vector<1x128xf32>
    %356 = vector.extract_strided_slice %344 {offsets = [0, 384], sizes = [1, 128], strides = [1, 1]} : vector<1x512xf32> to vector<1x128xf32>
    %cst_110 = arith.constant 1.000000e+00 : f32
    %357 = vector.broadcast %cst_110 : f32 to vector<1x128xf32>
    %358 = arith.addf %356, %357 : vector<1x128xf32>
    %cst_111 = arith.constant 5.000000e-01 : f32
    %359 = vector.broadcast %cst_111 : f32 to vector<1x128xf32>
    %360 = arith.mulf %359, %358 : vector<1x128xf32>
    %361 = arith.mulf %354, %337 : vector<1x128xf32>
    %362 = arith.mulf %349, %355 : vector<1x128xf32>
    %363 = arith.addf %361, %362 : vector<1x128xf32>
    %364 = math.tanh %363 : vector<1x128xf32>
    %365 = arith.mulf %360, %364 : vector<1x128xf32>
    %366 = vector.extract_strided_slice %259 {offsets = [4, 0], sizes = [1, 512], strides = [1, 1]} : vector<9x512xf32> to vector<1x512xf32>
    %367 = arith.truncf %365 : vector<1x128xf32> to vector<1x128xbf16>
    %cst_112 = arith.constant dense<0.000000e+00> : vector<1x512xf32>
    %368 = tpu.matmul %367, %254, %cst_112 {dimension_numbers = #tpu.dot_dimension_numbers<[1], [0], [0], [1], [0, 0, 1, 1], [], []>} : vector<1x128xbf16>, vector<128x512xbf16>, vector<1x512xf32> -> vector<1x512xf32>
    %369 = arith.addf %366, %368 : vector<1x512xf32>
    %370 = math.tanh %369 : vector<1x512xf32>
    %371 = vector.extract_strided_slice %370 {offsets = [0, 0], sizes = [1, 128], strides = [1, 1]} : vector<1x512xf32> to vector<1x128xf32>
    %cst_113 = arith.constant 1.000000e+00 : f32
    %372 = vector.broadcast %cst_113 : f32 to vector<1x128xf32>
    %373 = arith.addf %371, %372 : vector<1x128xf32>
    %cst_114 = arith.constant 5.000000e-01 : f32
    %374 = vector.broadcast %cst_114 : f32 to vector<1x128xf32>
    %375 = arith.mulf %374, %373 : vector<1x128xf32>
    %376 = vector.extract_strided_slice %370 {offsets = [0, 128], sizes = [1, 128], strides = [1, 1]} : vector<1x512xf32> to vector<1x128xf32>
    %cst_115 = arith.constant 1.000000e+00 : f32
    %377 = vector.broadcast %cst_115 : f32 to vector<1x128xf32>
    %378 = arith.addf %376, %377 : vector<1x128xf32>
    %cst_116 = arith.constant 5.000000e-01 : f32
    %379 = vector.broadcast %cst_116 : f32 to vector<1x128xf32>
    %380 = arith.mulf %379, %378 : vector<1x128xf32>
    %381 = vector.extract_strided_slice %370 {offsets = [0, 256], sizes = [1, 128], strides = [1, 1]} : vector<1x512xf32> to vector<1x128xf32>
    %382 = vector.extract_strided_slice %370 {offsets = [0, 384], sizes = [1, 128], strides = [1, 1]} : vector<1x512xf32> to vector<1x128xf32>
    %cst_117 = arith.constant 1.000000e+00 : f32
    %383 = vector.broadcast %cst_117 : f32 to vector<1x128xf32>
    %384 = arith.addf %382, %383 : vector<1x128xf32>
    %cst_118 = arith.constant 5.000000e-01 : f32
    %385 = vector.broadcast %cst_118 : f32 to vector<1x128xf32>
    %386 = arith.mulf %385, %384 : vector<1x128xf32>
    %387 = arith.mulf %380, %363 : vector<1x128xf32>
    %388 = arith.mulf %375, %381 : vector<1x128xf32>
    %389 = arith.addf %387, %388 : vector<1x128xf32>
    %390 = math.tanh %389 : vector<1x128xf32>
    %391 = arith.mulf %386, %390 : vector<1x128xf32>
    %392 = vector.extract_strided_slice %259 {offsets = [5, 0], sizes = [1, 512], strides = [1, 1]} : vector<9x512xf32> to vector<1x512xf32>
    %393 = arith.truncf %391 : vector<1x128xf32> to vector<1x128xbf16>
    %cst_119 = arith.constant dense<0.000000e+00> : vector<1x512xf32>
    %394 = tpu.matmul %393, %254, %cst_119 {dimension_numbers = #tpu.dot_dimension_numbers<[1], [0], [0], [1], [0, 0, 1, 1], [], []>} : vector<1x128xbf16>, vector<128x512xbf16>, vector<1x512xf32> -> vector<1x512xf32>
    %395 = arith.addf %392, %394 : vector<1x512xf32>
    %396 = math.tanh %395 : vector<1x512xf32>
    %397 = vector.extract_strided_slice %396 {offsets = [0, 0], sizes = [1, 128], strides = [1, 1]} : vector<1x512xf32> to vector<1x128xf32>
    %cst_120 = arith.constant 1.000000e+00 : f32
    %398 = vector.broadcast %cst_120 : f32 to vector<1x128xf32>
    %399 = arith.addf %397, %398 : vector<1x128xf32>
    %cst_121 = arith.constant 5.000000e-01 : f32
    %400 = vector.broadcast %cst_121 : f32 to vector<1x128xf32>
    %401 = arith.mulf %400, %399 : vector<1x128xf32>
    %402 = vector.extract_strided_slice %396 {offsets = [0, 128], sizes = [1, 128], strides = [1, 1]} : vector<1x512xf32> to vector<1x128xf32>
    %cst_122 = arith.constant 1.000000e+00 : f32
    %403 = vector.broadcast %cst_122 : f32 to vector<1x128xf32>
    %404 = arith.addf %402, %403 : vector<1x128xf32>
    %cst_123 = arith.constant 5.000000e-01 : f32
    %405 = vector.broadcast %cst_123 : f32 to vector<1x128xf32>
    %406 = arith.mulf %405, %404 : vector<1x128xf32>
    %407 = vector.extract_strided_slice %396 {offsets = [0, 256], sizes = [1, 128], strides = [1, 1]} : vector<1x512xf32> to vector<1x128xf32>
    %408 = vector.extract_strided_slice %396 {offsets = [0, 384], sizes = [1, 128], strides = [1, 1]} : vector<1x512xf32> to vector<1x128xf32>
    %cst_124 = arith.constant 1.000000e+00 : f32
    %409 = vector.broadcast %cst_124 : f32 to vector<1x128xf32>
    %410 = arith.addf %408, %409 : vector<1x128xf32>
    %cst_125 = arith.constant 5.000000e-01 : f32
    %411 = vector.broadcast %cst_125 : f32 to vector<1x128xf32>
    %412 = arith.mulf %411, %410 : vector<1x128xf32>
    %413 = arith.mulf %406, %389 : vector<1x128xf32>
    %414 = arith.mulf %401, %407 : vector<1x128xf32>
    %415 = arith.addf %413, %414 : vector<1x128xf32>
    %416 = math.tanh %415 : vector<1x128xf32>
    %417 = arith.mulf %412, %416 : vector<1x128xf32>
    %418 = vector.extract_strided_slice %259 {offsets = [6, 0], sizes = [1, 512], strides = [1, 1]} : vector<9x512xf32> to vector<1x512xf32>
    %419 = arith.truncf %417 : vector<1x128xf32> to vector<1x128xbf16>
    %cst_126 = arith.constant dense<0.000000e+00> : vector<1x512xf32>
    %420 = tpu.matmul %419, %254, %cst_126 {dimension_numbers = #tpu.dot_dimension_numbers<[1], [0], [0], [1], [0, 0, 1, 1], [], []>} : vector<1x128xbf16>, vector<128x512xbf16>, vector<1x512xf32> -> vector<1x512xf32>
    %421 = arith.addf %418, %420 : vector<1x512xf32>
    %422 = math.tanh %421 : vector<1x512xf32>
    %423 = vector.extract_strided_slice %422 {offsets = [0, 0], sizes = [1, 128], strides = [1, 1]} : vector<1x512xf32> to vector<1x128xf32>
    %cst_127 = arith.constant 1.000000e+00 : f32
    %424 = vector.broadcast %cst_127 : f32 to vector<1x128xf32>
    %425 = arith.addf %423, %424 : vector<1x128xf32>
    %cst_128 = arith.constant 5.000000e-01 : f32
    %426 = vector.broadcast %cst_128 : f32 to vector<1x128xf32>
    %427 = arith.mulf %426, %425 : vector<1x128xf32>
    %428 = vector.extract_strided_slice %422 {offsets = [0, 128], sizes = [1, 128], strides = [1, 1]} : vector<1x512xf32> to vector<1x128xf32>
    %cst_129 = arith.constant 1.000000e+00 : f32
    %429 = vector.broadcast %cst_129 : f32 to vector<1x128xf32>
    %430 = arith.addf %428, %429 : vector<1x128xf32>
    %cst_130 = arith.constant 5.000000e-01 : f32
    %431 = vector.broadcast %cst_130 : f32 to vector<1x128xf32>
    %432 = arith.mulf %431, %430 : vector<1x128xf32>
    %433 = vector.extract_strided_slice %422 {offsets = [0, 256], sizes = [1, 128], strides = [1, 1]} : vector<1x512xf32> to vector<1x128xf32>
    %434 = vector.extract_strided_slice %422 {offsets = [0, 384], sizes = [1, 128], strides = [1, 1]} : vector<1x512xf32> to vector<1x128xf32>
    %cst_131 = arith.constant 1.000000e+00 : f32
    %435 = vector.broadcast %cst_131 : f32 to vector<1x128xf32>
    %436 = arith.addf %434, %435 : vector<1x128xf32>
    %cst_132 = arith.constant 5.000000e-01 : f32
    %437 = vector.broadcast %cst_132 : f32 to vector<1x128xf32>
    %438 = arith.mulf %437, %436 : vector<1x128xf32>
    %439 = arith.mulf %432, %415 : vector<1x128xf32>
    %440 = arith.mulf %427, %433 : vector<1x128xf32>
    %441 = arith.addf %439, %440 : vector<1x128xf32>
    %442 = math.tanh %441 : vector<1x128xf32>
    %443 = arith.mulf %438, %442 : vector<1x128xf32>
    %444 = vector.extract_strided_slice %259 {offsets = [7, 0], sizes = [1, 512], strides = [1, 1]} : vector<9x512xf32> to vector<1x512xf32>
    %445 = arith.truncf %443 : vector<1x128xf32> to vector<1x128xbf16>
    %cst_133 = arith.constant dense<0.000000e+00> : vector<1x512xf32>
    %446 = tpu.matmul %445, %254, %cst_133 {dimension_numbers = #tpu.dot_dimension_numbers<[1], [0], [0], [1], [0, 0, 1, 1], [], []>} : vector<1x128xbf16>, vector<128x512xbf16>, vector<1x512xf32> -> vector<1x512xf32>
    %447 = arith.addf %444, %446 : vector<1x512xf32>
    %448 = math.tanh %447 : vector<1x512xf32>
    %449 = vector.extract_strided_slice %448 {offsets = [0, 0], sizes = [1, 128], strides = [1, 1]} : vector<1x512xf32> to vector<1x128xf32>
    %cst_134 = arith.constant 1.000000e+00 : f32
    %450 = vector.broadcast %cst_134 : f32 to vector<1x128xf32>
    %451 = arith.addf %449, %450 : vector<1x128xf32>
    %cst_135 = arith.constant 5.000000e-01 : f32
    %452 = vector.broadcast %cst_135 : f32 to vector<1x128xf32>
    %453 = arith.mulf %452, %451 : vector<1x128xf32>
    %454 = vector.extract_strided_slice %448 {offsets = [0, 128], sizes = [1, 128], strides = [1, 1]} : vector<1x512xf32> to vector<1x128xf32>
    %cst_136 = arith.constant 1.000000e+00 : f32
    %455 = vector.broadcast %cst_136 : f32 to vector<1x128xf32>
    %456 = arith.addf %454, %455 : vector<1x128xf32>
    %cst_137 = arith.constant 5.000000e-01 : f32
    %457 = vector.broadcast %cst_137 : f32 to vector<1x128xf32>
    %458 = arith.mulf %457, %456 : vector<1x128xf32>
    %459 = vector.extract_strided_slice %448 {offsets = [0, 256], sizes = [1, 128], strides = [1, 1]} : vector<1x512xf32> to vector<1x128xf32>
    %460 = vector.extract_strided_slice %448 {offsets = [0, 384], sizes = [1, 128], strides = [1, 1]} : vector<1x512xf32> to vector<1x128xf32>
    %cst_138 = arith.constant 1.000000e+00 : f32
    %461 = vector.broadcast %cst_138 : f32 to vector<1x128xf32>
    %462 = arith.addf %460, %461 : vector<1x128xf32>
    %cst_139 = arith.constant 5.000000e-01 : f32
    %463 = vector.broadcast %cst_139 : f32 to vector<1x128xf32>
    %464 = arith.mulf %463, %462 : vector<1x128xf32>
    %465 = arith.mulf %458, %441 : vector<1x128xf32>
    %466 = arith.mulf %453, %459 : vector<1x128xf32>
    %467 = arith.addf %465, %466 : vector<1x128xf32>
    %468 = math.tanh %467 : vector<1x128xf32>
    %469 = arith.mulf %464, %468 : vector<1x128xf32>
    %470 = vector.extract_strided_slice %259 {offsets = [8, 0], sizes = [1, 512], strides = [1, 1]} : vector<9x512xf32> to vector<1x512xf32>
    %471 = arith.truncf %469 : vector<1x128xf32> to vector<1x128xbf16>
    %cst_140 = arith.constant dense<0.000000e+00> : vector<1x512xf32>
    %472 = tpu.matmul %471, %254, %cst_140 {dimension_numbers = #tpu.dot_dimension_numbers<[1], [0], [0], [1], [0, 0, 1, 1], [], []>} : vector<1x128xbf16>, vector<128x512xbf16>, vector<1x512xf32> -> vector<1x512xf32>
    %473 = arith.addf %470, %472 : vector<1x512xf32>
    %474 = math.tanh %473 : vector<1x512xf32>
    %475 = vector.extract_strided_slice %474 {offsets = [0, 0], sizes = [1, 128], strides = [1, 1]} : vector<1x512xf32> to vector<1x128xf32>
    %cst_141 = arith.constant 1.000000e+00 : f32
    %476 = vector.broadcast %cst_141 : f32 to vector<1x128xf32>
    %477 = arith.addf %475, %476 : vector<1x128xf32>
    %cst_142 = arith.constant 5.000000e-01 : f32
    %478 = vector.broadcast %cst_142 : f32 to vector<1x128xf32>
    %479 = arith.mulf %478, %477 : vector<1x128xf32>
    %480 = vector.extract_strided_slice %474 {offsets = [0, 128], sizes = [1, 128], strides = [1, 1]} : vector<1x512xf32> to vector<1x128xf32>
    %cst_143 = arith.constant 1.000000e+00 : f32
    %481 = vector.broadcast %cst_143 : f32 to vector<1x128xf32>
    %482 = arith.addf %480, %481 : vector<1x128xf32>
    %cst_144 = arith.constant 5.000000e-01 : f32
    %483 = vector.broadcast %cst_144 : f32 to vector<1x128xf32>
    %484 = arith.mulf %483, %482 : vector<1x128xf32>
    %485 = vector.extract_strided_slice %474 {offsets = [0, 256], sizes = [1, 128], strides = [1, 1]} : vector<1x512xf32> to vector<1x128xf32>
    %486 = vector.extract_strided_slice %474 {offsets = [0, 384], sizes = [1, 128], strides = [1, 1]} : vector<1x512xf32> to vector<1x128xf32>
    %cst_145 = arith.constant 1.000000e+00 : f32
    %487 = vector.broadcast %cst_145 : f32 to vector<1x128xf32>
    %488 = arith.addf %486, %487 : vector<1x128xf32>
    %cst_146 = arith.constant 5.000000e-01 : f32
    %489 = vector.broadcast %cst_146 : f32 to vector<1x128xf32>
    %490 = arith.mulf %489, %488 : vector<1x128xf32>
    %491 = arith.mulf %484, %467 : vector<1x128xf32>
    %492 = arith.mulf %479, %485 : vector<1x128xf32>
    %493 = arith.addf %491, %492 : vector<1x128xf32>
    %494 = math.tanh %493 : vector<1x128xf32>
    %495 = arith.mulf %490, %494 : vector<1x128xf32>
    %496 = tpu.concatenate %287, %313, %339, %365, %391, %417, %443, %469, %495 in 0 : vector<1x128xf32>, vector<1x128xf32>, vector<1x128xf32>, vector<1x128xf32>, vector<1x128xf32>, vector<1x128xf32>, vector<1x128xf32>, vector<1x128xf32>, vector<1x128xf32> -> vector<9x128xf32>
    %497 = arith.truncf %496 : vector<9x128xf32> to vector<9x128xbf16>
    %c0_147 = arith.constant 0 : index
    %c0_148 = arith.constant 0 : index
    %498 = vector.load %arg8[%c0_147, %c0_148] : memref<128x128xbf16, #tpu.memory_space<vmem>>, vector<128x128xbf16>
    %cst_149 = arith.constant dense<0.000000e+00> : vector<9x128xf32>
    %499 = tpu.matmul %497, %498, %cst_149 {dimension_numbers = #tpu.dot_dimension_numbers<[1], [0], [0], [1], [0, 0, 1, 1], [], []>} : vector<9x128xbf16>, vector<128x128xbf16>, vector<9x128xf32> -> vector<9x128xf32>
    %c0_150 = arith.constant 0 : index
    %c0_151 = arith.constant 0 : index
    %500 = vector.load %arg9[%c0_150, %c0_151] : memref<1x128xf32, #tpu.memory_space<vmem>>, vector<1x128xf32>
    %501 = vector.broadcast %500 : vector<1x128xf32> to vector<9x128xf32>
    %502 = arith.addf %499, %501 : vector<9x128xf32>
    %c0_152 = arith.constant 0 : index
    %c0_153 = arith.constant 0 : index
    %503 = vector.load %arg10[%c0_152, %c0_153] : memref<9x128xf32, #tpu.memory_space<vmem>>, vector<9x128xf32>
    tpu.vector_store %arg10[%c0_152, %c0_153], %502 {strides = array<i32>} : memref<9x128xf32, #tpu.memory_space<vmem>>, vector<9x128xf32>,
    return
  }
}

</mosaic_0001>

<bundles_post_ra>
// kernel: tpu_custom_call.1
= control target key start
LH: loop header
LB: loop body
LE: loop exit
PB: predicated region body
PF: predicated region fallthrough
CT: control target
= control target key end

     0   :  { %15 = vsyncpa [#allocation3], 0  ;;  %s4998_s0 = inlined_call_operand.vmem [shape: s32[9,1], index: 0, kind: input, shape index: {}]   ;;  %s4999_s1 = inlined_call_operand.hbm [shape: bf16[128,128], index: 1, kind: input, shape index: {}]   ;;  %s5000_s2 = inlined_call_operand.hbm [shape: bf16[128,512], index: 2, kind: input, shape index: {}]   ;;  %s5001_s3 = inlined_call_operand.hbm [shape: bf16[128,512], index: 3, kind: input, shape index: {}]   ;;  %s5002_s4 = inlined_call_operand.vmem [shape: f32[1,512], index: 4, kind: input, shape index: {}]   ;;  %s5003_s5 = inlined_call_operand.hbm [shape: bf16[128,512], index: 5, kind: input, shape index: {}]   ;;  %s5004_s6 = inlined_call_operand.hbm [shape: bf16[128,512], index: 6, kind: input, shape index: {}]   ;;  %s5005_s7 = inlined_call_operand.vmem [shape: f32[1,512], index: 7, kind: input, shape index: {}]   ;;  %s5006_s8 = inlined_call_operand.hbm [shape: bf16[128,128], index: 8, kind: input, shape index: {}]   ;;  %s5007_s9 = inlined_call_operand.vmem [shape: f32[1,128], index: 9, kind: input, shape index: {}]   ;;  %s5008_s10 = inlined_call_operand.hbm [shape: f32[9,128], index: 10, kind: output, shape index: {}]  }
   0x1   :  { %16 = vsyncpa [#allocation6], 0 }
   0x2   :  { %17 = vsyncpa [#allocation9], 0 }
   0x3   :  { %18 = vsyncpa [#allocation12], 0  ;;  %s39_s15 = sshll.u32 %s5000_s2, 4  ;;  %s40_s15 = int_to_ptr.hbm [resolvable:$true] %s39_s15 }
   0x4   :  { %19 = vsyncpa [#allocation4], 0  ;;  %s3921_s16 = smov [#allocation5]   ;;  %s67_s20 = sshll.u32 %s5003_s5, 4  ;;  %s68_s20 = int_to_ptr.hbm [resolvable:$true] %s67_s20 }
   0x5   :  { %s41_s17 = sshll.u32 %s3921_s16, 4  ;;  %s3922_s21 = smov 256   ;;  %s42_s17 = int_to_ptr.vmem [resolvable:$true] %s41_s17 }
   0x6   :  { %s3923_s22 = smov 16   ;;  %s3924_s23 = smov [#allocation8]  }
   0x7   :  { %47 = dma.hbm_to_vmem [thread:$0]  %s40_s15, 4096, %s42_s17, [#allocation6], %s3922_s21, %s3922_s21, %s3923_s22  }
   0x8   :  { %s69_s24 = sshll.u32 %s3924_s23, 4  ;;  %s26_s26 = sshll.u32 %s4999_s1, 4  ;;  %s70_s24 = int_to_ptr.vmem [resolvable:$true] %s69_s24  ;;  %s27_s26 = int_to_ptr.hbm [resolvable:$true] %s26_s26 }
   0x9   :  { %75 = dma.hbm_to_vmem [thread:$0]  %s68_s20, 4096, %s70_s24, [#allocation9], %s3922_s21, %s3922_s21, %s3923_s22  }
   0xa   :  { %s3925_s5 = smov [#allocation2]   ;;  %s52_s30 = sshll.u32 %s5001_s3, 4  ;;  %s53_s30 = int_to_ptr.hbm [resolvable:$true] %s52_s30 }
   0xb   :  { %s28_s27 = sshll.u32 %s3925_s5, 4  ;;  %s3926_s11 = smov 64   ;;  %s29_s27 = int_to_ptr.vmem [resolvable:$true] %s28_s27 }
   0xc   :  { %s3927_s12 = smov 4   ;;  %s3928_s13 = smov [#allocation7]  }
   0xd   :  { %34 = dma.hbm_to_vmem [thread:$0]  %s27_s26, 1024, %s29_s27, [#allocation3], %s3926_s11, %s3926_s11, %s3927_s12  }
   0xe   :  { %s54_s14 = sshll.u32 %s3928_s13, 4  ;;  %s80_s16 = sshll.u32 %s5004_s6, 4  ;;  %s55_s14 = int_to_ptr.vmem [resolvable:$true] %s54_s14  ;;  %s81_s16 = int_to_ptr.hbm [resolvable:$true] %s80_s16 }
   0xf   :  { %60 = dma.hbm_to_vmem [thread:$0]  %s53_s30, 4096, %s55_s14, [#allocation6], %s3922_s21, %s3922_s21, %s3923_s22  }
  0x10   :  { %s95_s3 = sshll.u32 %s5006_s8, 4  ;;  %s3929_s19 = smov [#allocation10]   ;;  %s96_s3 = int_to_ptr.hbm [resolvable:$true] %s95_s3 }
  0x11   :  { %s82_s20 = sshll.u32 %s3929_s19, 4  ;;  %s3930_s23 = smov [#allocation11]   ;;  %s83_s20 = int_to_ptr.vmem [resolvable:$true] %s82_s20 }
  0x12   :  { %88 = dma.hbm_to_vmem [thread:$0]  %s81_s16, 4096, %s83_s20, [#allocation9], %s3922_s21, %s3922_s21, %s3923_s22  }
  0x13   :  { %s97_s6 = sshll.u32 %s3930_s23, 4  ;;  %s98_s6 = int_to_ptr.vmem [resolvable:$true] %s97_s6 }
  0x14   :  { %103 = dma.hbm_to_vmem [thread:$0]  %s96_s3, 1024, %s98_s6, [#allocation12], %s3926_s11, %s3926_s11, %s3927_s12  }
  0x15   :  { %3911 = dma.done.wait [#allocation3], 1024  }
  0x16   :  { %3912 = vsyncadd [#allocation3], 4294966272 }
  0x17   :  { %3913 = dma.done.wait [#allocation6], 8192  }
  0x18   :  { %3914 = vsyncadd [#allocation6], 4294959104 }
  0x19   :  { %3915 = dma.done.wait [#allocation9], 8192  }
  0x1a   :  { %3916 = vsyncadd [#allocation9], 4294959104 }
  0x1b   :  { %3917 = dma.done.wait [#allocation12], 1024  }
  0x1c   :  { %3918 = vsyncadd [#allocation12], 4294966272  ;;  %v5009_v0 = vmov 0   ;;  %v133_v1 = vld [vmem:[%s4998_s0] sm:$0xff]  ;;  %v3409_v2 = vld [vmem:[#allocation2 + $0x38] sm:$0xff]  ;;  %vm1460_vm3 = vcmask 1040384  }
  0x1d   :  { %3561 = vset.pattern.permute.xlu0 %v5009_v0  ;;  %212 = vmatpush.bf16.msra.mxu0 %v3409_v2  ;;  %v3408_v3 = vld [vmem:[#allocation2 + $0x30] sm:$0xff]  ;;  %v134_v4 = vld [vmem:[%s4998_s0 + $0x8] sm:$0x1]  ;;  %v3406_v6 = vld [vmem:[#allocation2 + $0x20] sm:$0xff]  ;;  %vm1462_vm4 = vcmask 1041408   ;;  %vm1464_vm5 = vcmask 1042432  }
  0x1e   :  { %136 = vperm.xlu0 %3561, %v133_v1   ;;  %v3407_v5 = vld [vmem:[#allocation2 + $0x28] sm:$0xff]  ;;  %v3405_v7 = vld [vmem:[#allocation2 + $0x18] sm:$0xff]  ;;  %v3404_v8 = vld [vmem:[#allocation2 + $0x10] sm:$0xff]  ;;  %vm1466_vm6 = vcmask 1043456   ;;  %vm1468_vm7 = vcmask 1044480   ;;  %vm1470_vm8 = vcmask 1045504  }
  0x1f   :  { %v3403_v9 = vld [vmem:[#allocation2 + $0x8] sm:$0xff]  ;;  %v3402_v10 = vld [vmem:[#allocation2] sm:$0xff]  ;;  %v3440_v12 = vld [vmem:[#allocation5 + $0xec] sm:$0xf0]  ;;  %vm1472_vm9 = vcmask 1046528   ;;  %s3933_s5 = smov [#allocation13]  }
  0x20   :  { %v2972_v11 = vld [vmem:[#allocation5 + $0xe0] sm:$0xf]  ;;  %v3438_v13 = vld [vmem:[#allocation5 + $0xe4] sm:$0xf]  ;;  %v2974_v15 = vld [vmem:[#allocation5 + $0xf0] sm:$0xf0] }
  0x21   :  { %213 = vmatpush.bf16.msra.mxu0 %v3408_v3  ;;  %v2973_v14 = vor.u32 %v3440_v12, %v2972_v11  ;;  %v2980_v16 = vld [vmem:[#allocation5 + $0xe8] sm:$0xf]  ;;  %v3441_v17 = vld [vmem:[#allocation5 + $0xf4] sm:$0xf0]  ;;  %v2977_v18 = vor.u32 %v3438_v13, %v2974_v15  ;;  %v3439_v20 = vld [vmem:[#allocation5 + $0xec] sm:$0xf] }
  0x22   :  { %v2981_v19 = vor.u32 %v3441_v17, %v2980_v16  ;;  %v2982_v21 = vld [vmem:[#allocation5 + $0xf8] sm:$0xf0]  ;;  %v2956_v22 = vld [vmem:[#allocation5 + $0xc0] sm:$0xf]  ;;  %v3436_v24 = vld [vmem:[#allocation5 + $0xcc] sm:$0xf0]  ;;  %v131_v16 = vlaneseq }
  0x23   :  { %461 = vmatpush.bf16.msra.mxu1 %v2973_v14  ;;  %v2985_v23 = vor.u32 %v3439_v20, %v2982_v21  ;;  %v3434_v25 = vld [vmem:[#allocation5 + $0xc4] sm:$0xf]  ;;  %v2958_v26 = vld [vmem:[#allocation5 + $0xd0] sm:$0xf0]  ;;  %475 = vmatpush.bf16.msra.mxu2 %v2977_v18  ;;  %v2957_v27 = vor.u32 %v3436_v24, %v2956_v22  ;;  %v2964_v29 = vld [vmem:[#allocation5 + $0xc8] sm:$0xf] }
  0x24   :  { %489 = vmatpush.bf16.msra.mxu3 %v2981_v19  ;;  %v2961_v28 = vor.u32 %v3434_v25, %v2958_v26  ;;  %v3437_v30 = vld [vmem:[#allocation5 + $0xd4] sm:$0xf0]  ;;  %v3435_v31 = vld [vmem:[#allocation5 + $0xcc] sm:$0xf]  ;;  %v2966_v33 = vld [vmem:[#allocation5 + $0xd8] sm:$0xf0] }
  0x25   :  { %214 = vmatpush.bf16.msra.mxu0 %v3407_v5  ;;  %v2965_v32 = vor.u32 %v3437_v30, %v2964_v29  ;;  %v2940_v34 = vld [vmem:[#allocation5 + $0xa0] sm:$0xf]  ;;  %v3432_v35 = vld [vmem:[#allocation5 + $0xac] sm:$0xf0]  ;;  %v2969_v36 = vor.u32 %v3435_v31, %v2966_v33  ;;  %v3430_v37 = vld [vmem:[#allocation5 + $0xa4] sm:$0xf] }
  0x26   :  { %139 = vperm.xlu0 %3561, %v134_v4   ;;  %v2942_v38 = vld [vmem:[#allocation5 + $0xb0] sm:$0xf0]  ;;  %v2948_v39 = vld [vmem:[#allocation5 + $0xa8] sm:$0xf]  ;;  %v2941_v40 = vor.u32 %v3432_v35, %v2940_v34  ;;  %v3433_v41 = vld [vmem:[#allocation5 + $0xb4] sm:$0xf0] }
  0x27   :  { %462 = vmatpush.bf16.msra.mxu1 %v2957_v27  ;;  %v3431_v42 = vld [vmem:[#allocation5 + $0xac] sm:$0xf]  ;;  %v2950_v43 = vld [vmem:[#allocation5 + $0xb8] sm:$0xf0]  ;;  %476 = vmatpush.bf16.msra.mxu2 %v2961_v28  ;;  %v2945_v44 = vor.u32 %v3430_v37, %v2942_v38  ;;  %v2949_v45 = vor.u32 %v3433_v41, %v2948_v39  ;;  %v2924_v46 = vld [vmem:[#allocation5 + $0x80] sm:$0xf] }
  0x28   :  { %490 = vmatpush.bf16.msra.mxu3 %v2965_v32  ;;  %v3428_v47 = vld [vmem:[#allocation5 + $0x8c] sm:$0xf0]  ;;  %v3426_v48 = vld [vmem:[#allocation5 + $0x84] sm:$0xf]  ;;  %v2953_v49 = vor.u32 %v3431_v42, %v2950_v43  ;;  %v2926_v50 = vld [vmem:[#allocation5 + $0x90] sm:$0xf0] }
  0x29   :  { %215 = vmatpush.bf16.msra.mxu0 %v3406_v6  ;;  %v2932_v51 = vld [vmem:[#allocation5 + $0x88] sm:$0xf]  ;;  %v3429_v52 = vld [vmem:[#allocation5 + $0x94] sm:$0xf0]  ;;  %v3427_v53 = vld [vmem:[#allocation5 + $0x8c] sm:$0xf]  ;;  %v2925_v55 = vor.u32 %v3428_v47, %v2924_v46  ;;  %v2929_v56 = vor.u32 %v3426_v48, %v2926_v50 }
  0x2a   :  { %v2934_v54 = vld [vmem:[#allocation5 + $0x98] sm:$0xf0]  ;;  %v2933_v57 = vor.u32 %v3429_v52, %v2932_v51  ;;  %v2908_v58 = vld [vmem:[#allocation5 + $0x60] sm:$0xf]  ;;  %v3424_v59 = vld [vmem:[#allocation5 + $0x6c] sm:$0xf0] }
  0x2b   :  { %463 = vmatpush.bf16.msra.mxu1 %v2941_v40  ;;  %477 = vmatpush.bf16.msra.mxu2 %v2945_v44  ;;  %v3422_v60 = vld [vmem:[#allocation5 + $0x64] sm:$0xf]  ;;  %v2937_v61 = vor.u32 %v3427_v53, %v2934_v54  ;;  %v2910_v62 = vld [vmem:[#allocation5 + $0x70] sm:$0xf0]  ;;  %v2916_v63 = vld [vmem:[#allocation5 + $0x68] sm:$0xf]  ;;  %v2909_v4 = vor.u32 %v3424_v59, %v2908_v58 }
  0x2c   :  { %491 = vmatpush.bf16.msra.mxu3 %v2949_v45  ;;  %v3425_v1 = vld [vmem:[#allocation5 + $0x74] sm:$0xf0]  ;;  %v3423_v2 = vld [vmem:[#allocation5 + $0x6c] sm:$0xf]  ;;  %v2918_v3 = vld [vmem:[#allocation5 + $0x78] sm:$0xf0]  ;;  %v2913_v5 = vor.u32 %v3422_v60, %v2910_v62 }
  0x2d   :  { %216 = vmatpush.bf16.msra.mxu0 %v3405_v7  ;;  %v2917_v6 = vor.u32 %v3425_v1, %v2916_v63  ;;  %v2892_v7 = vld [vmem:[#allocation5 + $0x40] sm:$0xf]  ;;  %v2894_v11 = vld [vmem:[#allocation5 + $0x50] sm:$0xf0]  ;;  %v2900_v12 = vld [vmem:[#allocation5 + $0x48] sm:$0xf] }
  0x2e   :  { %v3421_v13 = vld [vmem:[#allocation5 + $0x54] sm:$0xf0]  ;;  %v3419_v14 = vld [vmem:[#allocation5 + $0x4c] sm:$0xf]  ;;  %v2902_v15 = vld [vmem:[#allocation5 + $0x58] sm:$0xf0] }
  0x2f   :  { %464 = vmatpush.bf16.msra.mxu1 %v2925_v55  ;;  %478 = vmatpush.bf16.msra.mxu2 %v2929_v56  ;;  %v2901_v19 = vor.u32 %v3421_v13, %v2900_v12  ;;  %v2876_v20 = vld [vmem:[#allocation5 + $0x20] sm:$0xf]  ;;  %v3416_v21 = vld [vmem:[#allocation5 + $0x2c] sm:$0xf0]  ;;  %v3414_v22 = vld [vmem:[#allocation5 + $0x24] sm:$0xf]  ;;  %v2905_v24 = vor.u32 %v3419_v14, %v2902_v15 }
  0x30   :  { %492 = vmatpush.bf16.msra.mxu3 %v2933_v57  ;;  %v2878_v25 = vld [vmem:[#allocation5 + $0x30] sm:$0xf0]  ;;  %v2884_v26 = vld [vmem:[#allocation5 + $0x28] sm:$0xf]  ;;  %v3417_v27 = vld [vmem:[#allocation5 + $0x34] sm:$0xf0]  ;;  %v2877_v31 = vor.u32 %v3416_v21, %v2876_v20 }
  0x31   :  { %217 = vmatpush.bf16.msra.mxu0 %v3404_v8  ;;  %v3420_v8 = vld [vmem:[#allocation5 + $0x4c] sm:$0xf0]  ;;  %v3415_v28 = vld [vmem:[#allocation5 + $0x2c] sm:$0xf]  ;;  %v2886_v29 = vld [vmem:[#allocation5 + $0x38] sm:$0xf0]  ;;  %v2881_v33 = vor.u32 %v3414_v22, %v2878_v25  ;;  %v2885_v34 = vor.u32 %v3417_v27, %v2884_v26 }
  0x32   :  { %v2893_v17 = vor.u32 %v3420_v8, %v2892_v7  ;;  %v132_v30 = vand.u32 127, %v131_v16  ;;  %v2860_v32 = vld [vmem:[#allocation5] sm:$0xf]  ;;  %v3412_v35 = vld [vmem:[#allocation5 + $0xc] sm:$0xf0]  ;;  %v2889_v38 = vor.u32 %v3415_v28, %v2886_v29  ;;  %s2804_s27 = sshll.u32 %s3933_s5, 4  ;;  %s2805_s27 = int_to_ptr.vmem [resolvable:$true] %s2804_s27 }
  0x33   :  { %465 = vmatpush.bf16.msra.mxu1 %v2909_v4  ;;  %479 = vmatpush.bf16.msra.mxu2 %v2913_v5  ;;  %v2862_v37 = vld [vmem:[#allocation5 + $0x10] sm:$0xf0]  ;;  %v2868_v39 = vld [vmem:[#allocation5 + $0x8] sm:$0xf]  ;;  %v3413_v40 = vld [vmem:[#allocation5 + $0x14] sm:$0xf0]  ;;  %v2861_v45 = vor.u32 %v3412_v35, %v2860_v32 }
  0x34   :  { %493 = vmatpush.bf16.msra.mxu3 %v2917_v6  ;;  %v3411_v41 = vld [vmem:[#allocation5 + $0xc] sm:$0xf]  ;;  %v2870_v42 = vld [vmem:[#allocation5 + $0x18] sm:$0xf0]  ;;  %v3100_v43 = vld [vmem:[#allocation7 + $0xe0] sm:$0xf]  ;;  %v2869_v54 = vor.u32 %v3413_v40, %v2868_v39 }
  0x35   :  { %218 = vmatpush.bf16.msra.mxu0 %v3403_v9  ;;  %v3418_v9 = vld [vmem:[#allocation5 + $0x44] sm:$0xf]  ;;  %v3472_v44 = vld [vmem:[#allocation7 + $0xec] sm:$0xf0]  ;;  %v3102_v47 = vld [vmem:[#allocation7 + $0xf0] sm:$0xf0]  ;;  %v2873_v55 = vor.u32 %v3411_v41, %v2870_v42 }
  0x36   :  { %v2897_v18 = vor.u32 %v3418_v9, %v2894_v11  ;;  %v3470_v46 = vld [vmem:[#allocation7 + $0xe4] sm:$0xf]  ;;  %v3108_v48 = vld [vmem:[#allocation7 + $0xe8] sm:$0xf]  ;;  %v3473_v50 = vld [vmem:[#allocation7 + $0xf4] sm:$0xf0]  ;;  %v4028_v56 = vor.u32 %v3472_v44, %v3100_v43 }
  0x37   :  { %466 = vmatpush.bf16.msra.mxu1 %v2893_v17  ;;  %v3471_v51 = vld [vmem:[#allocation7 + $0xec] sm:$0xf]  ;;  %v3110_v52 = vld [vmem:[#allocation7 + $0xf8] sm:$0xf0]  ;;  %v4030_v57 = vor.u32 %v3470_v46, %v3102_v47  ;;  %v4032_v58 = vor.u32 %v3473_v50, %v3108_v48  ;;  %v3932_v60 = vmov 1.0|1.0  }
  0x38   :  { %480 = vmatpush.bf16.msra.mxu2 %v2897_v18  ;;  %494 = vmatpush.bf16.msra.mxu3 %v2901_v19  ;;  %v4034_v59 = vor.u32 %v3471_v51, %v3110_v52  ;;  %v3468_v62 = vld [vmem:[#allocation7 + $0xcc] sm:$0xf0]  ;;  %v3466_v63 = vld [vmem:[#allocation7 + $0xc4] sm:$0xf]  ;;  %v3469_v4 = vld [vmem:[#allocation7 + $0xd4] sm:$0xf0] }
  0x39   :  { %219 = vmatpush.bf16.msra.mxu0 %v3402_v10  ;;  %v2921_v10 = vor.u32 %v3423_v2, %v2918_v3  ;;  %v3086_v2 = vld [vmem:[#allocation7 + $0xd0] sm:$0xf0]  ;;  %v3092_v3 = vld [vmem:[#allocation7 + $0xc8] sm:$0xf]  ;;  %v3467_v7 = vld [vmem:[#allocation7 + $0xcc] sm:$0xf] }
  0x3a   :  { %v4042_v5 = vor.u32 %v3466_v63, %v3086_v2  ;;  %v4044_v6 = vor.u32 %v3469_v4, %v3092_v3  ;;  %v3094_v8 = vld [vmem:[#allocation7 + $0xd8] sm:$0xf0]  ;;  %v3464_v11 = vld [vmem:[#allocation7 + $0xac] sm:$0xf0]  ;;  %v3462_v12 = vld [vmem:[#allocation7 + $0xa4] sm:$0xf] }
  0x3b   :  { %467 = vmatpush.bf16.msra.mxu1 %v2877_v31  ;;  %v4047_v9 = vor.u32 %v3467_v7, %v3094_v8  ;;  %v3070_v14 = vld [vmem:[#allocation7 + $0xb0] sm:$0xf0]  ;;  %v3076_v15 = vld [vmem:[#allocation7 + $0xa8] sm:$0xf]  ;;  %v3465_v16 = vld [vmem:[#allocation7 + $0xb4] sm:$0xf0] }
  0x3c   :  { %481 = vmatpush.bf16.msra.mxu2 %v2881_v33  ;;  %495 = vmatpush.bf16.msra.mxu3 %v2885_v34  ;;  %v4054_v17 = vor.u32 %v3462_v12, %v3070_v14  ;;  %v4056_v18 = vor.u32 %v3465_v16, %v3076_v15  ;;  %v3463_v19 = vld [vmem:[#allocation7 + $0xac] sm:$0xf]  ;;  %v3078_v20 = vld [vmem:[#allocation7 + $0xb8] sm:$0xf0]  ;;  %v3052_v22 = vld [vmem:[#allocation7 + $0x80] sm:$0xf] }
  0x3d   :  { %503 = vmatpush.bf16.msrb.mxu0 %v2985_v23  ;;  %v4058_v21 = vor.u32 %v3463_v19, %v3078_v20  ;;  %v3054_v26 = vld [vmem:[#allocation7 + $0x90] sm:$0xf0]  ;;  %v3060_v27 = vld [vmem:[#allocation7 + $0x88] sm:$0xf]  ;;  %v3461_v28 = vld [vmem:[#allocation7 + $0x94] sm:$0xf0] }
  0x3e   :  { %v3459_v31 = vld [vmem:[#allocation7 + $0x8c] sm:$0xf]  ;;  %v3062_v32 = vld [vmem:[#allocation7 + $0x98] sm:$0xf0]  ;;  %v3036_v34 = vld [vmem:[#allocation7 + $0x60] sm:$0xf] }
  0x3f   :  { %468 = vmatpush.bf16.msra.mxu1 %v2861_v45  ;;  %v4071_v33 = vor.u32 %v3459_v31, %v3062_v32  ;;  %v3456_v35 = vld [vmem:[#allocation7 + $0x6c] sm:$0xf0]  ;;  %v3044_v39 = vld [vmem:[#allocation7 + $0x68] sm:$0xf]  ;;  %v3457_v40 = vld [vmem:[#allocation7 + $0x74] sm:$0xf0] }
  0x40   :  { %496 = vmatpush.bf16.msra.mxu3 %v2869_v54  ;;  %v4080_v42 = vor.u32 %v3457_v40, %v3044_v39  ;;  %v3455_v43 = vld [vmem:[#allocation7 + $0x6c] sm:$0xf]  ;;  %v3046_v44 = vld [vmem:[#allocation7 + $0x78] sm:$0xf0]  ;;  %v3020_v45 = vld [vmem:[#allocation7 + $0x40] sm:$0xf] }
  0x41   :  { %504 = vmatpush.bf16.msrb.mxu0 %v2969_v36  ;;  %v3410_v36 = vld [vmem:[#allocation5 + $0x4] sm:$0xf]  ;;  %v4083_v46 = vor.u32 %v3455_v43, %v3046_v44  ;;  %v3452_v47 = vld [vmem:[#allocation7 + $0x4c] sm:$0xf0]  ;;  %v3028_v52 = vld [vmem:[#allocation7 + $0x48] sm:$0xf] }
  0x42   :  { %v3450_v48 = vld [vmem:[#allocation7 + $0x44] sm:$0xf]  ;;  %v4087_v50 = vor.u32 %v3452_v47, %v3020_v45  ;;  %v3451_v54 = vld [vmem:[#allocation7 + $0x4c] sm:$0xf]  ;;  %v3006_v3 = vld [vmem:[#allocation7 + $0x30] sm:$0xf0] }
  0x43   :  { %677 = vmatpush.bf16.msrb.mxu1 %v4028_v56  ;;  %v3446_v2 = vld [vmem:[#allocation7 + $0x24] sm:$0xf]  ;;  %v3012_v4 = vld [vmem:[#allocation7 + $0x28] sm:$0xf]  ;;  %v3449_v8 = vld [vmem:[#allocation7 + $0x34] sm:$0xf0] }
  0x44   :  { %703 = vmatpush.bf16.msrb.mxu3 %v4032_v58  ;;  %v4101_v12 = vor.u32 %v3446_v2, %v3006_v3  ;;  %v4103_v14 = vor.u32 %v3449_v8, %v3012_v4  ;;  %v2988_v15 = vld [vmem:[#allocation7] sm:$0xf]  ;;  %v3444_v16 = vld [vmem:[#allocation7 + $0xc] sm:$0xf0]  ;;  %v3442_v19 = vld [vmem:[#allocation7 + $0x4] sm:$0xf] }
  0x45   :  { %505 = vmatpush.bf16.msrb.mxu0 %v2953_v49  ;;  %v2865_v49 = vor.u32 %v3410_v36, %v2862_v37  ;;  %v3454_v36 = vld [vmem:[#allocation7 + $0x64] sm:$0xf]  ;;  %v4076_v37 = vor.u32 %v3456_v35, %v3036_v34  ;;  %v4195_v45 = vld [vmem:[%s5002_s4] sm:$0xf]  ;;  %s2806_s30 = sshll.u32 %s5008_s10, 4  ;;  %s3934_s11 = smov 128   ;;  %s2807_s30 = int_to_ptr.hbm [resolvable:$true] %s2806_s30 }
  0x46   :  { %v5012_v3 = vperm.slane %v4195_v45, 2  ;;  %v5011_v8 = vperm.slane %v4195_v45, 3  ;;  %s3935_s12 = smov 8  }
  0x47   :  { %482 = vmatpush.bf16.msra.mxu2 %v2865_v49  ;;  %v3022_v49 = vld [vmem:[#allocation7 + $0x50] sm:$0xf0] }
  0x48   :  { %704 = vmatpush.bf16.msrb.mxu3 %v4044_v6  ;;  %v4089_v51 = vor.u32 %v3450_v48, %v3022_v49  ;;  %v293_v49 = vperm.slane %v4195_v45, 0 }
  0x49   :  { %506 = vmatpush.bf16.msrb.mxu0 %v2937_v61  ;;  %v3084_v61 = vld [vmem:[#allocation7 + $0xc0] sm:$0xf] }
  0x4a   :  { %v4040_v1 = vor.u32 %v3468_v62, %v3084_v61  ;;  %v3004_v61 = vld [vmem:[#allocation7 + $0x20] sm:$0xf]  ;;  %v3448_v62 = vld [vmem:[#allocation7 + $0x2c] sm:$0xf0] }
  0x4b   :  { %690 = vmatpush.bf16.msrb.mxu2 %v4030_v57  ;;  %v4097_v7 = vor.u32 %v3448_v62, %v3004_v61  ;;  %v294_v61 = vperm.slane %v4195_v45, 1 }
  0x4c   :  { %678 = vmatpush.bf16.msrb.mxu1 %v4040_v1  ;;  %705 = vmatpush.bf16.msrb.mxu3 %v4056_v18 }
  0x4d   :  { %507 = vmatpush.bf16.msrb.mxu0 %v2921_v10  ;;  %v3068_v10 = vld [vmem:[#allocation7 + $0xa0] sm:$0xf] }
  0x4e   :  { %v4051_v13 = vor.u32 %v3464_v11, %v3068_v10  ;;  %v3447_v10 = vld [vmem:[#allocation7 + $0x2c] sm:$0xf]  ;;  %v3014_v11 = vld [vmem:[#allocation7 + $0x38] sm:$0xf0] }
  0x4f   :  { %691 = vmatpush.bf16.msrb.mxu2 %v4042_v5  ;;  %v4106_v20 = vor.u32 %v3447_v10, %v3014_v11 }
  0x50   :  { %679 = vmatpush.bf16.msrb.mxu1 %v4051_v13 }
  0x51   :  { %508 = vmatpush.bf16.msrb.mxu0 %v2905_v24  ;;  %v3458_v24 = vld [vmem:[#allocation7 + $0x84] sm:$0xf] }
  0x52   :  { %v4066_v29 = vor.u32 %v3458_v24, %v3054_v26  ;;  %v3445_v24 = vld [vmem:[#allocation7 + $0x14] sm:$0xf0]  ;;  %v3443_v26 = vld [vmem:[#allocation7 + $0xc] sm:$0xf] }
  0x53   :  { %692 = vmatpush.bf16.msrb.mxu2 %v4054_v17 }
  0x55   :  { %509 = vmatpush.bf16.msrb.mxu0 %v2889_v38  ;;  %v3038_v38 = vld [vmem:[#allocation7 + $0x70] sm:$0xf0] }
  0x56   :  { %v4078_v41 = vor.u32 %v3454_v36, %v3038_v38 }
  0x57   :  { %693 = vmatpush.bf16.msrb.mxu2 %v4066_v29 }
  0x59   :  { %510 = vmatpush.bf16.msrb.mxu0 %v2873_v55 }
  0x5b   :  { %694 = vmatpush.bf16.msrb.mxu2 %v4078_v41 }
  0x5f   :  { %695 = vmatpush.bf16.msrb.mxu2 %v4089_v51 }
  0x63   :  { %696 = vmatpush.bf16.msrb.mxu2 %v4101_v12 }
  0x90   :  { %v137_v23 = vpop.permute.xlu0 %136 }
  0x91   :  { %vm141_vm0 = vcmp.eq.s32.totalorder %v137_v23, %v132_v30  ;;  %v3460_v23 = vld [vmem:[#allocation7 + $0x8c] sm:$0xf0] }
  0x92   :  { %v4064_v25 = vor.u32 %v3460_v23, %v3052_v22  ;;  %v2990_v22 = vld [vmem:[#allocation7 + $0x10] sm:$0xf0]  ;;  %v2996_v23 = vld [vmem:[#allocation7 + $0x8] sm:$0xf] }
  0x93   :  { %v4113_v31 = vor.u32 %v3442_v19, %v2990_v22  ;;  %v4115_v32 = vor.u32 %v3445_v24, %v2996_v23 }
  0x94   :  { %680 = vmatpush.bf16.msrb.mxu1 %v4064_v25 }
  0x95   :  { %697 = vmatpush.bf16.msrb.mxu2 %v4113_v31 }
  0x98   :  { %v140_v53 = vpop.permute.xlu0 %139  ;;  %681 = vmatpush.bf16.msrb.mxu1 %v4076_v37 }
  0x99   :  { %vm142_vm1 = vcmp.eq.s32.totalorder %v140_v53, %v132_v30  ;;  %v4068_v30 = vor.u32 %v3461_v28, %v3060_v27  ;;  %v3453_v53 = vld [vmem:[#allocation7 + $0x54] sm:$0xf0]  ;;  %v2998_v27 = vld [vmem:[#allocation7 + $0x18] sm:$0xf0]  ;;  %v4109_v28 = vor.u32 %v3444_v16, %v2988_v15 }
  0x9a   :  { %vm2856_vm2 = vmpackc.low %vm142_vm1, %vm141_vm0  ;;  %v4092_v55 = vor.u32 %v3453_v53, %v3028_v52  ;;  %v4118_v34 = vor.u32 %v3443_v26, %v2998_v27 }
  0x9b   :  { %2857 = vmatmul.msk.bf16.vlgmr.msra.gmra.mxu0 %vm2856_vm2, %v3932_v60  ;;  %706 = vmatpush.bf16.msrb.mxu3 %v4068_v30  ;;  %v3030_v60 = vld [vmem:[#allocation7 + $0x58] sm:$0xf0] }
  0x9c   :  { %716 = vmatpush.bf16.msra.mxu0 %v4034_v59  ;;  %v4094_v63 = vor.u32 %v3451_v54, %v3030_v60  ;;  %682 = vmatpush.bf16.msrb.mxu1 %v4087_v50 }
  0x9f   :  { %707 = vmatpush.bf16.msrb.mxu3 %v4080_v42 }
  0xa0   :  { %717 = vmatpush.bf16.msra.mxu0 %v4047_v9  ;;  %683 = vmatpush.bf16.msrb.mxu1 %v4097_v7 }
  0xa3   :  { %708 = vmatpush.bf16.msrb.mxu3 %v4092_v55 }
  0xa4   :  { %718 = vmatpush.bf16.msra.mxu0 %v4058_v21  ;;  %684 = vmatpush.bf16.msrb.mxu1 %v4109_v28 }
  0xa7   :  { %709 = vmatpush.bf16.msrb.mxu3 %v4103_v14 }
  0xa8   :  { %719 = vmatpush.bf16.msra.mxu0 %v4071_v33 }
  0xab   :  { %710 = vmatpush.bf16.msrb.mxu3 %v4115_v32 }
  0xac   :  { %720 = vmatpush.bf16.msra.mxu0 %v4083_v46 }
  0xb0   :  { %721 = vmatpush.bf16.msra.mxu0 %v4094_v63 }
  0xb4   :  { %722 = vmatpush.bf16.msra.mxu0 %v4106_v20 }
  0xb8   :  { %723 = vmatpush.bf16.msra.mxu0 %v4118_v34 }
 0x118   :  { %v221_v35 = vpop.f32.mrf.mxu0 }
 0x120   :  { %v223_v36 = vpop.f32.mrf.mxu0 }
 0x121   :  { %v291_v38 = vpack.c.bf16 %v223_v36, %v221_v35 }
 0x123   :  { %469 = vmatmul.bf16.vlgmr.msra.gmra.mxu1 %v291_v38  ;;  %483 = vmatmul.bf16.vlgmr.msra.gmra.mxu2 %v291_v38 }
 0x124   :  { %497 = vmatmul.bf16.vlgmr.msra.gmra.mxu3 %v291_v38  ;;  %511 = vmatmul.bf16.vlgmr.msrb.gmra.mxu0 %v291_v38 }
 0x125   :  { %749 = vmatpush.bf16.msra.mxu1 %v4028_v56  ;;  %762 = vmatpush.bf16.msra.mxu2 %v4030_v57 }
 0x126   :  { %775 = vmatpush.bf16.msra.mxu3 %v4032_v58  ;;  %788 = vmatpush.bf16.msrb.mxu0 %v4034_v59 }
 0x129   :  { %750 = vmatpush.bf16.msra.mxu1 %v4040_v1  ;;  %763 = vmatpush.bf16.msra.mxu2 %v4042_v5 }
 0x12a   :  { %776 = vmatpush.bf16.msra.mxu3 %v4044_v6  ;;  %789 = vmatpush.bf16.msrb.mxu0 %v4047_v9 }
 0x12d   :  { %751 = vmatpush.bf16.msra.mxu1 %v4051_v13  ;;  %764 = vmatpush.bf16.msra.mxu2 %v4054_v17 }
 0x12e   :  { %777 = vmatpush.bf16.msra.mxu3 %v4056_v18  ;;  %790 = vmatpush.bf16.msrb.mxu0 %v4058_v21 }
 0x131   :  { %752 = vmatpush.bf16.msra.mxu1 %v4064_v25  ;;  %765 = vmatpush.bf16.msra.mxu2 %v4066_v29 }
 0x132   :  { %778 = vmatpush.bf16.msra.mxu3 %v4068_v30  ;;  %791 = vmatpush.bf16.msrb.mxu0 %v4071_v33 }
 0x133   :  { %685 = vmatmul.bf16.vlgmr.msrb.gmra.mxu1 %v5009_v0  ;;  %698 = vmatmul.bf16.vlgmr.msrb.gmra.mxu2 %v5009_v0 }
 0x134   :  { %711 = vmatmul.bf16.vlgmr.msrb.gmra.mxu3 %v5009_v0  ;;  %724 = vmatmul.bf16.vlgmr.msra.gmra.mxu0 %v5009_v0 }
 0x135   :  { %753 = vmatpush.bf16.msra.mxu1 %v4076_v37  ;;  %766 = vmatpush.bf16.msra.mxu2 %v4078_v41 }
 0x136   :  { %779 = vmatpush.bf16.msra.mxu3 %v4080_v42  ;;  %792 = vmatpush.bf16.msrb.mxu0 %v4083_v46 }
 0x139   :  { %754 = vmatpush.bf16.msra.mxu1 %v4087_v50  ;;  %767 = vmatpush.bf16.msra.mxu2 %v4089_v51 }
 0x13a   :  { %780 = vmatpush.bf16.msra.mxu3 %v4092_v55  ;;  %793 = vmatpush.bf16.msrb.mxu0 %v4094_v63 }
 0x13d   :  { %755 = vmatpush.bf16.msra.mxu1 %v4097_v7  ;;  %768 = vmatpush.bf16.msra.mxu2 %v4101_v12 }
 0x13e   :  { %781 = vmatpush.bf16.msra.mxu3 %v4103_v14  ;;  %794 = vmatpush.bf16.msrb.mxu0 %v4106_v20 }
 0x141   :  { %756 = vmatpush.bf16.msra.mxu1 %v4109_v28  ;;  %769 = vmatpush.bf16.msra.mxu2 %v4113_v31 }
 0x142   :  { %782 = vmatpush.bf16.msra.mxu3 %v4115_v32  ;;  %795 = vmatpush.bf16.msrb.mxu0 %v4118_v34 }
 0x145   :  { %840 = vmatpush.bf16.msrb.mxu1 %v4028_v56  ;;  %853 = vmatpush.bf16.msrb.mxu2 %v4030_v57 }
 0x146   :  { %866 = vmatpush.bf16.msrb.mxu3 %v4032_v58  ;;  %879 = vmatpush.bf16.msra.mxu0 %v4034_v59 }
 0x149   :  { %841 = vmatpush.bf16.msrb.mxu1 %v4040_v1  ;;  %854 = vmatpush.bf16.msrb.mxu2 %v4042_v5 }
 0x14a   :  { %867 = vmatpush.bf16.msrb.mxu3 %v4044_v6  ;;  %880 = vmatpush.bf16.msra.mxu0 %v4047_v9 }
 0x14d   :  { %842 = vmatpush.bf16.msrb.mxu1 %v4051_v13  ;;  %855 = vmatpush.bf16.msrb.mxu2 %v4054_v17 }
 0x14e   :  { %868 = vmatpush.bf16.msrb.mxu3 %v4056_v18  ;;  %881 = vmatpush.bf16.msra.mxu0 %v4058_v21 }
 0x151   :  { %843 = vmatpush.bf16.msrb.mxu1 %v4064_v25  ;;  %856 = vmatpush.bf16.msrb.mxu2 %v4066_v29 }
 0x152   :  { %869 = vmatpush.bf16.msrb.mxu3 %v4068_v30  ;;  %882 = vmatpush.bf16.msra.mxu0 %v4071_v33 }
 0x155   :  { %844 = vmatpush.bf16.msrb.mxu1 %v4076_v37  ;;  %857 = vmatpush.bf16.msrb.mxu2 %v4078_v41 }
 0x156   :  { %870 = vmatpush.bf16.msrb.mxu3 %v4080_v42  ;;  %883 = vmatpush.bf16.msra.mxu0 %v4083_v46 }
 0x159   :  { %845 = vmatpush.bf16.msrb.mxu1 %v4087_v50  ;;  %858 = vmatpush.bf16.msrb.mxu2 %v4089_v51 }
 0x15a   :  { %871 = vmatpush.bf16.msrb.mxu3 %v4092_v55  ;;  %884 = vmatpush.bf16.msra.mxu0 %v4094_v63 }
 0x15d   :  { %846 = vmatpush.bf16.msrb.mxu1 %v4097_v7  ;;  %859 = vmatpush.bf16.msrb.mxu2 %v4101_v12 }
 0x15e   :  { %872 = vmatpush.bf16.msrb.mxu3 %v4103_v14  ;;  %885 = vmatpush.bf16.msra.mxu0 %v4106_v20 }
 0x161   :  { %847 = vmatpush.bf16.msrb.mxu1 %v4109_v28  ;;  %860 = vmatpush.bf16.msrb.mxu2 %v4113_v31 }
 0x162   :  { %873 = vmatpush.bf16.msrb.mxu3 %v4115_v32  ;;  %886 = vmatpush.bf16.msra.mxu0 %v4118_v34 }
 0x1a0   :  { %v470_v39 = vpop.f32.mrf.mxu1 }
 0x1a1   :  { %v512_v40 = vpop.f32.mrf.mxu0  ;;  %v4206_v53 = vadd.f32 %v470_v39, %v293_v49 }
 0x1a2   :  { %v4226_v24 = vadd.f32 %v512_v40, %v5011_v8 }
 0x1a6   :  { %v484_v43 = vpop.f32.mrf.mxu2 }
 0x1a7   :  { %v498_v44 = vpop.f32.mrf.mxu3  ;;  %v4215_v4 = vadd.f32 %v484_v43, %v294_v61 }
 0x1a8   :  { %v4197_v47 = vpop.f32.mrf.mxu1  ;;  %v4220_v10 = vadd.f32 %v498_v44, %v5012_v3 }
 0x1a9   :  { %v4199_v48 = vpop.f32.mrf.mxu0 }
 0x1ae   :  { %v4202_v52 = vpop.f32.mrf.mxu2 }
 0x1af   :  { %v4208_v54 = vpop.f32.mrf.mxu3 }
 0x1b0   :  { %v686_v60 = vpop.f32.mrf.mxu1 }
 0x1b1   :  { %v729_v62 = vadd.f32 %v686_v60, %v4206_v53  ;;  %v725_v2 = vpop.f32.mrf.mxu0 }
 0x1b2   :  { %v732_v27 = vadd.f32 %v725_v2, %v4226_v24 }
 0x1b3   :  { %3563 = vtanh.f32 %v729_v62 }
 0x1b6   :  { %v699_v11 = vpop.f32.mrf.mxu2 }
 0x1b7   :  { %v730_v15 = vadd.f32 %v699_v11, %v4215_v4  ;;  %v712_v16 = vpop.f32.mrf.mxu3 }
 0x1b8   :  { %v731_v19 = vadd.f32 %v712_v16, %v4220_v10  ;;  %v688_v22 = vpop.f32.mrf.mxu1 }
 0x1b9   :  { %3565 = vtanh.f32 %v730_v15  ;;  %v727_v23 = vpop.f32.mrf.mxu0  ;;  %v3564_v26 = vpop.eup %3563 }
 0x1ba   :  { %3567 = vtanh.f32 %v731_v19  ;;  %v737_v35 = vadd.f32 1.0, %v3564_v26 }
 0x1bb   :  { %3569 = vtanh.f32 %v732_v27 }
 0x1bc   :  { %v738_v60 = vmul.f32 0.5, %v737_v35 }
 0x1be   :  { %v701_v36 = vpop.f32.mrf.mxu2 }
 0x1bf   :  { %v3566_v38 = vpop.eup %3565  ;;  %v714_v39 = vpop.f32.mrf.mxu3 }
 0x1c0   :  { %v739_v43 = vadd.f32 1.0, %v3566_v38  ;;  %v3568_v44 = vpop.eup %3567 }
 0x1c1   :  { %v744_v15 = vmul.f32 %v3568_v44, %v738_v60  ;;  %v3570_v16 = vpop.eup %3569 }
 0x1c2   :  { %v740_v62 = vmul.f32 0.5, %v739_v43  ;;  %v741_v40 = vadd.f32 1.0, %v3570_v16 }
 0x1c4   :  { %v743_v11 = vmul.f32 0.0, %v740_v62  ;;  %v742_v19 = vmul.f32 0.5, %v741_v40 }
 0x1c6   :  { %v4229_v22 = vadd.f32 %v744_v15, %v743_v11 }
 0x1c8   :  { %3571 = vtanh.f32 %v4229_v22 }
 0x1ce   :  { %v3572_v23 = vpop.eup %3571 }
 0x1cf   :  { %v4232_v2 = vmul.f32 %v3572_v23, %v742_v19 }
 0x1d1   :  { %v748_v26 = vpack.c.bf16 %v4232_v2, %v4232_v2 }
 0x1d3   :  { %757 = vmatmul.bf16.vlgmr.msra.gmra.mxu1 %v748_v26  ;;  %770 = vmatmul.bf16.vlgmr.msra.gmra.mxu2 %v748_v26 }
 0x1d4   :  { %783 = vmatmul.bf16.vlgmr.msra.gmra.mxu3 %v748_v26  ;;  %796 = vmatmul.bf16.vlgmr.msrb.gmra.mxu0 %v748_v26 }
 0x1d5   :  { %930 = vmatpush.bf16.msra.mxu1 %v4028_v56  ;;  %943 = vmatpush.bf16.msra.mxu2 %v4030_v57 }
 0x1d6   :  { %956 = vmatpush.bf16.msra.mxu3 %v4032_v58  ;;  %969 = vmatpush.bf16.msrb.mxu0 %v4034_v59 }
 0x1d9   :  { %931 = vmatpush.bf16.msra.mxu1 %v4040_v1  ;;  %944 = vmatpush.bf16.msra.mxu2 %v4042_v5 }
 0x1da   :  { %957 = vmatpush.bf16.msra.mxu3 %v4044_v6  ;;  %970 = vmatpush.bf16.msrb.mxu0 %v4047_v9 }
 0x1dd   :  { %932 = vmatpush.bf16.msra.mxu1 %v4051_v13  ;;  %945 = vmatpush.bf16.msra.mxu2 %v4054_v17 }
 0x1de   :  { %958 = vmatpush.bf16.msra.mxu3 %v4056_v18  ;;  %971 = vmatpush.bf16.msrb.mxu0 %v4058_v21 }
 0x1e1   :  { %933 = vmatpush.bf16.msra.mxu1 %v4064_v25  ;;  %946 = vmatpush.bf16.msra.mxu2 %v4066_v29 }
 0x1e2   :  { %959 = vmatpush.bf16.msra.mxu3 %v4068_v30  ;;  %972 = vmatpush.bf16.msrb.mxu0 %v4071_v33 }
 0x1e5   :  { %934 = vmatpush.bf16.msra.mxu1 %v4076_v37  ;;  %947 = vmatpush.bf16.msra.mxu2 %v4078_v41 }
 0x1e6   :  { %960 = vmatpush.bf16.msra.mxu3 %v4080_v42  ;;  %973 = vmatpush.bf16.msrb.mxu0 %v4083_v46 }
 0x1e9   :  { %935 = vmatpush.bf16.msra.mxu1 %v4087_v50  ;;  %948 = vmatpush.bf16.msra.mxu2 %v4089_v51 }
 0x1ea   :  { %961 = vmatpush.bf16.msra.mxu3 %v4092_v55  ;;  %974 = vmatpush.bf16.msrb.mxu0 %v4094_v63 }
 0x1ed   :  { %936 = vmatpush.bf16.msra.mxu1 %v4097_v7  ;;  %949 = vmatpush.bf16.msra.mxu2 %v4101_v12 }
 0x1ee   :  { %962 = vmatpush.bf16.msra.mxu3 %v4103_v14  ;;  %975 = vmatpush.bf16.msrb.mxu0 %v4106_v20 }
 0x1f1   :  { %937 = vmatpush.bf16.msra.mxu1 %v4109_v28  ;;  %950 = vmatpush.bf16.msra.mxu2 %v4113_v31 }
 0x1f2   :  { %963 = vmatpush.bf16.msra.mxu3 %v4115_v32  ;;  %976 = vmatpush.bf16.msrb.mxu0 %v4118_v34 }
 0x250   :  { %v758_v27 = vpop.f32.mrf.mxu1 }
 0x251   :  { %v805_v35 = vrot.slane %v758_v27, 7  ;;  %v797_v36 = vpop.f32.mrf.mxu0 }
 0x252   :  { %v808_v16 = vrot.slane %v797_v36, 7 }
 0x253   :  { %v813_v38 = vadd.f32 %v805_v35, %v4206_v53 }
 0x254   :  { %v816_v23 = vadd.f32 %v808_v16, %v4226_v24 }
 0x255   :  { %3573 = vtanh.f32 %v813_v38 }
 0x256   :  { %v771_v39 = vpop.f32.mrf.mxu2 }
 0x257   :  { %v806_v43 = vrot.slane %v771_v39, 7  ;;  %v784_v44 = vpop.f32.mrf.mxu3 }
 0x258   :  { %v807_v60 = vrot.slane %v784_v44, 7  ;;  %v760_v62 = vpop.f32.mrf.mxu1 }
 0x259   :  { %v814_v11 = vadd.f32 %v806_v43, %v4215_v4  ;;  %v799_v15 = vpop.f32.mrf.mxu0  ;;  %v828_v43 = vrot.slane %v4229_v22, 7 }
 0x25a   :  { %v815_v40 = vadd.f32 %v807_v60, %v4220_v10 }
 0x25b   :  { %3575 = vtanh.f32 %v814_v11  ;;  %v3574_v19 = vpop.eup %3573 }
 0x25c   :  { %3577 = vtanh.f32 %v815_v40  ;;  %v821_v35 = vadd.f32 1.0, %v3574_v19 }
 0x25d   :  { %3579 = vtanh.f32 %v816_v23 }
 0x25e   :  { %v773_v26 = vpop.f32.mrf.mxu2  ;;  %v822_v44 = vmul.f32 0.5, %v821_v35 }
 0x25f   :  { %v786_v27 = vpop.f32.mrf.mxu3 }
 0x261   :  { %v3576_v0 = vpop.eup %3575 }
 0x262   :  { %v823_v38 = vadd.f32 1.0, %v3576_v0  ;;  %v3578_v39 = vpop.eup %3577 }
 0x263   :  { %v831_v36 = vmul.f32 %v3578_v39, %v822_v44  ;;  %v3580_v8 = vpop.eup %3579 }
 0x264   :  { %v824_v62 = vmul.f32 0.5, %v823_v38  ;;  %v825_v11 = vadd.f32 1.0, %v3580_v8 }
 0x266   :  { %v830_v15 = vmul.f32 %v828_v43, %v824_v62  ;;  %v826_v16 = vmul.f32 0.5, %v825_v11 }
 0x268   :  { %v4273_v60 = vadd.f32 %v831_v36, %v830_v15 }
 0x26a   :  { %3581 = vtanh.f32 %v4273_v60 }
 0x270   :  { %v3582_v40 = vpop.eup %3581 }
 0x271   :  { %v4276_v26 = vmul.f32 %v3582_v40, %v826_v16 }
 0x273   :  { %v835_v0 = vpack.c.bf16 %v4276_v26, %v4276_v26 }
 0x275   :  { %v837_v19 = vshrl.u32 %v835_v0, 16 }
 0x277   :  { %848 = vmatmul.bf16.vlgmr.msrb.gmra.mxu1 %v837_v19  ;;  %861 = vmatmul.bf16.vlgmr.msrb.gmra.mxu2 %v837_v19 }
 0x278   :  { %874 = vmatmul.bf16.vlgmr.msrb.gmra.mxu3 %v837_v19  ;;  %887 = vmatmul.bf16.vlgmr.msra.gmra.mxu0 %v837_v19 }
 0x279   :  { %1022 = vmatpush.bf16.msrb.mxu1 %v4028_v56  ;;  %1035 = vmatpush.bf16.msrb.mxu2 %v4030_v57 }
 0x27a   :  { %1048 = vmatpush.bf16.msrb.mxu3 %v4032_v58  ;;  %1061 = vmatpush.bf16.msra.mxu0 %v4034_v59 }
 0x27d   :  { %1023 = vmatpush.bf16.msrb.mxu1 %v4040_v1  ;;  %1036 = vmatpush.bf16.msrb.mxu2 %v4042_v5 }
 0x27e   :  { %1049 = vmatpush.bf16.msrb.mxu3 %v4044_v6  ;;  %1062 = vmatpush.bf16.msra.mxu0 %v4047_v9 }
 0x281   :  { %1024 = vmatpush.bf16.msrb.mxu1 %v4051_v13  ;;  %1037 = vmatpush.bf16.msrb.mxu2 %v4054_v17 }
 0x282   :  { %1050 = vmatpush.bf16.msrb.mxu3 %v4056_v18  ;;  %1063 = vmatpush.bf16.msra.mxu0 %v4058_v21 }
 0x285   :  { %1025 = vmatpush.bf16.msrb.mxu1 %v4064_v25  ;;  %1038 = vmatpush.bf16.msrb.mxu2 %v4066_v29 }
 0x286   :  { %1051 = vmatpush.bf16.msrb.mxu3 %v4068_v30  ;;  %1064 = vmatpush.bf16.msra.mxu0 %v4071_v33 }
 0x289   :  { %1026 = vmatpush.bf16.msrb.mxu1 %v4076_v37  ;;  %1039 = vmatpush.bf16.msrb.mxu2 %v4078_v41 }
 0x28a   :  { %1052 = vmatpush.bf16.msrb.mxu3 %v4080_v42  ;;  %1065 = vmatpush.bf16.msra.mxu0 %v4083_v46 }
 0x28d   :  { %1027 = vmatpush.bf16.msrb.mxu1 %v4087_v50  ;;  %1040 = vmatpush.bf16.msrb.mxu2 %v4089_v51 }
 0x28e   :  { %1053 = vmatpush.bf16.msrb.mxu3 %v4092_v55  ;;  %1066 = vmatpush.bf16.msra.mxu0 %v4094_v63 }
 0x291   :  { %1028 = vmatpush.bf16.msrb.mxu1 %v4097_v7  ;;  %1041 = vmatpush.bf16.msrb.mxu2 %v4101_v12 }
 0x292   :  { %1054 = vmatpush.bf16.msrb.mxu3 %v4103_v14  ;;  %1067 = vmatpush.bf16.msra.mxu0 %v4106_v20 }
 0x295   :  { %1029 = vmatpush.bf16.msrb.mxu1 %v4109_v28  ;;  %1042 = vmatpush.bf16.msrb.mxu2 %v4113_v31 }
 0x296   :  { %1055 = vmatpush.bf16.msrb.mxu3 %v4115_v32  ;;  %1068 = vmatpush.bf16.msra.mxu0 %v4118_v34 }
 0x2f4   :  { %v849_v8 = vpop.f32.mrf.mxu1 }
 0x2f5   :  { %v896_v22 = vrot.slane %v849_v8, 6  ;;  %v888_v23 = vpop.f32.mrf.mxu0 }
 0x2f6   :  { %v899_v36 = vrot.slane %v888_v23, 6 }
 0x2f7   :  { %v904_v27 = vadd.f32 %v896_v22, %v4206_v53 }
 0x2f8   :  { %v907_v40 = vadd.f32 %v899_v36, %v4226_v24 }
 0x2f9   :  { %3583 = vtanh.f32 %v904_v27 }
 0x2fa   :  { %v862_v35 = vpop.f32.mrf.mxu2 }
 0x2fb   :  { %v897_v38 = vrot.slane %v862_v35, 6  ;;  %v875_v39 = vpop.f32.mrf.mxu3 }
 0x2fc   :  { %v898_v44 = vrot.slane %v875_v39, 6  ;;  %v851_v62 = vpop.f32.mrf.mxu1 }
 0x2fd   :  { %v905_v43 = vadd.f32 %v897_v38, %v4215_v4  ;;  %v890_v15 = vpop.f32.mrf.mxu0  ;;  %v919_v38 = vrot.slane %v4273_v60, 7 }
 0x2fe   :  { %v906_v11 = vadd.f32 %v898_v44, %v4220_v10 }
 0x2ff   :  { %3585 = vtanh.f32 %v905_v43  ;;  %v3584_v16 = vpop.eup %3583 }
 0x300   :  { %3587 = vtanh.f32 %v906_v11  ;;  %v912_v8 = vadd.f32 1.0, %v3584_v16 }
 0x301   :  { %3589 = vtanh.f32 %v907_v40  ;;  %v1461_v40 = vsel %vm1460_vm3, %v4232_v2, %v4276_v26 }
 0x302   :  { %v864_v0 = vpop.f32.mrf.mxu2  ;;  %v913_v39 = vmul.f32 0.5, %v912_v8 }
 0x303   :  { %v877_v19 = vpop.f32.mrf.mxu3 }
 0x305   :  { %v3586_v22 = vpop.eup %3585 }
 0x306   :  { %v914_v27 = vadd.f32 1.0, %v3586_v22  ;;  %v3588_v35 = vpop.eup %3587 }
 0x307   :  { %v922_v23 = vmul.f32 %v3588_v35, %v913_v39  ;;  %v3590_v3 = vpop.eup %3589 }
 0x308   :  { %v915_v62 = vmul.f32 0.5, %v914_v27  ;;  %v916_v43 = vadd.f32 1.0, %v3590_v3 }
 0x30a   :  { %v921_v15 = vmul.f32 %v919_v38, %v915_v62  ;;  %v917_v36 = vmul.f32 0.5, %v916_v43 }
 0x30c   :  { %v4317_v44 = vadd.f32 %v922_v23, %v921_v15 }
 0x30e   :  { %3591 = vtanh.f32 %v4317_v44 }
 0x314   :  { %v3592_v11 = vpop.eup %3591 }
 0x315   :  { %v925_v16 = vmul.f32 %v3592_v11, %v917_v36 }
 0x317   :  { %v926_v0 = vpack.c.bf16 %v925_v16, %v925_v16  ;;  %v4324_v60 = vsel %vm1462_vm4, %v1461_v40, %v925_v16 }
 0x319   :  { %v928_v19 = vrot.slane %v926_v0, 1 }
 0x31b   :  { %938 = vmatmul.bf16.vlgmr.msra.gmra.mxu1 %v928_v19  ;;  %951 = vmatmul.bf16.vlgmr.msra.gmra.mxu2 %v928_v19 }
 0x31c   :  { %964 = vmatmul.bf16.vlgmr.msra.gmra.mxu3 %v928_v19  ;;  %977 = vmatmul.bf16.vlgmr.msrb.gmra.mxu0 %v928_v19 }
 0x31d   :  { %1112 = vmatpush.bf16.msra.mxu1 %v4028_v56  ;;  %1125 = vmatpush.bf16.msra.mxu2 %v4030_v57 }
 0x31e   :  { %1138 = vmatpush.bf16.msra.mxu3 %v4032_v58  ;;  %1151 = vmatpush.bf16.msrb.mxu0 %v4034_v59 }
 0x321   :  { %1113 = vmatpush.bf16.msra.mxu1 %v4040_v1  ;;  %1126 = vmatpush.bf16.msra.mxu2 %v4042_v5 }
 0x322   :  { %1139 = vmatpush.bf16.msra.mxu3 %v4044_v6  ;;  %1152 = vmatpush.bf16.msrb.mxu0 %v4047_v9 }
 0x325   :  { %1114 = vmatpush.bf16.msra.mxu1 %v4051_v13  ;;  %1127 = vmatpush.bf16.msra.mxu2 %v4054_v17 }
 0x326   :  { %1140 = vmatpush.bf16.msra.mxu3 %v4056_v18  ;;  %1153 = vmatpush.bf16.msrb.mxu0 %v4058_v21 }
 0x329   :  { %1115 = vmatpush.bf16.msra.mxu1 %v4064_v25  ;;  %1128 = vmatpush.bf16.msra.mxu2 %v4066_v29 }
 0x32a   :  { %1141 = vmatpush.bf16.msra.mxu3 %v4068_v30  ;;  %1154 = vmatpush.bf16.msrb.mxu0 %v4071_v33 }
 0x32d   :  { %1116 = vmatpush.bf16.msra.mxu1 %v4076_v37  ;;  %1129 = vmatpush.bf16.msra.mxu2 %v4078_v41 }
 0x32e   :  { %1142 = vmatpush.bf16.msra.mxu3 %v4080_v42  ;;  %1155 = vmatpush.bf16.msrb.mxu0 %v4083_v46 }
 0x331   :  { %1117 = vmatpush.bf16.msra.mxu1 %v4087_v50  ;;  %1130 = vmatpush.bf16.msra.mxu2 %v4089_v51 }
 0x332   :  { %1143 = vmatpush.bf16.msra.mxu3 %v4092_v55  ;;  %1156 = vmatpush.bf16.msrb.mxu0 %v4094_v63 }
 0x335   :  { %1118 = vmatpush.bf16.msra.mxu1 %v4097_v7  ;;  %1131 = vmatpush.bf16.msra.mxu2 %v4101_v12 }
 0x336   :  { %1144 = vmatpush.bf16.msra.mxu3 %v4103_v14  ;;  %1157 = vmatpush.bf16.msrb.mxu0 %v4106_v20 }
 0x339   :  { %1119 = vmatpush.bf16.msra.mxu1 %v4109_v28  ;;  %1132 = vmatpush.bf16.msra.mxu2 %v4113_v31 }
 0x33a   :  { %1145 = vmatpush.bf16.msra.mxu3 %v4115_v32  ;;  %1158 = vmatpush.bf16.msrb.mxu0 %v4118_v34 }
 0x398   :  { %v939_v3 = vpop.f32.mrf.mxu1 }
 0x399   :  { %v986_v2 = vrot.slane %v939_v3, 5  ;;  %v978_v26 = vpop.f32.mrf.mxu0 }
 0x39a   :  { %v989_v23 = vrot.slane %v978_v26, 5 }
 0x39b   :  { %v994_v8 = vadd.f32 %v986_v2, %v4206_v53 }
 0x39c   :  { %v997_v11 = vadd.f32 %v989_v23, %v4226_v24 }
 0x39d   :  { %3593 = vtanh.f32 %v994_v8 }
 0x39e   :  { %v952_v22 = vpop.f32.mrf.mxu2 }
 0x39f   :  { %v987_v27 = vrot.slane %v952_v22, 5  ;;  %v965_v35 = vpop.f32.mrf.mxu3 }
 0x3a0   :  { %v988_v39 = vrot.slane %v965_v35, 5  ;;  %v941_v62 = vpop.f32.mrf.mxu1 }
 0x3a1   :  { %v995_v38 = vadd.f32 %v987_v27, %v4215_v4  ;;  %v980_v15 = vpop.f32.mrf.mxu0  ;;  %v1009_v27 = vrot.slane %v4317_v44, 7 }
 0x3a2   :  { %v996_v43 = vadd.f32 %v988_v39, %v4220_v10 }
 0x3a3   :  { %3595 = vtanh.f32 %v995_v38  ;;  %v3594_v36 = vpop.eup %3593 }
 0x3a4   :  { %3597 = vtanh.f32 %v996_v43  ;;  %v1002_v0 = vadd.f32 1.0, %v3594_v36 }
 0x3a5   :  { %3599 = vtanh.f32 %v997_v11 }
 0x3a6   :  { %v954_v16 = vpop.f32.mrf.mxu2  ;;  %v1003_v8 = vmul.f32 0.5, %v1002_v0 }
 0x3a7   :  { %v967_v40 = vpop.f32.mrf.mxu3 }
 0x3a9   :  { %v3596_v19 = vpop.eup %3595 }
 0x3aa   :  { %v1004_v3 = vadd.f32 1.0, %v3596_v19  ;;  %v3598_v2 = vpop.eup %3597 }
 0x3ab   :  { %v1012_v26 = vmul.f32 %v3598_v2, %v1003_v8  ;;  %v3600_v62 = vpop.eup %3599 }
 0x3ac   :  { %v1005_v22 = vmul.f32 0.5, %v1004_v3  ;;  %v1006_v38 = vadd.f32 1.0, %v3600_v62 }
 0x3ae   :  { %v1011_v35 = vmul.f32 %v1009_v27, %v1005_v22  ;;  %v1007_v15 = vmul.f32 0.5, %v1006_v38 }
 0x3b0   :  { %v4363_v39 = vadd.f32 %v1012_v26, %v1011_v35 }
 0x3b2   :  { %3601 = vtanh.f32 %v4363_v39 }
 0x3b8   :  { %v3602_v23 = vpop.eup %3601 }
 0x3b9   :  { %v1015_v43 = vmul.f32 %v3602_v23, %v1007_v15 }
 0x3bb   :  { %v1016_v36 = vpack.c.bf16 %v1015_v43, %v1015_v43  ;;  %v4368_v11 = vsel %vm1464_vm5, %v4324_v60, %v1015_v43 }
 0x3bd   :  { %v1018_v16 = vshrl.u32 %v1016_v36, 16 }
 0x3bf   :  { %v1020_v40 = vrot.slane %v1018_v16, 1 }
 0x3c1   :  { %1030 = vmatmul.bf16.vlgmr.msrb.gmra.mxu1 %v1020_v40  ;;  %1043 = vmatmul.bf16.vlgmr.msrb.gmra.mxu2 %v1020_v40 }
 0x3c2   :  { %1056 = vmatmul.bf16.vlgmr.msrb.gmra.mxu3 %v1020_v40  ;;  %1069 = vmatmul.bf16.vlgmr.msra.gmra.mxu0 %v1020_v40 }
 0x3c3   :  { %1204 = vmatpush.bf16.msrb.mxu1 %v4028_v56  ;;  %1217 = vmatpush.bf16.msrb.mxu2 %v4030_v57 }
 0x3c4   :  { %1230 = vmatpush.bf16.msrb.mxu3 %v4032_v58  ;;  %1243 = vmatpush.bf16.msra.mxu0 %v4034_v59 }
 0x3c7   :  { %1205 = vmatpush.bf16.msrb.mxu1 %v4040_v1  ;;  %1218 = vmatpush.bf16.msrb.mxu2 %v4042_v5 }
 0x3c8   :  { %1231 = vmatpush.bf16.msrb.mxu3 %v4044_v6  ;;  %1244 = vmatpush.bf16.msra.mxu0 %v4047_v9 }
 0x3cb   :  { %1206 = vmatpush.bf16.msrb.mxu1 %v4051_v13  ;;  %1219 = vmatpush.bf16.msrb.mxu2 %v4054_v17 }
 0x3cc   :  { %1232 = vmatpush.bf16.msrb.mxu3 %v4056_v18  ;;  %1245 = vmatpush.bf16.msra.mxu0 %v4058_v21 }
 0x3cf   :  { %1207 = vmatpush.bf16.msrb.mxu1 %v4064_v25  ;;  %1220 = vmatpush.bf16.msrb.mxu2 %v4066_v29 }
 0x3d0   :  { %1233 = vmatpush.bf16.msrb.mxu3 %v4068_v30  ;;  %1246 = vmatpush.bf16.msra.mxu0 %v4071_v33 }
 0x3d3   :  { %1208 = vmatpush.bf16.msrb.mxu1 %v4076_v37  ;;  %1221 = vmatpush.bf16.msrb.mxu2 %v4078_v41 }
 0x3d4   :  { %1234 = vmatpush.bf16.msrb.mxu3 %v4080_v42  ;;  %1247 = vmatpush.bf16.msra.mxu0 %v4083_v46 }
 0x3d7   :  { %1209 = vmatpush.bf16.msrb.mxu1 %v4087_v50  ;;  %1222 = vmatpush.bf16.msrb.mxu2 %v4089_v51 }
 0x3d8   :  { %1235 = vmatpush.bf16.msrb.mxu3 %v4092_v55  ;;  %1248 = vmatpush.bf16.msra.mxu0 %v4094_v63 }
 0x3db   :  { %1210 = vmatpush.bf16.msrb.mxu1 %v4097_v7  ;;  %1223 = vmatpush.bf16.msrb.mxu2 %v4101_v12 }
 0x3dc   :  { %1236 = vmatpush.bf16.msrb.mxu3 %v4103_v14  ;;  %1249 = vmatpush.bf16.msra.mxu0 %v4106_v20 }
 0x3df   :  { %1211 = vmatpush.bf16.msrb.mxu1 %v4109_v28  ;;  %1224 = vmatpush.bf16.msrb.mxu2 %v4113_v31 }
 0x3e0   :  { %1237 = vmatpush.bf16.msrb.mxu3 %v4115_v32  ;;  %1250 = vmatpush.bf16.msra.mxu0 %v4118_v34 }
 0x43e   :  { %v1031_v44 = vpop.f32.mrf.mxu1 }
 0x43f   :  { %v1078_v60 = vrot.slane %v1031_v44, 4  ;;  %v1070_v0 = vpop.f32.mrf.mxu0 }
 0x440   :  { %v1081_v62 = vrot.slane %v1070_v0, 4 }
 0x441   :  { %v1086_v19 = vadd.f32 %v1078_v60, %v4206_v53 }
 0x442   :  { %v1089_v23 = vadd.f32 %v1081_v62, %v4226_v24 }
 0x443   :  { %3603 = vtanh.f32 %v1086_v19 }
 0x444   :  { %v1044_v3 = vpop.f32.mrf.mxu2 }
 0x445   :  { %v1079_v2 = vrot.slane %v1044_v3, 4  ;;  %v1057_v8 = vpop.f32.mrf.mxu3 }
 0x446   :  { %v1080_v22 = vrot.slane %v1057_v8, 4  ;;  %v1033_v27 = vpop.f32.mrf.mxu1 }
 0x447   :  { %v1087_v35 = vadd.f32 %v1079_v2, %v4215_v4  ;;  %v1072_v26 = vpop.f32.mrf.mxu0  ;;  %v1101_v2 = vrot.slane %v4363_v39, 7 }
 0x448   :  { %v1088_v38 = vadd.f32 %v1080_v22, %v4220_v10 }
 0x449   :  { %3605 = vtanh.f32 %v1087_v35  ;;  %v3604_v15 = vpop.eup %3603 }
 0x44a   :  { %3607 = vtanh.f32 %v1088_v38  ;;  %v1094_v16 = vadd.f32 1.0, %v3604_v15 }
 0x44b   :  { %3609 = vtanh.f32 %v1089_v23 }
 0x44c   :  { %v1046_v43 = vpop.f32.mrf.mxu2  ;;  %v1095_v19 = vmul.f32 0.5, %v1094_v16 }
 0x44d   :  { %v1059_v36 = vpop.f32.mrf.mxu3 }
 0x44f   :  { %v3606_v40 = vpop.eup %3605 }
 0x450   :  { %v1096_v44 = vadd.f32 1.0, %v3606_v40  ;;  %v3608_v60 = vpop.eup %3607 }
 0x451   :  { %v1104_v0 = vmul.f32 %v3608_v60, %v1095_v19  ;;  %v3610_v27 = vpop.eup %3609 }
 0x452   :  { %v1097_v3 = vmul.f32 0.5, %v1096_v44  ;;  %v1098_v35 = vadd.f32 1.0, %v3610_v27 }
 0x454   :  { %v1103_v8 = vmul.f32 %v1101_v2, %v1097_v3  ;;  %v1099_v26 = vmul.f32 0.5, %v1098_v35 }
 0x456   :  { %v4407_v22 = vadd.f32 %v1104_v0, %v1103_v8 }
 0x458   :  { %3611 = vtanh.f32 %v4407_v22 }
 0x45e   :  { %v3612_v62 = vpop.eup %3611 }
 0x45f   :  { %v1107_v38 = vmul.f32 %v3612_v62, %v1099_v26 }
 0x461   :  { %v1108_v15 = vpack.c.bf16 %v1107_v38, %v1107_v38  ;;  %v4412_v23 = vsel %vm1466_vm6, %v4368_v11, %v1107_v38 }
 0x463   :  { %v1110_v43 = vrot.slane %v1108_v15, 2 }
 0x465   :  { %1120 = vmatmul.bf16.vlgmr.msra.gmra.mxu1 %v1110_v43  ;;  %1133 = vmatmul.bf16.vlgmr.msra.gmra.mxu2 %v1110_v43 }
 0x466   :  { %1146 = vmatmul.bf16.vlgmr.msra.gmra.mxu3 %v1110_v43  ;;  %1159 = vmatmul.bf16.vlgmr.msrb.gmra.mxu0 %v1110_v43 }
 0x467   :  { %1294 = vmatpush.bf16.msra.mxu1 %v4028_v56  ;;  %1307 = vmatpush.bf16.msra.mxu2 %v4030_v57 }
 0x468   :  { %1320 = vmatpush.bf16.msra.mxu3 %v4032_v58  ;;  %1333 = vmatpush.bf16.msrb.mxu0 %v4034_v59 }
 0x46b   :  { %1295 = vmatpush.bf16.msra.mxu1 %v4040_v1  ;;  %1308 = vmatpush.bf16.msra.mxu2 %v4042_v5 }
 0x46c   :  { %1321 = vmatpush.bf16.msra.mxu3 %v4044_v6  ;;  %1334 = vmatpush.bf16.msrb.mxu0 %v4047_v9 }
 0x46f   :  { %1296 = vmatpush.bf16.msra.mxu1 %v4051_v13  ;;  %1309 = vmatpush.bf16.msra.mxu2 %v4054_v17 }
 0x470   :  { %1322 = vmatpush.bf16.msra.mxu3 %v4056_v18  ;;  %1335 = vmatpush.bf16.msrb.mxu0 %v4058_v21 }
 0x473   :  { %1297 = vmatpush.bf16.msra.mxu1 %v4064_v25  ;;  %1310 = vmatpush.bf16.msra.mxu2 %v4066_v29 }
 0x474   :  { %1323 = vmatpush.bf16.msra.mxu3 %v4068_v30  ;;  %1336 = vmatpush.bf16.msrb.mxu0 %v4071_v33 }
 0x477   :  { %1298 = vmatpush.bf16.msra.mxu1 %v4076_v37  ;;  %1311 = vmatpush.bf16.msra.mxu2 %v4078_v41 }
 0x478   :  { %1324 = vmatpush.bf16.msra.mxu3 %v4080_v42  ;;  %1337 = vmatpush.bf16.msrb.mxu0 %v4083_v46 }
 0x47b   :  { %1299 = vmatpush.bf16.msra.mxu1 %v4087_v50  ;;  %1312 = vmatpush.bf16.msra.mxu2 %v4089_v51 }
 0x47c   :  { %1325 = vmatpush.bf16.msra.mxu3 %v4092_v55  ;;  %1338 = vmatpush.bf16.msrb.mxu0 %v4094_v63 }
 0x47f   :  { %1300 = vmatpush.bf16.msra.mxu1 %v4097_v7  ;;  %1313 = vmatpush.bf16.msra.mxu2 %v4101_v12 }
 0x480   :  { %1326 = vmatpush.bf16.msra.mxu3 %v4103_v14  ;;  %1339 = vmatpush.bf16.msrb.mxu0 %v4106_v20 }
 0x483   :  { %1301 = vmatpush.bf16.msra.mxu1 %v4109_v28  ;;  %1314 = vmatpush.bf16.msra.mxu2 %v4113_v31 }
 0x484   :  { %1327 = vmatpush.bf16.msra.mxu3 %v4115_v32  ;;  %1340 = vmatpush.bf16.msrb.mxu0 %v4118_v34 }
 0x4e2   :  { %v1121_v39 = vpop.f32.mrf.mxu1 }
 0x4e3   :  { %v1168_v11 = vrot.slane %v1121_v39, 3  ;;  %v1160_v36 = vpop.f32.mrf.mxu0 }
 0x4e4   :  { %v1171_v0 = vrot.slane %v1160_v36, 3 }
 0x4e5   :  { %v1176_v16 = vadd.f32 %v1168_v11, %v4206_v53 }
 0x4e6   :  { %v1179_v26 = vadd.f32 %v1171_v0, %v4226_v24 }
 0x4e7   :  { %3613 = vtanh.f32 %v1176_v16 }
 0x4e8   :  { %v1134_v40 = vpop.f32.mrf.mxu2 }
 0x4e9   :  { %v1169_v44 = vrot.slane %v1134_v40, 3  ;;  %v1147_v60 = vpop.f32.mrf.mxu3 }
 0x4ea   :  { %v1170_v19 = vrot.slane %v1147_v60, 3  ;;  %v1123_v3 = vpop.f32.mrf.mxu1 }
 0x4eb   :  { %v1177_v2 = vadd.f32 %v1169_v44, %v4215_v4  ;;  %v1162_v8 = vpop.f32.mrf.mxu0  ;;  %v1191_v44 = vrot.slane %v4407_v22, 7 }
 0x4ec   :  { %v1178_v27 = vadd.f32 %v1170_v19, %v4220_v10 }
 0x4ed   :  { %3615 = vtanh.f32 %v1177_v2  ;;  %v3614_v35 = vpop.eup %3613 }
 0x4ee   :  { %3617 = vtanh.f32 %v1178_v27  ;;  %v1184_v15 = vadd.f32 1.0, %v3614_v35 }
 0x4ef   :  { %3619 = vtanh.f32 %v1179_v26 }
 0x4f0   :  { %v1136_v62 = vpop.f32.mrf.mxu2  ;;  %v1185_v16 = vmul.f32 0.5, %v1184_v15 }
 0x4f1   :  { %v1149_v38 = vpop.f32.mrf.mxu3 }
 0x4f3   :  { %v3616_v43 = vpop.eup %3615 }
 0x4f4   :  { %v1186_v39 = vadd.f32 1.0, %v3616_v43  ;;  %v3618_v11 = vpop.eup %3617 }
 0x4f5   :  { %v1194_v36 = vmul.f32 %v3618_v11, %v1185_v16  ;;  %v3620_v3 = vpop.eup %3619 }
 0x4f6   :  { %v1187_v40 = vmul.f32 0.5, %v1186_v39  ;;  %v1188_v2 = vadd.f32 1.0, %v3620_v3 }
 0x4f8   :  { %v1193_v60 = vmul.f32 %v1191_v44, %v1187_v40  ;;  %v1189_v8 = vmul.f32 0.5, %v1188_v2 }
 0x4fa   :  { %v4451_v19 = vadd.f32 %v1194_v36, %v1193_v60 }
 0x4fc   :  { %3621 = vtanh.f32 %v4451_v19 }
 0x502   :  { %v3622_v0 = vpop.eup %3621 }
 0x503   :  { %v1197_v27 = vmul.f32 %v3622_v0, %v1189_v8 }
 0x505   :  { %v1198_v35 = vpack.c.bf16 %v1197_v27, %v1197_v27  ;;  %v4456_v26 = vsel %vm1468_vm7, %v4412_v23, %v1197_v27  ;;  %v3228_v27 = vld [vmem:[#allocation8 + $0xe0] sm:$0xf] }
 0x507   :  { %v1200_v62 = vshrl.u32 %v1198_v35, 16  ;;  %v3504_v35 = vld [vmem:[#allocation8 + $0xec] sm:$0xf0] }
 0x509   :  { %v1202_v38 = vrot.slane %v1200_v62, 2  ;;  %v3229_v62 = vor.u32 %v3504_v35, %v3228_v27 }
 0x50b   :  { %1212 = vmatmul.bf16.vlgmr.msrb.gmra.mxu1 %v1202_v38  ;;  %1225 = vmatmul.bf16.vlgmr.msrb.gmra.mxu2 %v1202_v38 }
 0x50c   :  { %1238 = vmatmul.bf16.vlgmr.msrb.gmra.mxu3 %v1202_v38  ;;  %1251 = vmatmul.bf16.vlgmr.msra.gmra.mxu0 %v1202_v38  ;;  %v3230_v38 = vld [vmem:[#allocation8 + $0xf0] sm:$0xf0] }
 0x50d   :  { %1386 = vmatpush.bf16.msrb.mxu1 %v4028_v56  ;;  %1399 = vmatpush.bf16.msrb.mxu2 %v4030_v57 }
 0x50e   :  { %1412 = vmatpush.bf16.msrb.mxu3 %v4032_v58  ;;  %1425 = vmatpush.bf16.msra.mxu0 %v4034_v59 }
 0x511   :  { %1387 = vmatpush.bf16.msrb.mxu1 %v4040_v1  ;;  %1400 = vmatpush.bf16.msrb.mxu2 %v4042_v5 }
 0x512   :  { %1413 = vmatpush.bf16.msrb.mxu3 %v4044_v6  ;;  %1426 = vmatpush.bf16.msra.mxu0 %v4047_v9 }
 0x515   :  { %1388 = vmatpush.bf16.msrb.mxu1 %v4051_v13  ;;  %1401 = vmatpush.bf16.msrb.mxu2 %v4054_v17 }
 0x516   :  { %1414 = vmatpush.bf16.msrb.mxu3 %v4056_v18  ;;  %1427 = vmatpush.bf16.msra.mxu0 %v4058_v21 }
 0x519   :  { %1389 = vmatpush.bf16.msrb.mxu1 %v4064_v25  ;;  %1402 = vmatpush.bf16.msrb.mxu2 %v4066_v29 }
 0x51a   :  { %1415 = vmatpush.bf16.msrb.mxu3 %v4068_v30  ;;  %1428 = vmatpush.bf16.msra.mxu0 %v4071_v33 }
 0x51d   :  { %1390 = vmatpush.bf16.msrb.mxu1 %v4076_v37  ;;  %1403 = vmatpush.bf16.msrb.mxu2 %v4078_v41 }
 0x51e   :  { %1416 = vmatpush.bf16.msrb.mxu3 %v4080_v42  ;;  %1429 = vmatpush.bf16.msra.mxu0 %v4083_v46 }
 0x521   :  { %1391 = vmatpush.bf16.msrb.mxu1 %v4087_v50  ;;  %1404 = vmatpush.bf16.msrb.mxu2 %v4089_v51 }
 0x522   :  { %1417 = vmatpush.bf16.msrb.mxu3 %v4092_v55  ;;  %1430 = vmatpush.bf16.msra.mxu0 %v4094_v63  ;;  %v1283_v63 = vrot.slane %v4451_v19, 7 }
 0x525   :  { %1392 = vmatpush.bf16.msrb.mxu1 %v4097_v7  ;;  %1405 = vmatpush.bf16.msrb.mxu2 %v4101_v12 }
 0x526   :  { %1418 = vmatpush.bf16.msrb.mxu3 %v4103_v14  ;;  %1431 = vmatpush.bf16.msra.mxu0 %v4106_v20 }
 0x529   :  { %1393 = vmatpush.bf16.msrb.mxu1 %v4109_v28  ;;  %1406 = vmatpush.bf16.msrb.mxu2 %v4113_v31 }
 0x52a   :  { %1419 = vmatpush.bf16.msrb.mxu3 %v4115_v32  ;;  %1432 = vmatpush.bf16.msra.mxu0 %v4118_v34 }
 0x588   :  { %v1213_v56 = vpop.f32.mrf.mxu1 }
 0x589   :  { %v1260_v57 = vrot.slane %v1213_v56, 2  ;;  %v1252_v58 = vpop.f32.mrf.mxu0  ;;  %v3236_v56 = vld [vmem:[#allocation8 + $0xe8] sm:$0xf] }
 0x58a   :  { %v1263_v21 = vrot.slane %v1252_v58, 2 }
 0x58b   :  { %v1268_v59 = vadd.f32 %v1260_v57, %v4206_v53 }
 0x58c   :  { %v1271_v30 = vadd.f32 %v1263_v21, %v4226_v24  ;;  %v3214_v21 = vld [vmem:[#allocation8 + $0xd0] sm:$0xf0] }
 0x58d   :  { %3623 = vtanh.f32 %v1268_v59 }
 0x58e   :  { %v1226_v1 = vpop.f32.mrf.mxu2 }
 0x58f   :  { %v1261_v5 = vrot.slane %v1226_v1, 2  ;;  %v1239_v6 = vpop.f32.mrf.mxu3  ;;  %v3503_v1 = vld [vmem:[#allocation8 + $0xec] sm:$0xf] }
 0x590   :  { %v1262_v9 = vrot.slane %v1239_v6, 2  ;;  %v1215_v13 = vpop.f32.mrf.mxu1 }
 0x591   :  { %v1269_v17 = vadd.f32 %v1261_v5, %v4215_v4  ;;  %v1254_v18 = vpop.f32.mrf.mxu0  ;;  %v3238_v5 = vld [vmem:[#allocation8 + $0xf8] sm:$0xf0] }
 0x592   :  { %v1270_v25 = vadd.f32 %v1262_v9, %v4220_v10  ;;  %v3241_v6 = vor.u32 %v3503_v1, %v3238_v5  ;;  %v3500_v9 = vld [vmem:[#allocation8 + $0xcc] sm:$0xf0]  ;;  %v3498_v18 = vld [vmem:[#allocation8 + $0xc4] sm:$0xf] }
 0x593   :  { %3625 = vtanh.f32 %v1269_v17  ;;  %v3624_v29 = vpop.eup %3623 }
 0x594   :  { %3627 = vtanh.f32 %v1270_v25  ;;  %v1276_v41 = vadd.f32 1.0, %v3624_v29 }
 0x595   :  { %3629 = vtanh.f32 %v1271_v30  ;;  %v3217_v30 = vor.u32 %v3498_v18, %v3214_v21  ;;  %v3166_v18 = vld [vmem:[#allocation8 + $0x70] sm:$0xf0]  ;;  %v3172_v21 = vld [vmem:[#allocation8 + $0x68] sm:$0xf] }
 0x596   :  { %v1228_v33 = vpop.f32.mrf.mxu2  ;;  %v1277_v51 = vmul.f32 0.5, %v1276_v41 }
 0x597   :  { %v1241_v37 = vpop.f32.mrf.mxu3  ;;  %v3220_v33 = vld [vmem:[#allocation8 + $0xc8] sm:$0xf] }
 0x598   :  { %v3501_v37 = vld [vmem:[#allocation8 + $0xd4] sm:$0xf0] }
 0x599   :  { %v3626_v42 = vpop.eup %3625  ;;  %v3221_v41 = vor.u32 %v3501_v37, %v3220_v33  ;;  %v3487_v33 = vld [vmem:[#allocation8 + $0x6c] sm:$0xf]  ;;  %v3174_v37 = vld [vmem:[#allocation8 + $0x78] sm:$0xf0] }
 0x59a   :  { %v1278_v46 = vadd.f32 1.0, %v3626_v42  ;;  %v3628_v50 = vpop.eup %3627  ;;  %v3499_v42 = vld [vmem:[#allocation8 + $0xcc] sm:$0xf] }
 0x59b   :  { %v1286_v12 = vmul.f32 %v3628_v50, %v1277_v51  ;;  %v3630_v14 = vpop.eup %3629  ;;  %v3196_v50 = vld [vmem:[#allocation8 + $0xa0] sm:$0xf] }
 0x59c   :  { %v1279_v55 = vmul.f32 0.5, %v1278_v46  ;;  %v1280_v28 = vadd.f32 1.0, %v3630_v14  ;;  %v3222_v46 = vld [vmem:[#allocation8 + $0xd8] sm:$0xf0] }
 0x59e   :  { %v1285_v7 = vmul.f32 %v1283_v63, %v1279_v55  ;;  %v1281_v31 = vmul.f32 0.5, %v1280_v28  ;;  %v3225_v55 = vor.u32 %v3499_v42, %v3222_v46  ;;  %v3494_v63 = vld [vmem:[#allocation8 + $0xa4] sm:$0xf]  ;;  %v3148_v42 = vld [vmem:[#allocation8 + $0x40] sm:$0xf] }
 0x59f   :  { %v3484_v46 = vld [vmem:[#allocation8 + $0x4c] sm:$0xf0] }
 0x5a0   :  { %v4495_v20 = vadd.f32 %v1286_v12, %v1285_v7  ;;  %v3198_v7 = vld [vmem:[#allocation8 + $0xb0] sm:$0xf0] }
 0x5a1   :  { %v3201_v28 = vor.u32 %v3494_v63, %v3198_v7  ;;  %v3485_v63 = vld [vmem:[#allocation8 + $0x54] sm:$0xf0] }
 0x5a2   :  { %3631 = vtanh.f32 %v4495_v20 }
 0x5a8   :  { %v3632_v32 = vpop.eup %3631 }
 0x5a9   :  { %v1289_v34 = vmul.f32 %v3632_v32, %v1281_v31  ;;  %v3204_v31 = vld [vmem:[#allocation8 + $0xa8] sm:$0xf]  ;;  %v3497_v32 = vld [vmem:[#allocation8 + $0xb4] sm:$0xf0] }
 0x5ab   :  { %v1290_v22 = vpack.c.bf16 %v1289_v34, %v1289_v34  ;;  %v4500_v23 = vsel %vm1470_vm8, %v4456_v26, %v1289_v34  ;;  %v3502_v26 = vld [vmem:[#allocation8 + $0xe4] sm:$0xf] }
 0x5ac   :  { %v3233_v58 = vor.u32 %v3502_v26, %v3230_v38  ;;  %v3492_v38 = vld [vmem:[#allocation8 + $0x8c] sm:$0xf0] }
 0x5ad   :  { %v1292_v15 = vrot.slane %v1290_v22, 3  ;;  %v3205_v22 = vor.u32 %v3497_v32, %v3204_v31  ;;  %v3132_v32 = vld [vmem:[#allocation8 + $0x20] sm:$0xf] }
 0x5af   :  { %1302 = vmatmul.bf16.vlgmr.msra.gmra.mxu1 %v1292_v15  ;;  %1315 = vmatmul.bf16.vlgmr.msra.gmra.mxu2 %v1292_v15 }
 0x5b0   :  { %1328 = vmatmul.bf16.vlgmr.msra.gmra.mxu3 %v1292_v15  ;;  %1341 = vmatmul.bf16.vlgmr.msrb.gmra.mxu0 %v1292_v15  ;;  %v3495_v15 = vld [vmem:[#allocation8 + $0xac] sm:$0xf] }
 0x5b1   :  { %1709 = vmatpush.bf16.msra.mxu1 %v3229_v62  ;;  %1723 = vmatpush.bf16.msra.mxu2 %v3233_v58  ;;  %v3180_v62 = vld [vmem:[#allocation8 + $0x80] sm:$0xf]  ;;  %v3188_v58 = vld [vmem:[#allocation8 + $0x88] sm:$0xf] }
 0x5b2   :  { %1751 = vmatpush.bf16.msrb.mxu0 %v3241_v6  ;;  %v3491_v6 = vld [vmem:[#allocation8 + $0x8c] sm:$0xf] }
 0x5b5   :  { %1724 = vmatpush.bf16.msra.mxu2 %v3217_v30 }
 0x5b6   :  { %1752 = vmatpush.bf16.msrb.mxu0 %v3225_v55  ;;  %v3150_v55 = vld [vmem:[#allocation8 + $0x50] sm:$0xf0] }
 0x5b9   :  { %1725 = vmatpush.bf16.msra.mxu2 %v3201_v28  ;;  %v3158_v28 = vld [vmem:[#allocation8 + $0x58] sm:$0xf0] }
 0x62c   :  { %v1303_v43 = vpop.f32.mrf.mxu1 }
 0x62d   :  { %v1350_v39 = vrot.slane %v1303_v43, 1  ;;  %v1342_v11 = vpop.f32.mrf.mxu0  ;;  %v3206_v43 = vld [vmem:[#allocation8 + $0xb8] sm:$0xf0] }
 0x62e   :  { %v1353_v19 = vrot.slane %v1342_v11, 1 }
 0x62f   :  { %v1358_v16 = vadd.f32 %v1350_v39, %v4206_v53  ;;  %v3505_v53 = vld [vmem:[#allocation8 + $0xf4] sm:$0xf0] }
 0x630   :  { %v3237_v59 = vor.u32 %v3505_v53, %v3236_v56  ;;  %v3490_v56 = vld [vmem:[#allocation8 + $0x84] sm:$0xf]  ;;  %v3181_v53 = vor.u32 %v3492_v38, %v3180_v62 }
 0x631   :  { %3633 = vtanh.f32 %v1358_v16  ;;  %v1373_v16 = vrot.slane %v4495_v20, 7 }
 0x632   :  { %v1316_v40 = vpop.f32.mrf.mxu2  ;;  %1737 = vmatpush.bf16.msra.mxu3 %v3237_v59  ;;  %v3493_v59 = vld [vmem:[#allocation8 + $0x94] sm:$0xf0] }
 0x633   :  { %v1351_v44 = vrot.slane %v1316_v40, 1  ;;  %v1329_v60 = vpop.f32.mrf.mxu3  ;;  %v3209_v40 = vor.u32 %v3495_v15, %v3206_v43  ;;  %v3189_v5 = vor.u32 %v3493_v59, %v3188_v58  ;;  %v3134_v43 = vld [vmem:[#allocation8 + $0x30] sm:$0xf0]  ;;  %v3536_v59 = vld [vmem:[#allocation10 + $0xec] sm:$0xf0] }
 0x634   :  { %v1352_v36 = vrot.slane %v1329_v60, 1  ;;  %v1305_v3 = vpop.f32.mrf.mxu1 }
 0x635   :  { %v1359_v2 = vadd.f32 %v1351_v44, %v4215_v4  ;;  %v1344_v8 = vpop.f32.mrf.mxu0  ;;  %v3212_v4 = vld [vmem:[#allocation8 + $0xc0] sm:$0xf]  ;;  %1753 = vmatpush.bf16.msrb.mxu0 %v3209_v40 }
 0x636   :  { %v1360_v0 = vadd.f32 %v1352_v36, %v4220_v10  ;;  %v1361_v10 = vadd.f32 %v1353_v19, %v4226_v24  ;;  %v3213_v17 = vor.u32 %v3500_v9, %v3212_v4  ;;  %v3496_v24 = vld [vmem:[#allocation8 + $0xac] sm:$0xf0]  ;;  %1738 = vmatpush.bf16.msra.mxu3 %v3221_v41  ;;  %v3190_v4 = vld [vmem:[#allocation8 + $0x98] sm:$0xf0]  ;;  %v3164_v9 = vld [vmem:[#allocation8 + $0x60] sm:$0xf]  ;;  %v3177_v41 = vor.u32 %v3487_v33, %v3174_v37 }
 0x637   :  { %3635 = vtanh.f32 %v1359_v2  ;;  %v3634_v57 = vpop.eup %3633  ;;  %v3197_v14 = vor.u32 %v3496_v24, %v3196_v50  ;;  %v3482_v50 = vld [vmem:[#allocation8 + $0x44] sm:$0xf]  ;;  %v3156_v24 = vld [vmem:[#allocation8 + $0x48] sm:$0xf]  ;;  %v3342_v33 = vld [vmem:[#allocation10 + $0xd0] sm:$0xf0] }
 0x638   :  { %3637 = vtanh.f32 %v1360_v0  ;;  %v1366_v25 = vadd.f32 1.0, %v3634_v57  ;;  %1710 = vmatpush.bf16.msra.mxu1 %v3213_v17  ;;  %v3182_v57 = vld [vmem:[#allocation8 + $0x90] sm:$0xf0]  ;;  %v3153_v7 = vor.u32 %v3482_v50, %v3150_v55  ;;  %v3348_v37 = vld [vmem:[#allocation10 + $0xc8] sm:$0xf] }
 0x639   :  { %3639 = vtanh.f32 %v1361_v10  ;;  %v3185_v1 = vor.u32 %v3490_v56, %v3182_v57  ;;  %v3488_v10 = vld [vmem:[#allocation8 + $0x6c] sm:$0xf0]  ;;  %v3475_v56 = vld [vmem:[#allocation8 + $0xc] sm:$0xf]  ;;  %v3356_v57 = vld [vmem:[#allocation10 + $0xe0] sm:$0xf] }
 0x63a   :  { %v1318_v13 = vpop.f32.mrf.mxu2  ;;  %v1367_v39 = vmul.f32 0.5, %v1366_v25  ;;  %1739 = vmatpush.bf16.msra.mxu3 %v3205_v22  ;;  %v3165_v17 = vor.u32 %v3488_v10, %v3164_v9  ;;  %v3489_v25 = vld [vmem:[#allocation8 + $0x74] sm:$0xf0]  ;;  %v3478_v22 = vld [vmem:[#allocation8 + $0x24] sm:$0xf] }
 0x63b   :  { %v1331_v29 = vpop.f32.mrf.mxu3  ;;  %1726 = vmatpush.bf16.msra.mxu2 %v3185_v1  ;;  %v3486_v13 = vld [vmem:[#allocation8 + $0x64] sm:$0xf]  ;;  %v3173_v30 = vor.u32 %v3489_v25, %v3172_v21  ;;  %v3537_v9 = vld [vmem:[#allocation10 + $0xf4] sm:$0xf0]  ;;  %v3535_v10 = vld [vmem:[#allocation10 + $0xec] sm:$0xf] }
 0x63c   :  { %1711 = vmatpush.bf16.msra.mxu1 %v3197_v14  ;;  %v3169_v29 = vor.u32 %v3486_v13, %v3166_v18  ;;  %v3483_v14 = vld [vmem:[#allocation8 + $0x4c] sm:$0xf]  ;;  %v3534_v1 = vld [vmem:[#allocation10 + $0xe4] sm:$0xf]  ;;  %v3340_v18 = vld [vmem:[#allocation10 + $0xc0] sm:$0xf] }
 0x63d   :  { %v3636_v51 = vpop.eup %3635  ;;  %v3161_v31 = vor.u32 %v3483_v14, %v3158_v28  ;;  %v3532_v21 = vld [vmem:[#allocation10 + $0xcc] sm:$0xf0]  ;;  %v3350_v50 = vld [vmem:[#allocation10 + $0xd8] sm:$0xf0]  ;;  %v3332_v14 = vld [vmem:[#allocation10 + $0xa8] sm:$0xf] }
 0x63e   :  { %v1368_v12 = vadd.f32 1.0, %v3636_v51  ;;  %v3638_v34 = vpop.eup %3637  ;;  %1740 = vmatpush.bf16.msra.mxu3 %v3189_v5  ;;  %v3149_v51 = vor.u32 %v3484_v46, %v3148_v42  ;;  %v3358_v5 = vld [vmem:[#allocation10 + $0xf0] sm:$0xf0]  ;;  %v3533_v42 = vld [vmem:[#allocation10 + $0xd4] sm:$0xf0] }
 0x63f   :  { %v1376_v60 = vmul.f32 %v3638_v34, %v1367_v39  ;;  %v3640_v36 = vpop.eup %3639  ;;  %1727 = vmatpush.bf16.msra.mxu2 %v3169_v29  ;;  %v3480_v34 = vld [vmem:[#allocation8 + $0x2c] sm:$0xf0]  ;;  %v3140_v39 = vld [vmem:[#allocation8 + $0x28] sm:$0xf]  ;;  %v4524_v29 = vor.u32 %v3532_v21, %v3340_v18  ;;  %v3531_v46 = vld [vmem:[#allocation10 + $0xcc] sm:$0xf] }
 0x640   :  { %v1369_v11 = vmul.f32 0.5, %v1368_v12  ;;  %v1370_v19 = vadd.f32 1.0, %v3640_v36  ;;  %1712 = vmatpush.bf16.msra.mxu1 %v3181_v53  ;;  %v3157_v12 = vor.u32 %v3485_v63, %v3156_v24  ;;  %v3133_v15 = vor.u32 %v3480_v34, %v3132_v32  ;;  %v3126_v53 = vld [vmem:[#allocation8 + $0x18] sm:$0xf0]  ;;  %v3324_v24 = vld [vmem:[#allocation10 + $0xa0] sm:$0xf] }
 0x641   :  { %v3129_v58 = vor.u32 %v3475_v56, %v3126_v53  ;;  %v4532_v55 = vor.u32 %v3531_v46, %v3350_v50  ;;  %v3528_v63 = vld [vmem:[#allocation10 + $0xac] sm:$0xf0]  ;;  %v3529_v28 = vld [vmem:[#allocation10 + $0xb4] sm:$0xf0]  ;;  %v3527_v34 = vld [vmem:[#allocation10 + $0xac] sm:$0xf] }
 0x642   :  { %v1375_v44 = vmul.f32 %v1373_v16, %v1369_v11  ;;  %v1371_v2 = vmul.f32 0.5, %v1370_v19  ;;  %1741 = vmatpush.bf16.msra.mxu3 %v3173_v30  ;;  %v3481_v11 = vld [vmem:[#allocation8 + $0x34] sm:$0xf0]  ;;  %v3137_v16 = vor.u32 %v3478_v22, %v3134_v43  ;;  %v3116_v19 = vld [vmem:[#allocation8] sm:$0xf]  ;;  %v4541_v43 = vor.u32 %v3529_v28, %v3332_v14 }
 0x643   :  { %1728 = vmatpush.bf16.msra.mxu2 %v3153_v7  ;;  %v3141_v40 = vor.u32 %v3481_v11, %v3140_v39  ;;  %v3530_v30 = vld [vmem:[#allocation10 + $0xc4] sm:$0xf]  ;;  %v3334_v22 = vld [vmem:[#allocation10 + $0xb8] sm:$0xf0]  ;;  %v3524_v39 = vld [vmem:[#allocation10 + $0x8c] sm:$0xf0] }
 0x644   :  { %v4507_v3 = vadd.f32 %v1376_v60, %v1375_v44  ;;  %1713 = vmatpush.bf16.msra.mxu1 %v3165_v17  ;;  %v3479_v44 = vld [vmem:[#allocation8 + $0x2c] sm:$0xf]  ;;  %v3142_v60 = vld [vmem:[#allocation8 + $0x38] sm:$0xf0]  ;;  %v3526_v7 = vld [vmem:[#allocation10 + $0xa4] sm:$0xf] }
 0x645   :  { %v3145_v36 = vor.u32 %v3479_v44, %v3142_v60  ;;  %v3366_v17 = vld [vmem:[#allocation10 + $0xf8] sm:$0xf0]  ;;  %v3522_v11 = vld [vmem:[#allocation10 + $0x84] sm:$0xf]  ;;  %v3316_v44 = vld [vmem:[#allocation10 + $0x88] sm:$0xf] }
 0x646   :  { %3641 = vtanh.f32 %v4507_v3  ;;  %1742 = vmatpush.bf16.msra.mxu3 %v3157_v12  ;;  %v4522_v25 = vor.u32 %v3535_v10, %v3366_v17  ;;  %v3326_v12 = vld [vmem:[#allocation10 + $0xb0] sm:$0xf0]  ;;  %v3525_v60 = vld [vmem:[#allocation10 + $0x94] sm:$0xf0]  ;;  %v3518_v56 = vld [vmem:[#allocation10 + $0x64] sm:$0xf]  ;;  %v487_v17 = vadd.f32 %v4202_v52, %v294_v61 }
 0x647   :  { %1729 = vmatpush.bf16.msra.mxu2 %v3137_v16  ;;  %v4538_v32 = vor.u32 %v3526_v7, %v3326_v12  ;;  %v3310_v16 = vld [vmem:[#allocation10 + $0x90] sm:$0xf0]  ;;  %v3276_v10 = vld [vmem:[#allocation10 + $0x40] sm:$0xf]  ;;  %v3516_v21 = vld [vmem:[#allocation10 + $0x4c] sm:$0xf0] }
 0x648   :  { %1714 = vmatpush.bf16.msra.mxu1 %v3149_v51  ;;  %v4530_v51 = vor.u32 %v3533_v42, %v3348_v37  ;;  %v5013_v37 = vperm.slane %v4195_v45, 2  ;;  %v3284_v50 = vld [vmem:[#allocation10 + $0x48] sm:$0xf]  ;;  %v4581_v52 = vor.u32 %v3516_v21, %v3276_v10  ;;  %v3286_v14 = vld [vmem:[#allocation10 + $0x58] sm:$0xf0] }
 0x649   :  { %v3260_v28 = vld [vmem:[#allocation10 + $0x20] sm:$0xf]  ;;  %v3509_v21 = vld [vmem:[#allocation10 + $0x14] sm:$0xf0] }
 0x64a   :  { %1743 = vmatpush.bf16.msra.mxu3 %v3141_v40  ;;  %v4544_v40 = vor.u32 %v3527_v34, %v3334_v22  ;;  %v501_v42 = vadd.f32 %v4208_v54, %v5013_v37  ;;  %v3254_v37 = vld [vmem:[#allocation10 + $0x18] sm:$0xf0] }
 0x64c   :  { %v3642_v8 = vpop.eup %3641  ;;  %1715 = vmatpush.bf16.msra.mxu1 %v3133_v15  ;;  %v3308_v15 = vld [vmem:[#allocation10 + $0x80] sm:$0xf] }
 0x64d   :  { %v1379_v0 = vmul.f32 %v3642_v8, %v1371_v2  ;;  %v3476_v2 = vld [vmem:[#allocation8 + $0xc] sm:$0xf0]  ;;  %v3474_v8 = vld [vmem:[#allocation8 + $0x4] sm:$0xf] }
 0x64f   :  { %v1380_v27 = vpack.c.bf16 %v1379_v0, %v1379_v0  ;;  %v4512_v20 = vsel %vm1472_vm9, %v4500_v23, %v1379_v0  ;;  %v3193_v23 = vor.u32 %v3491_v6, %v3190_v4  ;;  %v3117_v0 = vor.u32 %v3476_v2, %v3116_v19  ;;  %v3318_v19 = vld [vmem:[#allocation10 + $0x98] sm:$0xf0] }
 0x650   :  { %v4514_v6 = vor.u32 %v3536_v59, %v3356_v57  ;;  %v4516_v4 = vor.u32 %v3534_v1, %v3358_v5  ;;  %v473_v2 = vadd.f32 %v4197_v47, %v293_v49  ;;  %v3292_v47 = vld [vmem:[#allocation10 + $0x60] sm:$0xf]  ;;  %v3520_v49 = vld [vmem:[#allocation10 + $0x6c] sm:$0xf0]  ;;  %v3294_v57 = vld [vmem:[#allocation10 + $0x70] sm:$0xf0] }
 0x651   :  { %v1382_v35 = vshrl.u32 %v1380_v27, 16  ;;  %1754 = vmatpush.bf16.msrb.mxu0 %v3193_v23  ;;  %v3118_v27 = vld [vmem:[#allocation8 + $0x10] sm:$0xf0]  ;;  %1716 = vmatpush.bf16.msra.mxu1 %v3117_v0  ;;  %v3364_v23 = vld [vmem:[#allocation10 + $0xe8] sm:$0xf]  ;;  %v4553_v0 = vor.u32 %v3522_v11, %v3310_v16  ;;  %v4563_v53 = vor.u32 %v3520_v49, %v3292_v47  ;;  %v4566_v1 = vor.u32 %v3518_v56, %v3294_v57 }
 0x652   :  { %v3121_v62 = vor.u32 %v3474_v8, %v3118_v27  ;;  %v4518_v13 = vor.u32 %v3537_v9, %v3364_v23  ;;  %v4551_v8 = vor.u32 %v3524_v39, %v3308_v15  ;;  %v3521_v59 = vld [vmem:[#allocation10 + $0x74] sm:$0xf0]  ;;  %v3519_v23 = vld [vmem:[#allocation10 + $0x6c] sm:$0xf]  ;;  %v3302_v9 = vld [vmem:[#allocation10 + $0x78] sm:$0xf0] }
 0x653   :  { %v1384_v26 = vrot.slane %v1382_v35, 3  ;;  %v3124_v35 = vld [vmem:[#allocation8 + $0x8] sm:$0xf]  ;;  %v4574_v18 = vor.u32 %v3519_v23, %v3302_v9  ;;  %v3512_v15 = vld [vmem:[#allocation10 + $0x2c] sm:$0xf0] }
 0x654   :  { %1730 = vmatpush.bf16.msra.mxu2 %v3121_v62  ;;  %v3510_v39 = vld [vmem:[#allocation10 + $0x24] sm:$0xf]  ;;  %v3262_v11 = vld [vmem:[#allocation10 + $0x30] sm:$0xf0]  ;;  %v3270_v47 = vld [vmem:[#allocation10 + $0x38] sm:$0xf0]  ;;  %v4596_v56 = vor.u32 %v3512_v15, %v3260_v28 }
 0x655   :  { %1394 = vmatmul.bf16.vlgmr.msrb.gmra.mxu1 %v1384_v26  ;;  %1407 = vmatmul.bf16.vlgmr.msrb.gmra.mxu2 %v1384_v26  ;;  %v4598_v57 = vor.u32 %v3510_v39, %v3262_v11  ;;  %v3246_v9 = vld [vmem:[#allocation10 + $0x10] sm:$0xf0] }
 0x656   :  { %1420 = vmatmul.bf16.vlgmr.msrb.gmra.mxu3 %v1384_v26  ;;  %1433 = vmatmul.bf16.vlgmr.msra.gmra.mxu0 %v1384_v26  ;;  %v3477_v26 = vld [vmem:[#allocation8 + $0x14] sm:$0xf0] }
 0x657   :  { %1755 = vmatpush.bf16.msrb.mxu0 %v3177_v41  ;;  %v3125_v38 = vor.u32 %v3477_v26, %v3124_v35  ;;  %1925 = vmatpush.bf16.msrb.mxu1 %v4514_v6  ;;  %v4527_v41 = vor.u32 %v3530_v30, %v3342_v33  ;;  %v4556_v35 = vor.u32 %v3525_v60, %v3316_v44  ;;  %v3514_v30 = vld [vmem:[#allocation10 + $0x44] sm:$0xf]  ;;  %v3278_v33 = vld [vmem:[#allocation10 + $0x50] sm:$0xf0] }
 0x658   :  { %1938 = vmatpush.bf16.msrb.mxu2 %v4516_v4  ;;  %v4583_v61 = vor.u32 %v3514_v30, %v3278_v33  ;;  %v3507_v33 = vld [vmem:[#allocation10 + $0xc] sm:$0xf] }
 0x659   :  { %1744 = vmatpush.bf16.msra.mxu3 %v3125_v38  ;;  %v4616_v28 = vor.u32 %v3507_v33, %v3254_v37 }
 0x65b   :  { %1756 = vmatpush.bf16.msrb.mxu0 %v3161_v31  ;;  %1926 = vmatpush.bf16.msrb.mxu1 %v4524_v29  ;;  %v4536_v31 = vor.u32 %v3528_v63, %v3324_v24  ;;  %v3517_v24 = vld [vmem:[#allocation10 + $0x54] sm:$0xf0]  ;;  %v3515_v63 = vld [vmem:[#allocation10 + $0x4c] sm:$0xf] }
 0x65c   :  { %1939 = vmatpush.bf16.msrb.mxu2 %v4527_v41  ;;  %v4586_v54 = vor.u32 %v3517_v24, %v3284_v50  ;;  %v4589_v60 = vor.u32 %v3515_v63, %v3286_v14 }
 0x65d   :  { %1951 = vmatpush.bf16.msrb.mxu3 %v4518_v13 }
 0x65f   :  { %1757 = vmatpush.bf16.msrb.mxu0 %v3145_v36  ;;  %v3523_v36 = vld [vmem:[#allocation10 + $0x8c] sm:$0xf]  ;;  %1927 = vmatpush.bf16.msrb.mxu1 %v4536_v31 }
 0x660   :  { %1940 = vmatpush.bf16.msrb.mxu2 %v4538_v32  ;;  %v4559_v38 = vor.u32 %v3523_v36, %v3318_v19  ;;  %v3268_v36 = vld [vmem:[#allocation10 + $0x28] sm:$0xf]  ;;  %v3513_v19 = vld [vmem:[#allocation10 + $0x34] sm:$0xf0] }
 0x661   :  { %1952 = vmatpush.bf16.msrb.mxu3 %v4530_v51  ;;  %v4601_v23 = vor.u32 %v3513_v19, %v3268_v36 }
 0x663   :  { %1758 = vmatpush.bf16.msrb.mxu0 %v3129_v58  ;;  %1928 = vmatpush.bf16.msrb.mxu1 %v4551_v8  ;;  %v3300_v58 = vld [vmem:[#allocation10 + $0x68] sm:$0xf] }
 0x664   :  { %1941 = vmatpush.bf16.msrb.mxu2 %v4553_v0  ;;  %v4568_v5 = vor.u32 %v3521_v59, %v3300_v58  ;;  %v3244_v58 = vld [vmem:[#allocation10] sm:$0xf] }
 0x665   :  { %1953 = vmatpush.bf16.msrb.mxu3 %v4541_v43 }
 0x667   :  { %1964 = vmatpush.bf16.msra.mxu0 %v4522_v25  ;;  %1929 = vmatpush.bf16.msrb.mxu1 %v4563_v53 }
 0x668   :  { %1942 = vmatpush.bf16.msrb.mxu2 %v4566_v1 }
 0x669   :  { %1954 = vmatpush.bf16.msrb.mxu3 %v4556_v35 }
 0x66b   :  { %1965 = vmatpush.bf16.msra.mxu0 %v4532_v55  ;;  %1930 = vmatpush.bf16.msrb.mxu1 %v4581_v52 }
 0x66c   :  { %1943 = vmatpush.bf16.msrb.mxu2 %v4583_v61 }
 0x66d   :  { %1955 = vmatpush.bf16.msrb.mxu3 %v4568_v5 }
 0x66f   :  { %1966 = vmatpush.bf16.msra.mxu0 %v4544_v40  ;;  %1931 = vmatpush.bf16.msrb.mxu1 %v4596_v56 }
 0x670   :  { %1944 = vmatpush.bf16.msrb.mxu2 %v4598_v57 }
 0x671   :  { %1956 = vmatpush.bf16.msrb.mxu3 %v4586_v54 }
 0x673   :  { %1967 = vmatpush.bf16.msra.mxu0 %v4559_v38 }
 0x675   :  { %1957 = vmatpush.bf16.msrb.mxu3 %v4601_v23 }
 0x677   :  { %1968 = vmatpush.bf16.msra.mxu0 %v4574_v18 }
 0x67b   :  { %1969 = vmatpush.bf16.msra.mxu0 %v4589_v60 }
 0x6d2   :  { %v1395_v27 = vpop.f32.mrf.mxu1 }
 0x6d3   :  { %v1438_v26 = vadd.f32 %v1395_v27, %v473_v2  ;;  %v1434_v62 = vpop.f32.mrf.mxu0  ;;  %v5014_v2 = vperm.slane %v4195_v45, 3  ;;  %v3508_v45 = vld [vmem:[#allocation10 + $0xc] sm:$0xf0] }
 0x6d5   :  { %3643 = vtanh.f32 %v1438_v26  ;;  %v515_v27 = vadd.f32 %v4199_v48, %v5014_v2  ;;  %v3511_v26 = vld [vmem:[#allocation10 + $0x2c] sm:$0xf]  ;;  %v3506_v48 = vld [vmem:[#allocation10 + $0x4] sm:$0xf] }
 0x6d6   :  { %v4604_v10 = vor.u32 %v3511_v26, %v3270_v47  ;;  %v4610_v24 = vor.u32 %v3506_v48, %v3246_v9  ;;  %v1538_v26 = vld [vmem:[%s5005_s7] sm:$0xf] }
 0x6d7   :  { %v1441_v59 = vadd.f32 %v1434_v62, %v515_v27  ;;  %v4608_v62 = vor.u32 %v3508_v45, %v3244_v58 }
 0x6d8   :  { %v1408_v46 = vpop.f32.mrf.mxu2  ;;  %1970 = vmatpush.bf16.msra.mxu0 %v4604_v10  ;;  %1945 = vmatpush.bf16.msrb.mxu2 %v4610_v24 }
 0x6d9   :  { %v1439_v7 = vadd.f32 %v1408_v46, %v487_v17  ;;  %v1421_v12 = vpop.f32.mrf.mxu3  ;;  %v3252_v17 = vld [vmem:[#allocation10 + $0x8] sm:$0xf]  ;;  %1932 = vmatpush.bf16.msrb.mxu1 %v4608_v62 }
 0x6da   :  { %v1440_v34 = vadd.f32 %v1421_v12, %v501_v42  ;;  %v1397_v22 = vpop.f32.mrf.mxu1  ;;  %v4613_v12 = vor.u32 %v3509_v21, %v3252_v17  ;;  %v1542_v21 = vperm.slane %v1538_v26, 1 }
 0x6db   :  { %v3644_v16 = vpop.eup %3643  ;;  %3645 = vtanh.f32 %v1439_v7  ;;  %v1436_v44 = vpop.f32.mrf.mxu0  ;;  %v1453_v22 = vrot.slane %v4507_v3, 7  ;;  %v5015_v3 = vmov 0  }
 0x6dc   :  { %3647 = vtanh.f32 %v1440_v34  ;;  %v1446_v49 = vadd.f32 1.0, %v3644_v16  ;;  %1958 = vmatpush.bf16.msrb.mxu3 %v4613_v12  ;;  %1971 = vmatpush.bf16.msra.mxu0 %v4616_v28 }
 0x6dd   :  { %3649 = vtanh.f32 %v1441_v59  ;;  %v1544_v59 = vperm.slane %v1538_v26, 3 }
 0x6de   :  { %v1447_v46 = vmul.f32 0.5, %v1446_v49  ;;  %v1541_v49 = vperm.slane %v1538_v26, 0 }
 0x6e0   :  { %v1410_v30 = vpop.f32.mrf.mxu2 }
 0x6e1   :  { %v3646_v42 = vpop.eup %3645  ;;  %v1423_v50 = vpop.f32.mrf.mxu3  ;;  %v1543_v30 = vperm.slane %v1538_v26, 2 }
 0x6e2   :  { %v3648_v63 = vpop.eup %3647  ;;  %v1448_v7 = vadd.f32 1.0, %v3646_v42 }
 0x6e3   :  { %v1456_v14 = vmul.f32 %v3648_v63, %v1447_v46  ;;  %v3650_v39 = vpop.eup %3649 }
 0x6e4   :  { %v1449_v34 = vmul.f32 0.5, %v1448_v7  ;;  %v1450_v16 = vadd.f32 1.0, %v3650_v39 }
 0x6e6   :  { %v1455_v15 = vmul.f32 %v1453_v22, %v1449_v34  ;;  %v1451_v44 = vmul.f32 0.5, %v1450_v16 }
 0x6e8   :  { %v1457_v11 = vadd.f32 %v1456_v14, %v1455_v15 }
 0x6ea   :  { %3651 = vtanh.f32 %v1457_v11 }
 0x6f0   :  { %v3652_v36 = vpop.eup %3651 }
 0x6f1   :  { %v1459_v19 = vmul.f32 %v3652_v36, %v1451_v44 }
 0x6f3   :  { %v1539_v2 = vpack.c.bf16 %v1459_v19, %v4512_v20 }
 0x6f5   :  { %1717 = vmatmul.bf16.vlgmr.msra.gmra.mxu1 %v1539_v2  ;;  %1731 = vmatmul.bf16.vlgmr.msra.gmra.mxu2 %v1539_v2 }
 0x6f6   :  { %1745 = vmatmul.bf16.vlgmr.msra.gmra.mxu3 %v1539_v2  ;;  %1759 = vmatmul.bf16.vlgmr.msrb.gmra.mxu0 %v1539_v2 }
 0x6f7   :  { %1997 = vmatpush.bf16.msra.mxu1 %v4514_v6  ;;  %2010 = vmatpush.bf16.msra.mxu2 %v4516_v4 }
 0x6f8   :  { %2023 = vmatpush.bf16.msra.mxu3 %v4518_v13  ;;  %2036 = vmatpush.bf16.msrb.mxu0 %v4522_v25 }
 0x6fb   :  { %1998 = vmatpush.bf16.msra.mxu1 %v4524_v29  ;;  %2011 = vmatpush.bf16.msra.mxu2 %v4527_v41 }
 0x6fc   :  { %2024 = vmatpush.bf16.msra.mxu3 %v4530_v51  ;;  %2037 = vmatpush.bf16.msrb.mxu0 %v4532_v55 }
 0x6ff   :  { %1999 = vmatpush.bf16.msra.mxu1 %v4536_v31  ;;  %2012 = vmatpush.bf16.msra.mxu2 %v4538_v32 }
 0x700   :  { %2025 = vmatpush.bf16.msra.mxu3 %v4541_v43  ;;  %2038 = vmatpush.bf16.msrb.mxu0 %v4544_v40 }
 0x703   :  { %2000 = vmatpush.bf16.msra.mxu1 %v4551_v8  ;;  %2013 = vmatpush.bf16.msra.mxu2 %v4553_v0 }
 0x704   :  { %2026 = vmatpush.bf16.msra.mxu3 %v4556_v35  ;;  %2039 = vmatpush.bf16.msrb.mxu0 %v4559_v38 }
 0x705   :  { %1933 = vmatmul.bf16.vlgmr.msrb.gmra.mxu1 %v5015_v3  ;;  %1946 = vmatmul.bf16.vlgmr.msrb.gmra.mxu2 %v5015_v3 }
 0x706   :  { %1959 = vmatmul.bf16.vlgmr.msrb.gmra.mxu3 %v5015_v3  ;;  %1972 = vmatmul.bf16.vlgmr.msra.gmra.mxu0 %v5015_v3 }
 0x707   :  { %2001 = vmatpush.bf16.msra.mxu1 %v4563_v53  ;;  %2014 = vmatpush.bf16.msra.mxu2 %v4566_v1 }
 0x708   :  { %2027 = vmatpush.bf16.msra.mxu3 %v4568_v5  ;;  %2040 = vmatpush.bf16.msrb.mxu0 %v4574_v18 }
 0x70b   :  { %2002 = vmatpush.bf16.msra.mxu1 %v4581_v52  ;;  %2015 = vmatpush.bf16.msra.mxu2 %v4583_v61 }
 0x70c   :  { %2028 = vmatpush.bf16.msra.mxu3 %v4586_v54  ;;  %2041 = vmatpush.bf16.msrb.mxu0 %v4589_v60 }
 0x70f   :  { %2003 = vmatpush.bf16.msra.mxu1 %v4596_v56  ;;  %2016 = vmatpush.bf16.msra.mxu2 %v4598_v57 }
 0x710   :  { %2029 = vmatpush.bf16.msra.mxu3 %v4601_v23  ;;  %2042 = vmatpush.bf16.msrb.mxu0 %v4604_v10 }
 0x713   :  { %2004 = vmatpush.bf16.msra.mxu1 %v4608_v62  ;;  %2017 = vmatpush.bf16.msra.mxu2 %v4610_v24 }
 0x714   :  { %2030 = vmatpush.bf16.msra.mxu3 %v4613_v12  ;;  %2043 = vmatpush.bf16.msrb.mxu0 %v4616_v28 }
 0x717   :  { %2088 = vmatpush.bf16.msrb.mxu1 %v4514_v6  ;;  %2101 = vmatpush.bf16.msrb.mxu2 %v4516_v4 }
 0x718   :  { %2114 = vmatpush.bf16.msrb.mxu3 %v4518_v13  ;;  %2127 = vmatpush.bf16.msra.mxu0 %v4522_v25 }
 0x71b   :  { %2089 = vmatpush.bf16.msrb.mxu1 %v4524_v29  ;;  %2102 = vmatpush.bf16.msrb.mxu2 %v4527_v41 }
 0x71c   :  { %2115 = vmatpush.bf16.msrb.mxu3 %v4530_v51  ;;  %2128 = vmatpush.bf16.msra.mxu0 %v4532_v55 }
 0x71f   :  { %2090 = vmatpush.bf16.msrb.mxu1 %v4536_v31  ;;  %2103 = vmatpush.bf16.msrb.mxu2 %v4538_v32 }
 0x720   :  { %2116 = vmatpush.bf16.msrb.mxu3 %v4541_v43  ;;  %2129 = vmatpush.bf16.msra.mxu0 %v4544_v40 }
 0x723   :  { %2091 = vmatpush.bf16.msrb.mxu1 %v4551_v8  ;;  %2104 = vmatpush.bf16.msrb.mxu2 %v4553_v0 }
 0x724   :  { %2117 = vmatpush.bf16.msrb.mxu3 %v4556_v35  ;;  %2130 = vmatpush.bf16.msra.mxu0 %v4559_v38 }
 0x727   :  { %2092 = vmatpush.bf16.msrb.mxu1 %v4563_v53  ;;  %2105 = vmatpush.bf16.msrb.mxu2 %v4566_v1 }
 0x728   :  { %2118 = vmatpush.bf16.msrb.mxu3 %v4568_v5  ;;  %2131 = vmatpush.bf16.msra.mxu0 %v4574_v18 }
 0x72b   :  { %2093 = vmatpush.bf16.msrb.mxu1 %v4581_v52  ;;  %2106 = vmatpush.bf16.msrb.mxu2 %v4583_v61 }
 0x72c   :  { %2119 = vmatpush.bf16.msrb.mxu3 %v4586_v54  ;;  %2132 = vmatpush.bf16.msra.mxu0 %v4589_v60 }
 0x72f   :  { %2094 = vmatpush.bf16.msrb.mxu1 %v4596_v56  ;;  %2107 = vmatpush.bf16.msrb.mxu2 %v4598_v57 }
 0x730   :  { %2120 = vmatpush.bf16.msrb.mxu3 %v4601_v23  ;;  %2133 = vmatpush.bf16.msra.mxu0 %v4604_v10 }
 0x733   :  { %2095 = vmatpush.bf16.msrb.mxu1 %v4608_v62  ;;  %2108 = vmatpush.bf16.msrb.mxu2 %v4610_v24 }
 0x734   :  { %2121 = vmatpush.bf16.msrb.mxu3 %v4613_v12  ;;  %2134 = vmatpush.bf16.msra.mxu0 %v4616_v28 }
 0x772   :  { %v1718_v20 = vpop.f32.mrf.mxu1 }
 0x773   :  { %v1760_v27 = vpop.f32.mrf.mxu0  ;;  %v4699_v37 = vadd.f32 %v1718_v20, %v1541_v49 }
 0x774   :  { %v4712_v19 = vadd.f32 %v1760_v27, %v1544_v59 }
 0x778   :  { %v1732_v47 = vpop.f32.mrf.mxu2 }
 0x779   :  { %v1746_v58 = vpop.f32.mrf.mxu3  ;;  %v4706_v34 = vadd.f32 %v1732_v47, %v1542_v21 }
 0x77a   :  { %v1720_v45 = vpop.f32.mrf.mxu1  ;;  %v4708_v22 = vadd.f32 %v1746_v58, %v1543_v30 }
 0x77b   :  { %v4695_v48 = vadd.f32 %v1720_v45, %v1541_v49  ;;  %v1762_v9 = vpop.f32.mrf.mxu0 }
 0x77c   :  { %v4697_v17 = vadd.f32 %v1762_v9, %v1544_v59 }
 0x780   :  { %v1734_v33 = vpop.f32.mrf.mxu2 }
 0x781   :  { %v4701_v42 = vadd.f32 %v1734_v33, %v1542_v21  ;;  %v1748_v46 = vpop.f32.mrf.mxu3 }
 0x782   :  { %v4703_v50 = vadd.f32 %v1748_v46, %v1543_v30  ;;  %v1934_v63 = vpop.f32.mrf.mxu1 }
 0x783   :  { %v1977_v7 = vadd.f32 %v1934_v63, %v4699_v37  ;;  %v1973_v14 = vpop.f32.mrf.mxu0 }
 0x784   :  { %v1980_v3 = vadd.f32 %v1973_v14, %v4712_v19 }
 0x785   :  { %3653 = vtanh.f32 %v1977_v7 }
 0x788   :  { %v1947_v15 = vpop.f32.mrf.mxu2 }
 0x789   :  { %v1978_v39 = vadd.f32 %v1947_v15, %v4706_v34  ;;  %v1960_v11 = vpop.f32.mrf.mxu3 }
 0x78a   :  { %v1979_v16 = vadd.f32 %v1960_v11, %v4708_v22  ;;  %v1936_v44 = vpop.f32.mrf.mxu1 }
 0x78b   :  { %3655 = vtanh.f32 %v1978_v39  ;;  %v1975_v36 = vpop.f32.mrf.mxu0  ;;  %v3654_v2 = vpop.eup %3653 }
 0x78c   :  { %3657 = vtanh.f32 %v1979_v16  ;;  %v1985_v20 = vadd.f32 1.0, %v3654_v2 }
 0x78d   :  { %3659 = vtanh.f32 %v1980_v3 }
 0x78e   :  { %v1986_v9 = vmul.f32 0.5, %v1985_v20 }
 0x790   :  { %v1949_v26 = vpop.f32.mrf.mxu2 }
 0x791   :  { %v3656_v47 = vpop.eup %3655  ;;  %v1962_v49 = vpop.f32.mrf.mxu3 }
 0x792   :  { %v1987_v58 = vadd.f32 1.0, %v3656_v47  ;;  %v3658_v45 = vpop.eup %3657 }
 0x793   :  { %v1992_v33 = vmul.f32 %v3658_v45, %v1986_v9  ;;  %v3660_v46 = vpop.eup %3659 }
 0x794   :  { %v1988_v21 = vmul.f32 0.5, %v1987_v58  ;;  %v1989_v27 = vadd.f32 1.0, %v3660_v46 }
 0x796   :  { %v1991_v30 = vmul.f32 0.0, %v1988_v21  ;;  %v1990_v59 = vmul.f32 0.5, %v1989_v27 }
 0x798   :  { %v4715_v63 = vadd.f32 %v1992_v33, %v1991_v30 }
 0x79a   :  { %3661 = vtanh.f32 %v4715_v63 }
 0x7a0   :  { %v3662_v7 = vpop.eup %3661 }
 0x7a1   :  { %v4718_v14 = vmul.f32 %v3662_v7, %v1990_v59 }
 0x7a3   :  { %v1996_v15 = vpack.c.bf16 %v4718_v14, %v4718_v14 }
 0x7a5   :  { %2005 = vmatmul.bf16.vlgmr.msra.gmra.mxu1 %v1996_v15  ;;  %2018 = vmatmul.bf16.vlgmr.msra.gmra.mxu2 %v1996_v15 }
 0x7a6   :  { %2031 = vmatmul.bf16.vlgmr.msra.gmra.mxu3 %v1996_v15  ;;  %2044 = vmatmul.bf16.vlgmr.msrb.gmra.mxu0 %v1996_v15 }
 0x7a7   :  { %2178 = vmatpush.bf16.msra.mxu1 %v4514_v6  ;;  %2191 = vmatpush.bf16.msra.mxu2 %v4516_v4 }
 0x7a8   :  { %2204 = vmatpush.bf16.msra.mxu3 %v4518_v13  ;;  %2217 = vmatpush.bf16.msrb.mxu0 %v4522_v25 }
 0x7ab   :  { %2179 = vmatpush.bf16.msra.mxu1 %v4524_v29  ;;  %2192 = vmatpush.bf16.msra.mxu2 %v4527_v41 }
 0x7ac   :  { %2205 = vmatpush.bf16.msra.mxu3 %v4530_v51  ;;  %2218 = vmatpush.bf16.msrb.mxu0 %v4532_v55 }
 0x7af   :  { %2180 = vmatpush.bf16.msra.mxu1 %v4536_v31  ;;  %2193 = vmatpush.bf16.msra.mxu2 %v4538_v32 }
 0x7b0   :  { %2206 = vmatpush.bf16.msra.mxu3 %v4541_v43  ;;  %2219 = vmatpush.bf16.msrb.mxu0 %v4544_v40 }
 0x7b3   :  { %2181 = vmatpush.bf16.msra.mxu1 %v4551_v8  ;;  %2194 = vmatpush.bf16.msra.mxu2 %v4553_v0 }
 0x7b4   :  { %2207 = vmatpush.bf16.msra.mxu3 %v4556_v35  ;;  %2220 = vmatpush.bf16.msrb.mxu0 %v4559_v38 }
 0x7b7   :  { %2182 = vmatpush.bf16.msra.mxu1 %v4563_v53  ;;  %2195 = vmatpush.bf16.msra.mxu2 %v4566_v1 }
 0x7b8   :  { %2208 = vmatpush.bf16.msra.mxu3 %v4568_v5  ;;  %2221 = vmatpush.bf16.msrb.mxu0 %v4574_v18 }
 0x7bb   :  { %2183 = vmatpush.bf16.msra.mxu1 %v4581_v52  ;;  %2196 = vmatpush.bf16.msra.mxu2 %v4583_v61 }
 0x7bc   :  { %2209 = vmatpush.bf16.msra.mxu3 %v4586_v54  ;;  %2222 = vmatpush.bf16.msrb.mxu0 %v4589_v60 }
 0x7bf   :  { %2184 = vmatpush.bf16.msra.mxu1 %v4596_v56  ;;  %2197 = vmatpush.bf16.msra.mxu2 %v4598_v57 }
 0x7c0   :  { %2210 = vmatpush.bf16.msra.mxu3 %v4601_v23  ;;  %2223 = vmatpush.bf16.msrb.mxu0 %v4604_v10 }
 0x7c3   :  { %2185 = vmatpush.bf16.msra.mxu1 %v4608_v62  ;;  %2198 = vmatpush.bf16.msra.mxu2 %v4610_v24 }
 0x7c4   :  { %2211 = vmatpush.bf16.msra.mxu3 %v4613_v12  ;;  %2224 = vmatpush.bf16.msrb.mxu0 %v4616_v28 }
 0x822   :  { %v2006_v39 = vpop.f32.mrf.mxu1 }
 0x823   :  { %v2053_v11 = vrot.slane %v2006_v39, 7  ;;  %v2045_v16 = vpop.f32.mrf.mxu0 }
 0x824   :  { %v2056_v58 = vrot.slane %v2045_v16, 7 }
 0x825   :  { %v2061_v44 = vadd.f32 %v2053_v11, %v4699_v37  ;;  %v2076_v11 = vrot.slane %v4715_v63, 7 }
 0x826   :  { %v2064_v21 = vadd.f32 %v2056_v58, %v4712_v19 }
 0x827   :  { %3663 = vtanh.f32 %v2061_v44 }
 0x828   :  { %v2019_v36 = vpop.f32.mrf.mxu2 }
 0x829   :  { %v2054_v2 = vrot.slane %v2019_v36, 7  ;;  %v2032_v3 = vpop.f32.mrf.mxu3 }
 0x82a   :  { %v2055_v20 = vrot.slane %v2032_v3, 7  ;;  %v2008_v26 = vpop.f32.mrf.mxu1 }
 0x82b   :  { %v2062_v47 = vadd.f32 %v2054_v2, %v4706_v34  ;;  %v2047_v49 = vpop.f32.mrf.mxu0 }
 0x82c   :  { %v2063_v45 = vadd.f32 %v2055_v20, %v4708_v22 }
 0x82d   :  { %3665 = vtanh.f32 %v2062_v47  ;;  %v3664_v9 = vpop.eup %3663 }
 0x82e   :  { %3667 = vtanh.f32 %v2063_v45  ;;  %v2069_v46 = vadd.f32 1.0, %v3664_v9 }
 0x82f   :  { %3669 = vtanh.f32 %v2064_v21 }
 0x830   :  { %v2021_v30 = vpop.f32.mrf.mxu2  ;;  %v2070_v15 = vmul.f32 0.5, %v2069_v46 }
 0x831   :  { %v2034_v33 = vpop.f32.mrf.mxu3 }
 0x833   :  { %v3666_v27 = vpop.eup %3665 }
 0x834   :  { %v2071_v59 = vadd.f32 1.0, %v3666_v27  ;;  %v3668_v7 = vpop.eup %3667 }
 0x835   :  { %v2079_v16 = vmul.f32 %v3668_v7, %v2070_v15  ;;  %v3670_v36 = vpop.eup %3669 }
 0x836   :  { %v2072_v39 = vmul.f32 0.5, %v2071_v59  ;;  %v2073_v3 = vadd.f32 1.0, %v3670_v36 }
 0x838   :  { %v2078_v44 = vmul.f32 %v2076_v11, %v2072_v39  ;;  %v2074_v20 = vmul.f32 0.5, %v2073_v3 }
 0x83a   :  { %v4759_v2 = vadd.f32 %v2079_v16, %v2078_v44 }
 0x83c   :  { %3671 = vtanh.f32 %v4759_v2 }
 0x842   :  { %v3672_v26 = vpop.eup %3671 }
 0x843   :  { %v4762_v47 = vmul.f32 %v3672_v26, %v2074_v20 }
 0x845   :  { %v2083_v49 = vpack.c.bf16 %v4762_v47, %v4762_v47 }
 0x847   :  { %v2085_v58 = vshrl.u32 %v2083_v49, 16 }
 0x849   :  { %2096 = vmatmul.bf16.vlgmr.msrb.gmra.mxu1 %v2085_v58  ;;  %2109 = vmatmul.bf16.vlgmr.msrb.gmra.mxu2 %v2085_v58 }
 0x84a   :  { %2122 = vmatmul.bf16.vlgmr.msrb.gmra.mxu3 %v2085_v58  ;;  %2135 = vmatmul.bf16.vlgmr.msra.gmra.mxu0 %v2085_v58 }
 0x84b   :  { %2270 = vmatpush.bf16.msrb.mxu1 %v4514_v6  ;;  %2283 = vmatpush.bf16.msrb.mxu2 %v4516_v4 }
 0x84c   :  { %2296 = vmatpush.bf16.msrb.mxu3 %v4518_v13  ;;  %2309 = vmatpush.bf16.msra.mxu0 %v4522_v25 }
 0x84f   :  { %2271 = vmatpush.bf16.msrb.mxu1 %v4524_v29  ;;  %2284 = vmatpush.bf16.msrb.mxu2 %v4527_v41 }
 0x850   :  { %2297 = vmatpush.bf16.msrb.mxu3 %v4530_v51  ;;  %2310 = vmatpush.bf16.msra.mxu0 %v4532_v55 }
 0x853   :  { %2272 = vmatpush.bf16.msrb.mxu1 %v4536_v31  ;;  %2285 = vmatpush.bf16.msrb.mxu2 %v4538_v32 }
 0x854   :  { %2298 = vmatpush.bf16.msrb.mxu3 %v4541_v43  ;;  %2311 = vmatpush.bf16.msra.mxu0 %v4544_v40 }
 0x857   :  { %2273 = vmatpush.bf16.msrb.mxu1 %v4551_v8  ;;  %2286 = vmatpush.bf16.msrb.mxu2 %v4553_v0 }
 0x858   :  { %2299 = vmatpush.bf16.msrb.mxu3 %v4556_v35  ;;  %2312 = vmatpush.bf16.msra.mxu0 %v4559_v38 }
 0x85b   :  { %2274 = vmatpush.bf16.msrb.mxu1 %v4563_v53  ;;  %2287 = vmatpush.bf16.msrb.mxu2 %v4566_v1 }
 0x85c   :  { %2300 = vmatpush.bf16.msrb.mxu3 %v4568_v5  ;;  %2313 = vmatpush.bf16.msra.mxu0 %v4574_v18 }
 0x85f   :  { %2275 = vmatpush.bf16.msrb.mxu1 %v4581_v52  ;;  %2288 = vmatpush.bf16.msrb.mxu2 %v4583_v61 }
 0x860   :  { %2301 = vmatpush.bf16.msrb.mxu3 %v4586_v54  ;;  %2314 = vmatpush.bf16.msra.mxu0 %v4589_v60 }
 0x863   :  { %2276 = vmatpush.bf16.msrb.mxu1 %v4596_v56  ;;  %2289 = vmatpush.bf16.msrb.mxu2 %v4598_v57 }
 0x864   :  { %2302 = vmatpush.bf16.msrb.mxu3 %v4601_v23  ;;  %2315 = vmatpush.bf16.msra.mxu0 %v4604_v10 }
 0x867   :  { %2277 = vmatpush.bf16.msrb.mxu1 %v4608_v62  ;;  %2290 = vmatpush.bf16.msrb.mxu2 %v4610_v24 }
 0x868   :  { %2303 = vmatpush.bf16.msrb.mxu3 %v4613_v12  ;;  %2316 = vmatpush.bf16.msra.mxu0 %v4616_v28 }
 0x8c6   :  { %v2097_v63 = vpop.f32.mrf.mxu1 }
 0x8c7   :  { %v2144_v45 = vrot.slane %v2097_v63, 6  ;;  %v2136_v9 = vpop.f32.mrf.mxu0 }
 0x8c8   :  { %v2147_v39 = vrot.slane %v2136_v9, 6 }
 0x8c9   :  { %v2152_v21 = vadd.f32 %v2144_v45, %v4699_v37 }
 0x8ca   :  { %v2155_v16 = vadd.f32 %v2147_v39, %v4712_v19  ;;  %v2708_v39 = vsel %vm1460_vm3, %v4718_v14, %v4762_v47 }
 0x8cb   :  { %3673 = vtanh.f32 %v2152_v21  ;;  %v2167_v21 = vrot.slane %v4759_v2, 7 }
 0x8cc   :  { %v2110_v30 = vpop.f32.mrf.mxu2 }
 0x8cd   :  { %v2145_v33 = vrot.slane %v2110_v30, 6  ;;  %v2123_v46 = vpop.f32.mrf.mxu3 }
 0x8ce   :  { %v2146_v27 = vrot.slane %v2123_v46, 6  ;;  %v2099_v59 = vpop.f32.mrf.mxu1 }
 0x8cf   :  { %v2153_v7 = vadd.f32 %v2145_v33, %v4706_v34  ;;  %v2138_v15 = vpop.f32.mrf.mxu0 }
 0x8d0   :  { %v2154_v11 = vadd.f32 %v2146_v27, %v4708_v22 }
 0x8d1   :  { %3675 = vtanh.f32 %v2153_v7  ;;  %v3674_v44 = vpop.eup %3673 }
 0x8d2   :  { %3677 = vtanh.f32 %v2154_v11  ;;  %v2160_v20 = vadd.f32 1.0, %v3674_v44 }
 0x8d3   :  { %3679 = vtanh.f32 %v2155_v16 }
 0x8d4   :  { %v2112_v36 = vpop.f32.mrf.mxu2  ;;  %v2161_v63 = vmul.f32 0.5, %v2160_v20 }
 0x8d5   :  { %v2125_v3 = vpop.f32.mrf.mxu3 }
 0x8d7   :  { %v3676_v26 = vpop.eup %3675 }
 0x8d8   :  { %v2162_v49 = vadd.f32 1.0, %v3676_v26  ;;  %v3678_v58 = vpop.eup %3677 }
 0x8d9   :  { %v2170_v9 = vmul.f32 %v3678_v58, %v2161_v63  ;;  %v3680_v33 = vpop.eup %3679 }
 0x8da   :  { %v2163_v45 = vmul.f32 0.5, %v2162_v49  ;;  %v2164_v27 = vadd.f32 1.0, %v3680_v33 }
 0x8dc   :  { %v2169_v30 = vmul.f32 %v2167_v21, %v2163_v45  ;;  %v2165_v59 = vmul.f32 0.5, %v2164_v27 }
 0x8de   :  { %v4803_v46 = vadd.f32 %v2170_v9, %v2169_v30 }
 0x8e0   :  { %3681 = vtanh.f32 %v4803_v46 }
 0x8e6   :  { %v3682_v7 = vpop.eup %3681 }
 0x8e7   :  { %v2173_v15 = vmul.f32 %v3682_v7, %v2165_v59 }
 0x8e9   :  { %v2174_v11 = vpack.c.bf16 %v2173_v15, %v2173_v15  ;;  %v4810_v44 = vsel %vm1462_vm4, %v2708_v39, %v2173_v15 }
 0x8eb   :  { %v2176_v2 = vrot.slane %v2174_v11, 1 }
 0x8ed   :  { %2186 = vmatmul.bf16.vlgmr.msra.gmra.mxu1 %v2176_v2  ;;  %2199 = vmatmul.bf16.vlgmr.msra.gmra.mxu2 %v2176_v2 }
 0x8ee   :  { %2212 = vmatmul.bf16.vlgmr.msra.gmra.mxu3 %v2176_v2  ;;  %2225 = vmatmul.bf16.vlgmr.msrb.gmra.mxu0 %v2176_v2 }
 0x8ef   :  { %2360 = vmatpush.bf16.msra.mxu1 %v4514_v6  ;;  %2373 = vmatpush.bf16.msra.mxu2 %v4516_v4 }
 0x8f0   :  { %2386 = vmatpush.bf16.msra.mxu3 %v4518_v13  ;;  %2399 = vmatpush.bf16.msrb.mxu0 %v4522_v25 }
 0x8f3   :  { %2361 = vmatpush.bf16.msra.mxu1 %v4524_v29  ;;  %2374 = vmatpush.bf16.msra.mxu2 %v4527_v41 }
 0x8f4   :  { %2387 = vmatpush.bf16.msra.mxu3 %v4530_v51  ;;  %2400 = vmatpush.bf16.msrb.mxu0 %v4532_v55 }
 0x8f7   :  { %2362 = vmatpush.bf16.msra.mxu1 %v4536_v31  ;;  %2375 = vmatpush.bf16.msra.mxu2 %v4538_v32 }
 0x8f8   :  { %2388 = vmatpush.bf16.msra.mxu3 %v4541_v43  ;;  %2401 = vmatpush.bf16.msrb.mxu0 %v4544_v40 }
 0x8fb   :  { %2363 = vmatpush.bf16.msra.mxu1 %v4551_v8  ;;  %2376 = vmatpush.bf16.msra.mxu2 %v4553_v0 }
 0x8fc   :  { %2389 = vmatpush.bf16.msra.mxu3 %v4556_v35  ;;  %2402 = vmatpush.bf16.msrb.mxu0 %v4559_v38 }
 0x8ff   :  { %2364 = vmatpush.bf16.msra.mxu1 %v4563_v53  ;;  %2377 = vmatpush.bf16.msra.mxu2 %v4566_v1 }
 0x900   :  { %2390 = vmatpush.bf16.msra.mxu3 %v4568_v5  ;;  %2403 = vmatpush.bf16.msrb.mxu0 %v4574_v18 }
 0x903   :  { %2365 = vmatpush.bf16.msra.mxu1 %v4581_v52  ;;  %2378 = vmatpush.bf16.msra.mxu2 %v4583_v61 }
 0x904   :  { %2391 = vmatpush.bf16.msra.mxu3 %v4586_v54  ;;  %2404 = vmatpush.bf16.msrb.mxu0 %v4589_v60 }
 0x907   :  { %2366 = vmatpush.bf16.msra.mxu1 %v4596_v56  ;;  %2379 = vmatpush.bf16.msra.mxu2 %v4598_v57 }
 0x908   :  { %2392 = vmatpush.bf16.msra.mxu3 %v4601_v23  ;;  %2405 = vmatpush.bf16.msrb.mxu0 %v4604_v10 }
 0x90b   :  { %2367 = vmatpush.bf16.msra.mxu1 %v4608_v62  ;;  %2380 = vmatpush.bf16.msra.mxu2 %v4610_v24 }
 0x90c   :  { %2393 = vmatpush.bf16.msra.mxu3 %v4613_v12  ;;  %2406 = vmatpush.bf16.msrb.mxu0 %v4616_v28 }
 0x96a   :  { %v2187_v14 = vpop.f32.mrf.mxu1 }
 0x96b   :  { %v2234_v47 = vrot.slane %v2187_v14, 5  ;;  %v2226_v16 = vpop.f32.mrf.mxu0 }
 0x96c   :  { %v2237_v21 = vrot.slane %v2226_v16, 5 }
 0x96d   :  { %v2242_v36 = vadd.f32 %v2234_v47, %v4699_v37  ;;  %v2257_v47 = vrot.slane %v4803_v46, 7 }
 0x96e   :  { %v2245_v33 = vadd.f32 %v2237_v21, %v4712_v19 }
 0x96f   :  { %3683 = vtanh.f32 %v2242_v36 }
 0x970   :  { %v2200_v3 = vpop.f32.mrf.mxu2 }
 0x971   :  { %v2235_v20 = vrot.slane %v2200_v3, 5  ;;  %v2213_v26 = vpop.f32.mrf.mxu3 }
 0x972   :  { %v2236_v49 = vrot.slane %v2213_v26, 5  ;;  %v2189_v58 = vpop.f32.mrf.mxu1 }
 0x973   :  { %v2243_v63 = vadd.f32 %v2235_v20, %v4706_v34  ;;  %v2228_v45 = vpop.f32.mrf.mxu0 }
 0x974   :  { %v2244_v30 = vadd.f32 %v2236_v49, %v4708_v22 }
 0x975   :  { %3685 = vtanh.f32 %v2243_v63  ;;  %v3684_v9 = vpop.eup %3683 }
 0x976   :  { %3687 = vtanh.f32 %v2244_v30  ;;  %v2250_v7 = vadd.f32 1.0, %v3684_v9 }
 0x977   :  { %3689 = vtanh.f32 %v2245_v33 }
 0x978   :  { %v2202_v27 = vpop.f32.mrf.mxu2  ;;  %v2251_v2 = vmul.f32 0.5, %v2250_v7 }
 0x979   :  { %v2215_v59 = vpop.f32.mrf.mxu3 }
 0x97b   :  { %v3686_v15 = vpop.eup %3685 }
 0x97c   :  { %v2252_v39 = vadd.f32 1.0, %v3686_v15  ;;  %v3688_v11 = vpop.eup %3687 }
 0x97d   :  { %v2260_v16 = vmul.f32 %v3688_v11, %v2251_v2  ;;  %v3690_v3 = vpop.eup %3689 }
 0x97e   :  { %v2253_v14 = vmul.f32 0.5, %v2252_v39  ;;  %v2254_v26 = vadd.f32 1.0, %v3690_v3 }
 0x980   :  { %v2259_v36 = vmul.f32 %v2257_v47, %v2253_v14  ;;  %v2255_v49 = vmul.f32 0.5, %v2254_v26 }
 0x982   :  { %v4849_v20 = vadd.f32 %v2260_v16, %v2259_v36 }
 0x984   :  { %3691 = vtanh.f32 %v4849_v20 }
 0x98a   :  { %v3692_v58 = vpop.eup %3691 }
 0x98b   :  { %v2263_v63 = vmul.f32 %v3692_v58, %v2255_v49 }
 0x98d   :  { %v2264_v45 = vpack.c.bf16 %v2263_v63, %v2263_v63  ;;  %v4854_v21 = vsel %vm1464_vm5, %v4810_v44, %v2263_v63 }
 0x98f   :  { %v2266_v30 = vshrl.u32 %v2264_v45, 16 }
 0x991   :  { %v2268_v9 = vrot.slane %v2266_v30, 1 }
 0x993   :  { %2278 = vmatmul.bf16.vlgmr.msrb.gmra.mxu1 %v2268_v9  ;;  %2291 = vmatmul.bf16.vlgmr.msrb.gmra.mxu2 %v2268_v9 }
 0x994   :  { %2304 = vmatmul.bf16.vlgmr.msrb.gmra.mxu3 %v2268_v9  ;;  %2317 = vmatmul.bf16.vlgmr.msra.gmra.mxu0 %v2268_v9 }
 0x995   :  { %2452 = vmatpush.bf16.msrb.mxu1 %v4514_v6  ;;  %2465 = vmatpush.bf16.msrb.mxu2 %v4516_v4 }
 0x996   :  { %2478 = vmatpush.bf16.msrb.mxu3 %v4518_v13  ;;  %2491 = vmatpush.bf16.msra.mxu0 %v4522_v25 }
 0x999   :  { %2453 = vmatpush.bf16.msrb.mxu1 %v4524_v29  ;;  %2466 = vmatpush.bf16.msrb.mxu2 %v4527_v41 }
 0x99a   :  { %2479 = vmatpush.bf16.msrb.mxu3 %v4530_v51  ;;  %2492 = vmatpush.bf16.msra.mxu0 %v4532_v55 }
 0x99d   :  { %2454 = vmatpush.bf16.msrb.mxu1 %v4536_v31  ;;  %2467 = vmatpush.bf16.msrb.mxu2 %v4538_v32 }
 0x99e   :  { %2480 = vmatpush.bf16.msrb.mxu3 %v4541_v43  ;;  %2493 = vmatpush.bf16.msra.mxu0 %v4544_v40 }
 0x9a1   :  { %2455 = vmatpush.bf16.msrb.mxu1 %v4551_v8  ;;  %2468 = vmatpush.bf16.msrb.mxu2 %v4553_v0 }
 0x9a2   :  { %2481 = vmatpush.bf16.msrb.mxu3 %v4556_v35  ;;  %2494 = vmatpush.bf16.msra.mxu0 %v4559_v38 }
 0x9a5   :  { %2456 = vmatpush.bf16.msrb.mxu1 %v4563_v53  ;;  %2469 = vmatpush.bf16.msrb.mxu2 %v4566_v1 }
 0x9a6   :  { %2482 = vmatpush.bf16.msrb.mxu3 %v4568_v5  ;;  %2495 = vmatpush.bf16.msra.mxu0 %v4574_v18 }
 0x9a9   :  { %2457 = vmatpush.bf16.msrb.mxu1 %v4581_v52  ;;  %2470 = vmatpush.bf16.msrb.mxu2 %v4583_v61 }
 0x9aa   :  { %2483 = vmatpush.bf16.msrb.mxu3 %v4586_v54  ;;  %2496 = vmatpush.bf16.msra.mxu0 %v4589_v60 }
 0x9ad   :  { %2458 = vmatpush.bf16.msrb.mxu1 %v4596_v56  ;;  %2471 = vmatpush.bf16.msrb.mxu2 %v4598_v57 }
 0x9ae   :  { %2484 = vmatpush.bf16.msrb.mxu3 %v4601_v23  ;;  %2497 = vmatpush.bf16.msra.mxu0 %v4604_v10 }
 0x9b1   :  { %2459 = vmatpush.bf16.msrb.mxu1 %v4608_v62  ;;  %2472 = vmatpush.bf16.msrb.mxu2 %v4610_v24 }
 0x9b2   :  { %2485 = vmatpush.bf16.msrb.mxu3 %v4613_v12  ;;  %2498 = vmatpush.bf16.msra.mxu0 %v4616_v28 }
 0xa10   :  { %v2279_v46 = vpop.f32.mrf.mxu1 }
 0xa11   :  { %v2326_v44 = vrot.slane %v2279_v46, 4  ;;  %v2318_v33 = vpop.f32.mrf.mxu0 }
 0xa12   :  { %v2329_v47 = vrot.slane %v2318_v33, 4 }
 0xa13   :  { %v2334_v27 = vadd.f32 %v2326_v44, %v4699_v37  ;;  %v2349_v44 = vrot.slane %v4849_v20, 7 }
 0xa14   :  { %v2337_v3 = vadd.f32 %v2329_v47, %v4712_v19 }
 0xa15   :  { %3693 = vtanh.f32 %v2334_v27 }
 0xa16   :  { %v2292_v59 = vpop.f32.mrf.mxu2 }
 0xa17   :  { %v2327_v7 = vrot.slane %v2292_v59, 4  ;;  %v2305_v15 = vpop.f32.mrf.mxu3 }
 0xa18   :  { %v2328_v39 = vrot.slane %v2305_v15, 4  ;;  %v2281_v11 = vpop.f32.mrf.mxu1 }
 0xa19   :  { %v2335_v2 = vadd.f32 %v2327_v7, %v4706_v34  ;;  %v2320_v14 = vpop.f32.mrf.mxu0 }
 0xa1a   :  { %v2336_v36 = vadd.f32 %v2328_v39, %v4708_v22 }
 0xa1b   :  { %3695 = vtanh.f32 %v2335_v2  ;;  %v3694_v16 = vpop.eup %3693 }
 0xa1c   :  { %3697 = vtanh.f32 %v2336_v36  ;;  %v2342_v58 = vadd.f32 1.0, %v3694_v16 }
 0xa1d   :  { %3699 = vtanh.f32 %v2337_v3 }
 0xa1e   :  { %v2294_v26 = vpop.f32.mrf.mxu2  ;;  %v2343_v9 = vmul.f32 0.5, %v2342_v58 }
 0xa1f   :  { %v2307_v49 = vpop.f32.mrf.mxu3 }
 0xa21   :  { %v3696_v63 = vpop.eup %3695 }
 0xa22   :  { %v2344_v45 = vadd.f32 1.0, %v3696_v63  ;;  %v3698_v30 = vpop.eup %3697 }
 0xa23   :  { %v2352_v33 = vmul.f32 %v3698_v30, %v2343_v9  ;;  %v3700_v59 = vpop.eup %3699 }
 0xa24   :  { %v2345_v46 = vmul.f32 0.5, %v2344_v45  ;;  %v2346_v15 = vadd.f32 1.0, %v3700_v59 }
 0xa26   :  { %v2351_v27 = vmul.f32 %v2349_v44, %v2345_v46  ;;  %v2347_v39 = vmul.f32 0.5, %v2346_v15 }
 0xa28   :  { %v4893_v7 = vadd.f32 %v2352_v33, %v2351_v27 }
 0xa2a   :  { %3701 = vtanh.f32 %v4893_v7 }
 0xa30   :  { %v3702_v11 = vpop.eup %3701 }
 0xa31   :  { %v2355_v2 = vmul.f32 %v3702_v11, %v2347_v39 }
 0xa33   :  { %v2356_v14 = vpack.c.bf16 %v2355_v2, %v2355_v2  ;;  %v4898_v47 = vsel %vm1466_vm6, %v4854_v21, %v2355_v2 }
 0xa35   :  { %v2358_v36 = vrot.slane %v2356_v14, 2 }
 0xa37   :  { %2368 = vmatmul.bf16.vlgmr.msra.gmra.mxu1 %v2358_v36  ;;  %2381 = vmatmul.bf16.vlgmr.msra.gmra.mxu2 %v2358_v36 }
 0xa38   :  { %2394 = vmatmul.bf16.vlgmr.msra.gmra.mxu3 %v2358_v36  ;;  %2407 = vmatmul.bf16.vlgmr.msrb.gmra.mxu0 %v2358_v36 }
 0xa39   :  { %2542 = vmatpush.bf16.msra.mxu1 %v4514_v6  ;;  %2555 = vmatpush.bf16.msra.mxu2 %v4516_v4 }
 0xa3a   :  { %2568 = vmatpush.bf16.msra.mxu3 %v4518_v13  ;;  %2581 = vmatpush.bf16.msrb.mxu0 %v4522_v25 }
 0xa3d   :  { %2543 = vmatpush.bf16.msra.mxu1 %v4524_v29  ;;  %2556 = vmatpush.bf16.msra.mxu2 %v4527_v41 }
 0xa3e   :  { %2569 = vmatpush.bf16.msra.mxu3 %v4530_v51  ;;  %2582 = vmatpush.bf16.msrb.mxu0 %v4532_v55 }
 0xa41   :  { %2544 = vmatpush.bf16.msra.mxu1 %v4536_v31  ;;  %2557 = vmatpush.bf16.msra.mxu2 %v4538_v32 }
 0xa42   :  { %2570 = vmatpush.bf16.msra.mxu3 %v4541_v43  ;;  %2583 = vmatpush.bf16.msrb.mxu0 %v4544_v40 }
 0xa45   :  { %2545 = vmatpush.bf16.msra.mxu1 %v4551_v8  ;;  %2558 = vmatpush.bf16.msra.mxu2 %v4553_v0 }
 0xa46   :  { %2571 = vmatpush.bf16.msra.mxu3 %v4556_v35  ;;  %2584 = vmatpush.bf16.msrb.mxu0 %v4559_v38 }
 0xa49   :  { %2546 = vmatpush.bf16.msra.mxu1 %v4563_v53  ;;  %2559 = vmatpush.bf16.msra.mxu2 %v4566_v1 }
 0xa4a   :  { %2572 = vmatpush.bf16.msra.mxu3 %v4568_v5  ;;  %2585 = vmatpush.bf16.msrb.mxu0 %v4574_v18 }
 0xa4d   :  { %2547 = vmatpush.bf16.msra.mxu1 %v4581_v52  ;;  %2560 = vmatpush.bf16.msra.mxu2 %v4583_v61 }
 0xa4e   :  { %2573 = vmatpush.bf16.msra.mxu3 %v4586_v54  ;;  %2586 = vmatpush.bf16.msrb.mxu0 %v4589_v60 }
 0xa51   :  { %2548 = vmatpush.bf16.msra.mxu1 %v4596_v56  ;;  %2561 = vmatpush.bf16.msra.mxu2 %v4598_v57 }
 0xa52   :  { %2574 = vmatpush.bf16.msra.mxu3 %v4601_v23  ;;  %2587 = vmatpush.bf16.msrb.mxu0 %v4604_v10 }
 0xa55   :  { %2549 = vmatpush.bf16.msra.mxu1 %v4608_v62  ;;  %2562 = vmatpush.bf16.msra.mxu2 %v4610_v24 }
 0xa56   :  { %2575 = vmatpush.bf16.msra.mxu3 %v4613_v12  ;;  %2588 = vmatpush.bf16.msrb.mxu0 %v4616_v28 }
 0xab4   :  { %v2369_v20 = vpop.f32.mrf.mxu1 }
 0xab5   :  { %v2416_v21 = vrot.slane %v2369_v20, 3  ;;  %v2408_v16 = vpop.f32.mrf.mxu0 }
 0xab6   :  { %v2419_v46 = vrot.slane %v2408_v16, 3 }
 0xab7   :  { %v2424_v3 = vadd.f32 %v2416_v21, %v4699_v37  ;;  %v2439_v21 = vrot.slane %v4893_v7, 7 }
 0xab8   :  { %v2427_v33 = vadd.f32 %v2419_v46, %v4712_v19 }
 0xab9   :  { %3703 = vtanh.f32 %v2424_v3 }
 0xaba   :  { %v2382_v26 = vpop.f32.mrf.mxu2 }
 0xabb   :  { %v2417_v49 = vrot.slane %v2382_v26, 3  ;;  %v2395_v58 = vpop.f32.mrf.mxu3 }
 0xabc   :  { %v2418_v63 = vrot.slane %v2395_v58, 3  ;;  %v2371_v45 = vpop.f32.mrf.mxu1 }
 0xabd   :  { %v2425_v30 = vadd.f32 %v2417_v49, %v4706_v34  ;;  %v2410_v9 = vpop.f32.mrf.mxu0 }
 0xabe   :  { %v2426_v44 = vadd.f32 %v2418_v63, %v4708_v22 }
 0xabf   :  { %3705 = vtanh.f32 %v2425_v30  ;;  %v3704_v27 = vpop.eup %3703 }
 0xac0   :  { %3707 = vtanh.f32 %v2426_v44  ;;  %v2432_v39 = vadd.f32 1.0, %v3704_v27 }
 0xac1   :  { %3709 = vtanh.f32 %v2427_v33 }
 0xac2   :  { %v2384_v59 = vpop.f32.mrf.mxu2  ;;  %v2433_v36 = vmul.f32 0.5, %v2432_v39 }
 0xac3   :  { %v2397_v15 = vpop.f32.mrf.mxu3 }
 0xac5   :  { %v3706_v11 = vpop.eup %3705 }
 0xac6   :  { %v2434_v2 = vadd.f32 1.0, %v3706_v11  ;;  %v3708_v14 = vpop.eup %3707 }
 0xac7   :  { %v2442_v16 = vmul.f32 %v3708_v14, %v2433_v36  ;;  %v3710_v26 = vpop.eup %3709 }
 0xac8   :  { %v2435_v20 = vmul.f32 0.5, %v2434_v2  ;;  %v2436_v58 = vadd.f32 1.0, %v3710_v26 }
 0xaca   :  { %v2441_v3 = vmul.f32 %v2439_v21, %v2435_v20  ;;  %v2437_v63 = vmul.f32 0.5, %v2436_v58 }
 0xacc   :  { %v4937_v49 = vadd.f32 %v2442_v16, %v2441_v3 }
 0xace   :  { %3711 = vtanh.f32 %v4937_v49 }
 0xad4   :  { %v3712_v45 = vpop.eup %3711 }
 0xad5   :  { %v2445_v30 = vmul.f32 %v3712_v45, %v2437_v63 }
 0xad7   :  { %v2446_v9 = vpack.c.bf16 %v2445_v30, %v2445_v30  ;;  %v4942_v46 = vsel %vm1468_vm7, %v4898_v47, %v2445_v30 }
 0xad9   :  { %v2448_v44 = vshrl.u32 %v2446_v9, 16 }
 0xadb   :  { %v2450_v27 = vrot.slane %v2448_v44, 2 }
 0xadd   :  { %2460 = vmatmul.bf16.vlgmr.msrb.gmra.mxu1 %v2450_v27  ;;  %2473 = vmatmul.bf16.vlgmr.msrb.gmra.mxu2 %v2450_v27 }
 0xade   :  { %2486 = vmatmul.bf16.vlgmr.msrb.gmra.mxu3 %v2450_v27  ;;  %2499 = vmatmul.bf16.vlgmr.msra.gmra.mxu0 %v2450_v27 }
 0xadf   :  { %2634 = vmatpush.bf16.msrb.mxu1 %v4514_v6  ;;  %2647 = vmatpush.bf16.msrb.mxu2 %v4516_v4 }
 0xae0   :  { %2660 = vmatpush.bf16.msrb.mxu3 %v4518_v13  ;;  %2673 = vmatpush.bf16.msra.mxu0 %v4522_v25 }
 0xae3   :  { %2635 = vmatpush.bf16.msrb.mxu1 %v4524_v29  ;;  %2648 = vmatpush.bf16.msrb.mxu2 %v4527_v41 }
 0xae4   :  { %2661 = vmatpush.bf16.msrb.mxu3 %v4530_v51  ;;  %2674 = vmatpush.bf16.msra.mxu0 %v4532_v55 }
 0xae7   :  { %2636 = vmatpush.bf16.msrb.mxu1 %v4536_v31  ;;  %2649 = vmatpush.bf16.msrb.mxu2 %v4538_v32 }
 0xae8   :  { %2662 = vmatpush.bf16.msrb.mxu3 %v4541_v43  ;;  %2675 = vmatpush.bf16.msra.mxu0 %v4544_v40 }
 0xaeb   :  { %2637 = vmatpush.bf16.msrb.mxu1 %v4551_v8  ;;  %2650 = vmatpush.bf16.msrb.mxu2 %v4553_v0 }
 0xaec   :  { %2663 = vmatpush.bf16.msrb.mxu3 %v4556_v35  ;;  %2676 = vmatpush.bf16.msra.mxu0 %v4559_v38 }
 0xaef   :  { %2638 = vmatpush.bf16.msrb.mxu1 %v4563_v53  ;;  %2651 = vmatpush.bf16.msrb.mxu2 %v4566_v1 }
 0xaf0   :  { %2664 = vmatpush.bf16.msrb.mxu3 %v4568_v5  ;;  %2677 = vmatpush.bf16.msra.mxu0 %v4574_v18 }
 0xaf3   :  { %2639 = vmatpush.bf16.msrb.mxu1 %v4581_v52  ;;  %2652 = vmatpush.bf16.msrb.mxu2 %v4583_v61 }
 0xaf4   :  { %2665 = vmatpush.bf16.msrb.mxu3 %v4586_v54  ;;  %2678 = vmatpush.bf16.msra.mxu0 %v4589_v60  ;;  %v2531_v60 = vrot.slane %v4937_v49, 7 }
 0xaf7   :  { %2640 = vmatpush.bf16.msrb.mxu1 %v4596_v56  ;;  %2653 = vmatpush.bf16.msrb.mxu2 %v4598_v57 }
 0xaf8   :  { %2666 = vmatpush.bf16.msrb.mxu3 %v4601_v23  ;;  %2679 = vmatpush.bf16.msra.mxu0 %v4604_v10 }
 0xafb   :  { %2641 = vmatpush.bf16.msrb.mxu1 %v4608_v62  ;;  %2654 = vmatpush.bf16.msrb.mxu2 %v4610_v24 }
 0xafc   :  { %2667 = vmatpush.bf16.msrb.mxu3 %v4613_v12  ;;  %2680 = vmatpush.bf16.msra.mxu0 %v4616_v28 }
 0xb5a   :  { %v2461_v6 = vpop.f32.mrf.mxu1 }
 0xb5b   :  { %v2508_v4 = vrot.slane %v2461_v6, 2  ;;  %v2500_v13 = vpop.f32.mrf.mxu0 }
 0xb5c   :  { %v2511_v40 = vrot.slane %v2500_v13, 2 }
 0xb5d   :  { %v2516_v25 = vadd.f32 %v2508_v4, %v4699_v37 }
 0xb5e   :  { %v2519_v35 = vadd.f32 %v2511_v40, %v4712_v19  ;;  %v3545_v40 = vld [vmem:[#allocation11 + $0x38] sm:$0xff] }
 0xb5f   :  { %3713 = vtanh.f32 %v2516_v25 }
 0xb60   :  { %v2474_v29 = vpop.f32.mrf.mxu2 }
 0xb61   :  { %v2509_v41 = vrot.slane %v2474_v29, 2  ;;  %v2487_v51 = vpop.f32.mrf.mxu3 }
 0xb62   :  { %v2510_v55 = vrot.slane %v2487_v51, 2  ;;  %v2463_v31 = vpop.f32.mrf.mxu1 }
 0xb63   :  { %v2517_v32 = vadd.f32 %v2509_v41, %v4706_v34  ;;  %v2502_v43 = vpop.f32.mrf.mxu0 }
 0xb64   :  { %v2518_v8 = vadd.f32 %v2510_v55, %v4708_v22 }
 0xb65   :  { %3715 = vtanh.f32 %v2517_v32  ;;  %v3714_v0 = vpop.eup %3713 }
 0xb66   :  { %3717 = vtanh.f32 %v2518_v8  ;;  %v2524_v1 = vadd.f32 1.0, %v3714_v0  ;;  %v3544_v8 = vld [vmem:[#allocation11 + $0x30] sm:$0xff]  ;;  %v3543_v0 = vld [vmem:[#allocation11 + $0x28] sm:$0xff] }
 0xb67   :  { %3719 = vtanh.f32 %v2519_v35  ;;  %v3542_v35 = vld [vmem:[#allocation11 + $0x20] sm:$0xff] }
 0xb68   :  { %v2476_v38 = vpop.f32.mrf.mxu2  ;;  %v2525_v61 = vmul.f32 0.5, %v2524_v1  ;;  %v3539_v1 = vld [vmem:[#allocation11 + $0x8] sm:$0xff] }
 0xb69   :  { %v2489_v53 = vpop.f32.mrf.mxu3  ;;  %v3541_v38 = vld [vmem:[#allocation11 + $0x18] sm:$0xff] }
 0xb6a   :  { %v3540_v53 = vld [vmem:[#allocation11 + $0x10] sm:$0xff] }
 0xb6b   :  { %v3716_v5 = vpop.eup %3715 }
 0xb6c   :  { %v2526_v18 = vadd.f32 1.0, %v3716_v5  ;;  %v3718_v52 = vpop.eup %3717  ;;  %v3538_v5 = vld [vmem:[#allocation11] sm:$0xff] }
 0xb6d   :  { %v2534_v57 = vmul.f32 %v3718_v52, %v2525_v61  ;;  %v3720_v23 = vpop.eup %3719 }
 0xb6e   :  { %v2527_v54 = vmul.f32 0.5, %v2526_v18  ;;  %v2528_v62 = vadd.f32 1.0, %v3720_v23 }
 0xb70   :  { %v2533_v56 = vmul.f32 %v2531_v60, %v2527_v54  ;;  %v2529_v24 = vmul.f32 0.5, %v2528_v62 }
 0xb72   :  { %v2535_v10 = vadd.f32 %v2534_v57, %v2533_v56 }
 0xb74   :  { %3721 = vtanh.f32 %v2535_v10  ;;  %v2621_v4 = vrot.slane %v2535_v10, 7 }
 0xb7a   :  { %v3722_v12 = vpop.eup %3721 }
 0xb7b   :  { %v2537_v28 = vmul.f32 %v3722_v12, %v2529_v24 }
 0xb7d   :  { %v2538_v7 = vpack.c.bf16 %v2537_v28, %v2537_v28  ;;  %v2713_v47 = vsel %vm1470_vm8, %v4942_v46, %v2537_v28 }
 0xb7f   :  { %v2540_v33 = vrot.slane %v2538_v7, 3 }
 0xb81   :  { %2550 = vmatmul.bf16.vlgmr.msra.gmra.mxu1 %v2540_v33  ;;  %2563 = vmatmul.bf16.vlgmr.msra.gmra.mxu2 %v2540_v33 }
 0xb82   :  { %2576 = vmatmul.bf16.vlgmr.msra.gmra.mxu3 %v2540_v33  ;;  %2589 = vmatmul.bf16.vlgmr.msrb.gmra.mxu0 %v2540_v33 }
 0xb83   :  { %2784 = vmatpush.bf16.msra.mxu1 %v3545_v40 }
 0xb87   :  { %2785 = vmatpush.bf16.msra.mxu1 %v3544_v8 }
 0xb8b   :  { %2786 = vmatpush.bf16.msra.mxu1 %v3543_v0 }
 0xb8f   :  { %2787 = vmatpush.bf16.msra.mxu1 %v3542_v35 }
 0xb93   :  { %2788 = vmatpush.bf16.msra.mxu1 %v3541_v38 }
 0xb97   :  { %2789 = vmatpush.bf16.msra.mxu1 %v3540_v53 }
 0xb9b   :  { %2790 = vmatpush.bf16.msra.mxu1 %v3539_v1 }
 0xb9f   :  { %2791 = vmatpush.bf16.msra.mxu1 %v3538_v5 }
 0xbfe   :  { %v2551_v59 = vpop.f32.mrf.mxu1 }
 0xbff   :  { %v2598_v15 = vrot.slane %v2551_v59, 1  ;;  %v2590_v39 = vpop.f32.mrf.mxu0 }
 0xc00   :  { %v2601_v26 = vrot.slane %v2590_v39, 1 }
 0xc01   :  { %v2606_v11 = vadd.f32 %v2598_v15, %v4699_v37 }
 0xc02   :  { %v2609_v63 = vadd.f32 %v2601_v26, %v4712_v19 }
 0xc03   :  { %3723 = vtanh.f32 %v2606_v11 }
 0xc04   :  { %v2564_v2 = vpop.f32.mrf.mxu2 }
 0xc05   :  { %v2599_v14 = vrot.slane %v2564_v2, 1  ;;  %v2577_v36 = vpop.f32.mrf.mxu3 }
 0xc06   :  { %v2600_v20 = vrot.slane %v2577_v36, 1  ;;  %v2553_v21 = vpop.f32.mrf.mxu1 }
 0xc07   :  { %v2607_v3 = vadd.f32 %v2599_v14, %v4706_v34  ;;  %v2592_v16 = vpop.f32.mrf.mxu0 }
 0xc08   :  { %v2608_v49 = vadd.f32 %v2600_v20, %v4708_v22 }
 0xc09   :  { %3725 = vtanh.f32 %v2607_v3  ;;  %v3724_v58 = vpop.eup %3723 }
 0xc0a   :  { %3727 = vtanh.f32 %v2608_v49  ;;  %v2614_v37 = vadd.f32 1.0, %v3724_v58 }
 0xc0b   :  { %3729 = vtanh.f32 %v2609_v63 }
 0xc0c   :  { %v2566_v45 = vpop.f32.mrf.mxu2  ;;  %v2615_v27 = vmul.f32 0.5, %v2614_v37 }
 0xc0d   :  { %v2579_v30 = vpop.f32.mrf.mxu3 }
 0xc0f   :  { %v3726_v9 = vpop.eup %3725 }
 0xc10   :  { %v2616_v46 = vadd.f32 1.0, %v3726_v9  ;;  %v3728_v44 = vpop.eup %3727 }
 0xc11   :  { %v2624_v13 = vmul.f32 %v3728_v44, %v2615_v27  ;;  %v3730_v25 = vpop.eup %3729 }
 0xc12   :  { %v2617_v6 = vmul.f32 0.5, %v2616_v46  ;;  %v2618_v22 = vadd.f32 1.0, %v3730_v25 }
 0xc14   :  { %v2623_v34 = vmul.f32 %v2621_v4, %v2617_v6  ;;  %v2619_v41 = vmul.f32 0.5, %v2618_v22 }
 0xc16   :  { %v2625_v29 = vadd.f32 %v2624_v13, %v2623_v34 }
 0xc18   :  { %3731 = vtanh.f32 %v2625_v29  ;;  %v2701_v39 = vrot.slane %v2625_v29, 7 }
 0xc1e   :  { %v3732_v51 = vpop.eup %3731 }
 0xc1f   :  { %v2627_v55 = vmul.f32 %v3732_v51, %v2619_v41 }
 0xc21   :  { %v2628_v19 = vpack.c.bf16 %v2627_v55, %v2627_v55  ;;  %v2714_v31 = vsel %vm1472_vm9, %v2713_v47, %v2627_v55 }
 0xc23   :  { %v2630_v32 = vshrl.u32 %v2628_v19, 16 }
 0xc25   :  { %v2632_v43 = vrot.slane %v2630_v32, 3 }
 0xc27   :  { %2642 = vmatmul.bf16.vlgmr.msrb.gmra.mxu1 %v2632_v43  ;;  %2655 = vmatmul.bf16.vlgmr.msrb.gmra.mxu2 %v2632_v43 }
 0xc28   :  { %2668 = vmatmul.bf16.vlgmr.msrb.gmra.mxu3 %v2632_v43  ;;  %2681 = vmatmul.bf16.vlgmr.msra.gmra.mxu0 %v2632_v43 }
 0xca4   :  { %v2643_v18 = vpop.f32.mrf.mxu1 }
 0xca5   :  { %v2686_v52 = vadd.f32 %v2643_v18, %v4695_v48  ;;  %v2682_v61 = vpop.f32.mrf.mxu0 }
 0xca6   :  { %v2689_v12 = vadd.f32 %v2682_v61, %v4697_v17  ;;  %v3562_v17 = vld [vmem:[%s5007_s9] ss:$0 sm:$0xff] }
 0xca7   :  { %3733 = vtanh.f32 %v2686_v52 }
 0xcaa   :  { %v2656_v54 = vpop.f32.mrf.mxu2 }
 0xcab   :  { %v2687_v60 = vadd.f32 %v2656_v54, %v4701_v42  ;;  %v2669_v56 = vpop.f32.mrf.mxu3 }
 0xcac   :  { %v2688_v57 = vadd.f32 %v2669_v56, %v4703_v50  ;;  %v2645_v23 = vpop.f32.mrf.mxu1 }
 0xcad   :  { %v3734_v10 = vpop.eup %3733  ;;  %3735 = vtanh.f32 %v2687_v60  ;;  %v2684_v62 = vpop.f32.mrf.mxu0 }
 0xcae   :  { %3737 = vtanh.f32 %v2688_v57  ;;  %v2694_v24 = vadd.f32 1.0, %v3734_v10 }
 0xcaf   :  { %3739 = vtanh.f32 %v2689_v12 }
 0xcb0   :  { %v2695_v48 = vmul.f32 0.5, %v2694_v24 }
 0xcb2   :  { %v2658_v28 = vpop.f32.mrf.mxu2 }
 0xcb3   :  { %v3736_v7 = vpop.eup %3735  ;;  %v2671_v47 = vpop.f32.mrf.mxu3 }
 0xcb4   :  { %v3738_v33 = vpop.eup %3737  ;;  %v2696_v59 = vadd.f32 1.0, %v3736_v7 }
 0xcb5   :  { %v2704_v15 = vmul.f32 %v3738_v33, %v2695_v48  ;;  %v3740_v50 = vpop.eup %3739 }
 0xcb6   :  { %v2697_v42 = vmul.f32 0.5, %v2696_v59  ;;  %v2698_v14 = vadd.f32 1.0, %v3740_v50 }
 0xcb8   :  { %v2703_v11 = vmul.f32 %v2701_v39, %v2697_v42  ;;  %v2699_v36 = vmul.f32 0.5, %v2698_v14 }
 0xcba   :  { %v2705_v2 = vadd.f32 %v2704_v15, %v2703_v11 }
 0xcbc   :  { %3741 = vtanh.f32 %v2705_v2 }
 0xcc2   :  { %v3742_v20 = vpop.eup %3741 }
 0xcc3   :  { %v2707_v21 = vmul.f32 %v3742_v20, %v2699_v36 }
 0xcc5   :  { %v2715_v3 = vpack.c.bf16 %v2707_v21, %v2714_v31 }
 0xcc7   :  { %2792 = vmatmul.bf16.vlgmr.msra.gmra.mxu1 %v2715_v3 }
 0xd44   :  { %v2793_v16 = vpop.f32.mrf.mxu1 }
 0xd45   :  { %v2794_v26 = vadd.f32 %v3562_v17, %v2793_v16 }
 0xd47   :  { %2798 = vst [vmem:[#allocation13] sm:$0xff] %v2794_v26 }
 0xd4c   :  { %v2795_v49 = vpop.f32.mrf.mxu1 }
 0xd4d   :  { %v2796_v58 = vadd.f32 %v3562_v17, %v2795_v49 }
 0xd4f   :  { %2799 = vst [vmem:[#allocation13 + $0x8] sm:$0x1] %v2796_v58 }
 0xd50   :  { %2812 = dma.vmem_to_hbm [thread:$0]  %s2805_s27, 256, %s2807_s30, [#allocation4], %s3934_s11, %s3934_s11, %s3935_s12  }
 0xd51   :  { %3919 = dma.done.wait [#allocation4], 256  }
 0xd52   :  { %3920 = vsyncadd [#allocation4], 4294967040 }
 0xd53   :  { %2817 = vsyncpa [#allocation3], 1 }
 0xd54   :  { %2818 = vsyncpa [#allocation6], 1 }
 0xd55   :  { %2819 = vsyncpa [#allocation9], 1 }
 0xd56   :  { %2820 = vsyncpa [#allocation12], 1 }
 0xd57   :  { %2821 = vsyncpa [#allocation4], 1 }

</bundles_post_ra>
